<compile_context>
chip_gen: v6e
topology: v6e:2x2x1
jax: 0.10.0
libtpu: 0.0.40
codegen_flags: <defaults>
</compile_context>

<pallas_src>
import functools

import jax
import jax.numpy as jnp
from jax.experimental import pallas as pl
from jax.experimental.pallas import tpu as pltpu


def _upsample_conv_kernel(x_ref, w_ref, b_ref, o_ref, *, C, H, W):
    """Fused nearest-2x upsample + 3x3 'same' conv, subpixel form, q fused into lanes.

    x_ref: (NB, H+2, (W+2)*2C) zero-padded, column-doubled input,
                               lane = beta*2C + r*C + ci  (r in {0,1} identical copies)
    w_ref: (8*(2C-1), H, 2WC)  per-(p,i,j,delta) weight rows, pre-broadcast over H,
                               lane = b*2C + q*C + co
    b_ref: (H, 2WC)            bias, pre-broadcast over H, same lane layout
    o_ref: (NB, H, 2, 2WC)     o[n, a, p, b*2C + q*C + co] = y[n, co, 2a+p, 2b+q]
    """
    NB = x_ref.shape[0]
    L = 2 * W * C                 # 128 dense lanes for the demo shape
    nd = 2 * C - 1                # number of channel deltas co - ci

    for p in range(2):            # output row phase
        # bias-initialised, full-lane accumulator (q=0 / q=1 fused in the lane axis)
        acc = jnp.broadcast_to(b_ref[...].astype(jnp.float32), (NB, H, L))
        for i in range(2):        # 2x2 subpixel row tap
            r0 = p + i            # padded-row offset for output row a
            for j in range(2):    # 2x2 subpixel column tap
                for dd in range(nd):          # channel delta = co - ci
                    delta = dd - (C - 1)
                    t = C + 2 * C * j - delta             # lane window start (>= 1)
                    widx = ((p * 2 + i) * 2 + j) * nd + dd
                    win = x_ref[:, r0:r0 + H, t:t + L].astype(jnp.float32)
                    acc = acc + win * w_ref[widx]         # 128-lane VPU FMA
        o_ref[:, :, p, :] = acc.astype(o_ref.dtype)


def upsample_forward(x_nchw, weight_oihw, bias):
    """Upsample.forward (dims=2, use_conv=True): nearest 2x upsample + 3x3 'same' conv.

    x_nchw:      (N, C, H, W)
    weight_oihw: (C, C, 3, 3)   (PyTorch Conv2d layout)
    bias:        (C,)
    returns:     (N, C, 2H, 2W)
    """
    N, C, H, W = x_nchw.shape
    L = 2 * W * C
    nd = 2 * C - 1
    LX = (W + 2) * 2 * C

    # ---- input layout: NHWC, spatial zero-pad 1, column-doubled, flattened lanes ----
    x = jnp.transpose(x_nchw, (0, 2, 3, 1))               # (N, H, W, C)
    x = jnp.pad(x, ((0, 0), (1, 1), (1, 1), (0, 0)))      # (N, H+2, W+2, C)
    x = jnp.repeat(x, 2, axis=2)                          # (N, H+2, 2(W+2), C)
    x = x.reshape(N, H + 2, LX)                           # lane = beta*2C + r*C + ci

    # ---- fold nearest-2x upsample into the 3x3 conv: 2x2 subpixel taps per phase ----
    # S[p, i, ky] = 1 iff 3x3 row-tap ky contributes to subpixel row-tap i of phase p.
    S = jnp.array([[[1., 0., 0.], [0., 1., 1.]],
                   [[1., 1., 0.], [0., 0., 1.]]], dtype=jnp.float32)
    wf = weight_oihw.astype(jnp.float32)                  # (co, ci, ky, kx)
    Wc = jnp.einsum('pia,qjb,ocab->pijqco', S, S, wf)     # (2,2,2,2,Cin,Cout)

    # ---- per-lane weight rows over lane = b*2C + q*C + co, one per (p,i,j,delta) ----
    co_idx = jnp.arange(C)
    delta = jnp.arange(nd) - (C - 1)
    ci_idx = co_idx[None, :] - delta[:, None]             # (nd, C): ci = co - delta
    valid = (ci_idx >= 0) & (ci_idx < C)
    ci_c = jnp.clip(ci_idx, 0, C - 1)
    co_b = jnp.broadcast_to(co_idx[None, :], ci_c.shape)
    wpat = jnp.where(valid, Wc[:, :, :, :, ci_c, co_b], 0.0)   # (2,2,2,2,nd,C) [p,i,j,q,dd,co]
    wpat = jnp.transpose(wpat, (0, 1, 2, 4, 3, 5))             # [p,i,j,dd,q,co]
    wrow = jnp.tile(wpat.reshape(8 * nd, 2 * C), (1, W))       # (8*nd, 2WC), lane=(b,q,co)
    wvec = jnp.broadcast_to(wrow[:, None, :], (8 * nd, H, L))  # pre-broadcast over H
    brow = jnp.tile(jnp.tile(bias.astype(jnp.float32), 2), W)  # (2WC,), lane=(b,q,co)
    bvec = jnp.broadcast_to(brow[None, :], (H, L))

    # ---- grid: >=2 steps when possible (v7x megacore + input/output pipelining) ----
    if N >= 2 and N % 2 == 0:
        NB = N // 2
    else:
        NB = N
    grid = (N // NB,)

    kernel = functools.partial(_upsample_conv_kernel, C=C, H=H, W=W)
    out_k = pl.pallas_call(
        kernel,
        out_shape=jax.ShapeDtypeStruct((N, H, 2, L), x_nchw.dtype),
        grid_spec=pltpu.PrefetchScalarGridSpec(
            num_scalar_prefetch=0,
            grid=grid,
            in_specs=[
                pl.BlockSpec((NB, H + 2, LX), lambda nb: (nb, 0, 0)),
                pl.BlockSpec((8 * nd, H, L), lambda nb: (0, 0, 0)),
                pl.BlockSpec((H, L), lambda nb: (0, 0)),
            ],
            out_specs=pl.BlockSpec((NB, H, 2, L), lambda nb: (nb, 0, 0, 0)),
        ),
        compiler_params=pltpu.CompilerParams(
            dimension_semantics=("parallel",),
            vmem_limit_bytes=32 * 1024 * 1024,   # explicit (v5e scoped default is 16 MiB)
        ),
    )(x, wvec, bvec)

    # ---- output is already NHWC-ordered: (n, a, p, (b, q, co)) -> (N, 2H, 2W, C) ----
    out_nhwc = out_k.reshape(N, 2 * H, 2 * W, C)          # pure reshape, no data movement
    return jnp.transpose(out_nhwc, (0, 3, 1, 2))          # single NHWC->NCHW transpose


if __name__ == "__main__":
    key = jax.random.PRNGKey(0)
    k_x, k_w, k_b = jax.random.split(key, 3)

    N, C, H, W = 2, 4, 16, 16
    x = jax.random.normal(k_x, (N, C, H, W), dtype=jnp.float32)

    # Deterministic Conv2d-style init: U(-bound, bound), bound = 1/sqrt(fan_in)
    fan_in = C * 3 * 3
    bound = 1.0 / (fan_in ** 0.5)
    weight = jax.random.uniform(k_w, (C, C, 3, 3), minval=-bound, maxval=bound,
                                dtype=jnp.float32)
    bias = jax.random.uniform(k_b, (C,), minval=-bound, maxval=bound,
                              dtype=jnp.float32)

    out = jax.jit(upsample_forward)(x, weight, bias)
    out = jax.block_until_ready(out)
    assert out.shape == (N, C, 2 * H, 2 * W), out.shape

    # Cross-check against XLA reference (nearest upsample + conv).
    x_up = jnp.repeat(jnp.repeat(x, 2, axis=2), 2, axis=3)
    ref = jax.lax.conv_general_dilated(
        x_up, weight, window_strides=(1, 1), padding=((1, 1), (1, 1)),
        dimension_numbers=("NCHW", "OIHW", "NCHW")) + bias[None, :, None, None]
    assert jnp.allclose(out, ref, atol=1e-4, rtol=1e-4)

    print("KERNEL_OK")
</pallas_src>

<mosaic_0001>
module attributes {stable_mosaic.version = 11 : i64} {
  func.func @_upsample_conv_kernel(%arg0: i32, %arg1: memref<1x18x144xf32, #tpu.memory_space<vmem>>, %arg2: memref<56x16x128xf32, #tpu.memory_space<vmem>>, %arg3: memref<16x128xf32, #tpu.memory_space<vmem>>, %arg4: memref<1x16x2x128xf32, #tpu.memory_space<vmem>>) attributes {dimension_semantics = [#tpu.dimension_semantics<parallel>], iteration_bounds = array<i64: 2>, scalar_prefetch = 0 : i64, scratch_operands = 0 : i64, tpu.core_type = #tpu.core_type<tc>, window_params = [{transform_indices = @transform_0, window_bounds = array<i64: 1, 18, 144>}, {pipeline_mode = #tpu.pipeline_mode<synchronous>, transform_indices = @transform_1, window_bounds = array<i64: 56, 16, 128>}, {pipeline_mode = #tpu.pipeline_mode<synchronous>, transform_indices = @transform_2, window_bounds = array<i64: 16, 128>}, {transform_indices = @transform_3, window_bounds = array<i64: 1, 16, 2, 128>}]} {
    %c0 = arith.constant 0 : index
    %c0_0 = arith.constant 0 : index
    %0 = vector.load %arg3[%c0, %c0_0] : memref<16x128xf32, #tpu.memory_space<vmem>>, vector<16x128xf32>
    %1 = vector.shape_cast %0 : vector<16x128xf32> to vector<1x16x128xf32>
    %c0_1 = arith.constant 0 : index
    %c0_2 = arith.constant 0 : index
    %c7 = arith.constant 7 : index
    %2 = vector.load %arg1[%c0_1, %c0_2, %c7] : memref<1x18x144xf32, #tpu.memory_space<vmem>>, vector<1x16x128xf32>
    %c0_3 = arith.constant 0 : index
    %c0_4 = arith.constant 0 : index
    %c0_5 = arith.constant 0 : index
    %3 = vector.load %arg2[%c0_3, %c0_4, %c0_5] : memref<56x16x128xf32, #tpu.memory_space<vmem>>, vector<1x16x128xf32>
    %4 = vector.shape_cast %3 : vector<1x16x128xf32> to vector<16x128xf32>
    %5 = vector.shape_cast %4 : vector<16x128xf32> to vector<1x16x128xf32>
    %6 = arith.mulf %2, %5 : vector<1x16x128xf32>
    %7 = arith.addf %1, %6 : vector<1x16x128xf32>
    %c0_6 = arith.constant 0 : index
    %c0_7 = arith.constant 0 : index
    %c6 = arith.constant 6 : index
    %8 = vector.load %arg1[%c0_6, %c0_7, %c6] : memref<1x18x144xf32, #tpu.memory_space<vmem>>, vector<1x16x128xf32>
    %c1 = arith.constant 1 : index
    %c0_8 = arith.constant 0 : index
    %c0_9 = arith.constant 0 : index
    %9 = vector.load %arg2[%c1, %c0_8, %c0_9] : memref<56x16x128xf32, #tpu.memory_space<vmem>>, vector<1x16x128xf32>
    %10 = vector.shape_cast %9 : vector<1x16x128xf32> to vector<16x128xf32>
    %11 = vector.shape_cast %10 : vector<16x128xf32> to vector<1x16x128xf32>
    %12 = arith.mulf %8, %11 : vector<1x16x128xf32>
    %13 = arith.addf %7, %12 : vector<1x16x128xf32>
    %c0_10 = arith.constant 0 : index
    %c0_11 = arith.constant 0 : index
    %c5 = arith.constant 5 : index
    %14 = vector.load %arg1[%c0_10, %c0_11, %c5] : memref<1x18x144xf32, #tpu.memory_space<vmem>>, vector<1x16x128xf32>
    %c2 = arith.constant 2 : index
    %c0_12 = arith.constant 0 : index
    %c0_13 = arith.constant 0 : index
    %15 = vector.load %arg2[%c2, %c0_12, %c0_13] : memref<56x16x128xf32, #tpu.memory_space<vmem>>, vector<1x16x128xf32>
    %16 = vector.shape_cast %15 : vector<1x16x128xf32> to vector<16x128xf32>
    %17 = vector.shape_cast %16 : vector<16x128xf32> to vector<1x16x128xf32>
    %18 = arith.mulf %14, %17 : vector<1x16x128xf32>
    %19 = arith.addf %13, %18 : vector<1x16x128xf32>
    %c0_14 = arith.constant 0 : index
    %c0_15 = arith.constant 0 : index
    %c4 = arith.constant 4 : index
    %20 = vector.load %arg1[%c0_14, %c0_15, %c4] : memref<1x18x144xf32, #tpu.memory_space<vmem>>, vector<1x16x128xf32>
    %c3 = arith.constant 3 : index
    %c0_16 = arith.constant 0 : index
    %c0_17 = arith.constant 0 : index
    %21 = vector.load %arg2[%c3, %c0_16, %c0_17] : memref<56x16x128xf32, #tpu.memory_space<vmem>>, vector<1x16x128xf32>
    %22 = vector.shape_cast %21 : vector<1x16x128xf32> to vector<16x128xf32>
    %23 = vector.shape_cast %22 : vector<16x128xf32> to vector<1x16x128xf32>
    %24 = arith.mulf %20, %23 : vector<1x16x128xf32>
    %25 = arith.addf %19, %24 : vector<1x16x128xf32>
    %c0_18 = arith.constant 0 : index
    %c0_19 = arith.constant 0 : index
    %c3_20 = arith.constant 3 : index
    %26 = vector.load %arg1[%c0_18, %c0_19, %c3_20] : memref<1x18x144xf32, #tpu.memory_space<vmem>>, vector<1x16x128xf32>
    %c4_21 = arith.constant 4 : index
    %c0_22 = arith.constant 0 : index
    %c0_23 = arith.constant 0 : index
    %27 = vector.load %arg2[%c4_21, %c0_22, %c0_23] : memref<56x16x128xf32, #tpu.memory_space<vmem>>, vector<1x16x128xf32>
    %28 = vector.shape_cast %27 : vector<1x16x128xf32> to vector<16x128xf32>
    %29 = vector.shape_cast %28 : vector<16x128xf32> to vector<1x16x128xf32>
    %30 = arith.mulf %26, %29 : vector<1x16x128xf32>
    %31 = arith.addf %25, %30 : vector<1x16x128xf32>
    %c0_24 = arith.constant 0 : index
    %c0_25 = arith.constant 0 : index
    %c2_26 = arith.constant 2 : index
    %32 = vector.load %arg1[%c0_24, %c0_25, %c2_26] : memref<1x18x144xf32, #tpu.memory_space<vmem>>, vector<1x16x128xf32>
    %c5_27 = arith.constant 5 : index
    %c0_28 = arith.constant 0 : index
    %c0_29 = arith.constant 0 : index
    %33 = vector.load %arg2[%c5_27, %c0_28, %c0_29] : memref<56x16x128xf32, #tpu.memory_space<vmem>>, vector<1x16x128xf32>
    %34 = vector.shape_cast %33 : vector<1x16x128xf32> to vector<16x128xf32>
    %35 = vector.shape_cast %34 : vector<16x128xf32> to vector<1x16x128xf32>
    %36 = arith.mulf %32, %35 : vector<1x16x128xf32>
    %37 = arith.addf %31, %36 : vector<1x16x128xf32>
    %c0_30 = arith.constant 0 : index
    %c0_31 = arith.constant 0 : index
    %c1_32 = arith.constant 1 : index
    %38 = vector.load %arg1[%c0_30, %c0_31, %c1_32] : memref<1x18x144xf32, #tpu.memory_space<vmem>>, vector<1x16x128xf32>
    %c6_33 = arith.constant 6 : index
    %c0_34 = arith.constant 0 : index
    %c0_35 = arith.constant 0 : index
    %39 = vector.load %arg2[%c6_33, %c0_34, %c0_35] : memref<56x16x128xf32, #tpu.memory_space<vmem>>, vector<1x16x128xf32>
    %40 = vector.shape_cast %39 : vector<1x16x128xf32> to vector<16x128xf32>
    %41 = vector.shape_cast %40 : vector<16x128xf32> to vector<1x16x128xf32>
    %42 = arith.mulf %38, %41 : vector<1x16x128xf32>
    %43 = arith.addf %37, %42 : vector<1x16x128xf32>
    %c0_36 = arith.constant 0 : index
    %c0_37 = arith.constant 0 : index
    %c15 = arith.constant 15 : index
    %44 = vector.load %arg1[%c0_36, %c0_37, %c15] : memref<1x18x144xf32, #tpu.memory_space<vmem>>, vector<1x16x128xf32>
    %c7_38 = arith.constant 7 : index
    %c0_39 = arith.constant 0 : index
    %c0_40 = arith.constant 0 : index
    %45 = vector.load %arg2[%c7_38, %c0_39, %c0_40] : memref<56x16x128xf32, #tpu.memory_space<vmem>>, vector<1x16x128xf32>
    %46 = vector.shape_cast %45 : vector<1x16x128xf32> to vector<16x128xf32>
    %47 = vector.shape_cast %46 : vector<16x128xf32> to vector<1x16x128xf32>
    %48 = arith.mulf %44, %47 : vector<1x16x128xf32>
    %49 = arith.addf %43, %48 : vector<1x16x128xf32>
    %c0_41 = arith.constant 0 : index
    %c0_42 = arith.constant 0 : index
    %c14 = arith.constant 14 : index
    %50 = vector.load %arg1[%c0_41, %c0_42, %c14] : memref<1x18x144xf32, #tpu.memory_space<vmem>>, vector<1x16x128xf32>
    %c8 = arith.constant 8 : index
    %c0_43 = arith.constant 0 : index
    %c0_44 = arith.constant 0 : index
    %51 = vector.load %arg2[%c8, %c0_43, %c0_44] : memref<56x16x128xf32, #tpu.memory_space<vmem>>, vector<1x16x128xf32>
    %52 = vector.shape_cast %51 : vector<1x16x128xf32> to vector<16x128xf32>
    %53 = vector.shape_cast %52 : vector<16x128xf32> to vector<1x16x128xf32>
    %54 = arith.mulf %50, %53 : vector<1x16x128xf32>
    %55 = arith.addf %49, %54 : vector<1x16x128xf32>
    %c0_45 = arith.constant 0 : index
    %c0_46 = arith.constant 0 : index
    %c13 = arith.constant 13 : index
    %56 = vector.load %arg1[%c0_45, %c0_46, %c13] : memref<1x18x144xf32, #tpu.memory_space<vmem>>, vector<1x16x128xf32>
    %c9 = arith.constant 9 : index
    %c0_47 = arith.constant 0 : index
    %c0_48 = arith.constant 0 : index
    %57 = vector.load %arg2[%c9, %c0_47, %c0_48] : memref<56x16x128xf32, #tpu.memory_space<vmem>>, vector<1x16x128xf32>
    %58 = vector.shape_cast %57 : vector<1x16x128xf32> to vector<16x128xf32>
    %59 = vector.shape_cast %58 : vector<16x128xf32> to vector<1x16x128xf32>
    %60 = arith.mulf %56, %59 : vector<1x16x128xf32>
    %61 = arith.addf %55, %60 : vector<1x16x128xf32>
    %c0_49 = arith.constant 0 : index
    %c0_50 = arith.constant 0 : index
    %c12 = arith.constant 12 : index
    %62 = vector.load %arg1[%c0_49, %c0_50, %c12] : memref<1x18x144xf32, #tpu.memory_space<vmem>>, vector<1x16x128xf32>
    %c10 = arith.constant 10 : index
    %c0_51 = arith.constant 0 : index
    %c0_52 = arith.constant 0 : index
    %63 = vector.load %arg2[%c10, %c0_51, %c0_52] : memref<56x16x128xf32, #tpu.memory_space<vmem>>, vector<1x16x128xf32>
    %64 = vector.shape_cast %63 : vector<1x16x128xf32> to vector<16x128xf32>
    %65 = vector.shape_cast %64 : vector<16x128xf32> to vector<1x16x128xf32>
    %66 = arith.mulf %62, %65 : vector<1x16x128xf32>
    %67 = arith.addf %61, %66 : vector<1x16x128xf32>
    %c0_53 = arith.constant 0 : index
    %c0_54 = arith.constant 0 : index
    %c11 = arith.constant 11 : index
    %68 = vector.load %arg1[%c0_53, %c0_54, %c11] : memref<1x18x144xf32, #tpu.memory_space<vmem>>, vector<1x16x128xf32>
    %c11_55 = arith.constant 11 : index
    %c0_56 = arith.constant 0 : index
    %c0_57 = arith.constant 0 : index
    %69 = vector.load %arg2[%c11_55, %c0_56, %c0_57] : memref<56x16x128xf32, #tpu.memory_space<vmem>>, vector<1x16x128xf32>
    %70 = vector.shape_cast %69 : vector<1x16x128xf32> to vector<16x128xf32>
    %71 = vector.shape_cast %70 : vector<16x128xf32> to vector<1x16x128xf32>
    %72 = arith.mulf %68, %71 : vector<1x16x128xf32>
    %73 = arith.addf %67, %72 : vector<1x16x128xf32>
    %c0_58 = arith.constant 0 : index
    %c0_59 = arith.constant 0 : index
    %c10_60 = arith.constant 10 : index
    %74 = vector.load %arg1[%c0_58, %c0_59, %c10_60] : memref<1x18x144xf32, #tpu.memory_space<vmem>>, vector<1x16x128xf32>
    %c12_61 = arith.constant 12 : index
    %c0_62 = arith.constant 0 : index
    %c0_63 = arith.constant 0 : index
    %75 = vector.load %arg2[%c12_61, %c0_62, %c0_63] : memref<56x16x128xf32, #tpu.memory_space<vmem>>, vector<1x16x128xf32>
    %76 = vector.shape_cast %75 : vector<1x16x128xf32> to vector<16x128xf32>
    %77 = vector.shape_cast %76 : vector<16x128xf32> to vector<1x16x128xf32>
    %78 = arith.mulf %74, %77 : vector<1x16x128xf32>
    %79 = arith.addf %73, %78 : vector<1x16x128xf32>
    %c0_64 = arith.constant 0 : index
    %c0_65 = arith.constant 0 : index
    %c9_66 = arith.constant 9 : index
    %80 = vector.load %arg1[%c0_64, %c0_65, %c9_66] : memref<1x18x144xf32, #tpu.memory_space<vmem>>, vector<1x16x128xf32>
    %c13_67 = arith.constant 13 : index
    %c0_68 = arith.constant 0 : index
    %c0_69 = arith.constant 0 : index
    %81 = vector.load %arg2[%c13_67, %c0_68, %c0_69] : memref<56x16x128xf32, #tpu.memory_space<vmem>>, vector<1x16x128xf32>
    %82 = vector.shape_cast %81 : vector<1x16x128xf32> to vector<16x128xf32>
    %83 = vector.shape_cast %82 : vector<16x128xf32> to vector<1x16x128xf32>
    %84 = arith.mulf %80, %83 : vector<1x16x128xf32>
    %85 = arith.addf %79, %84 : vector<1x16x128xf32>
    %c0_70 = arith.constant 0 : index
    %c1_71 = arith.constant 1 : index
    %c7_72 = arith.constant 7 : index
    %86 = vector.load %arg1[%c0_70, %c1_71, %c7_72] : memref<1x18x144xf32, #tpu.memory_space<vmem>>, vector<1x16x128xf32>
    %c14_73 = arith.constant 14 : index
    %c0_74 = arith.constant 0 : index
    %c0_75 = arith.constant 0 : index
    %87 = vector.load %arg2[%c14_73, %c0_74, %c0_75] : memref<56x16x128xf32, #tpu.memory_space<vmem>>, vector<1x16x128xf32>
    %88 = vector.shape_cast %87 : vector<1x16x128xf32> to vector<16x128xf32>
    %89 = vector.shape_cast %88 : vector<16x128xf32> to vector<1x16x128xf32>
    %90 = arith.mulf %86, %89 : vector<1x16x128xf32>
    %91 = arith.addf %85, %90 : vector<1x16x128xf32>
    %c0_76 = arith.constant 0 : index
    %c1_77 = arith.constant 1 : index
    %c6_78 = arith.constant 6 : index
    %92 = vector.load %arg1[%c0_76, %c1_77, %c6_78] : memref<1x18x144xf32, #tpu.memory_space<vmem>>, vector<1x16x128xf32>
    %c15_79 = arith.constant 15 : index
    %c0_80 = arith.constant 0 : index
    %c0_81 = arith.constant 0 : index
    %93 = vector.load %arg2[%c15_79, %c0_80, %c0_81] : memref<56x16x128xf32, #tpu.memory_space<vmem>>, vector<1x16x128xf32>
    %94 = vector.shape_cast %93 : vector<1x16x128xf32> to vector<16x128xf32>
    %95 = vector.shape_cast %94 : vector<16x128xf32> to vector<1x16x128xf32>
    %96 = arith.mulf %92, %95 : vector<1x16x128xf32>
    %97 = arith.addf %91, %96 : vector<1x16x128xf32>
    %c0_82 = arith.constant 0 : index
    %c1_83 = arith.constant 1 : index
    %c5_84 = arith.constant 5 : index
    %98 = vector.load %arg1[%c0_82, %c1_83, %c5_84] : memref<1x18x144xf32, #tpu.memory_space<vmem>>, vector<1x16x128xf32>
    %c16 = arith.constant 16 : index
    %c0_85 = arith.constant 0 : index
    %c0_86 = arith.constant 0 : index
    %99 = vector.load %arg2[%c16, %c0_85, %c0_86] : memref<56x16x128xf32, #tpu.memory_space<vmem>>, vector<1x16x128xf32>
    %100 = vector.shape_cast %99 : vector<1x16x128xf32> to vector<16x128xf32>
    %101 = vector.shape_cast %100 : vector<16x128xf32> to vector<1x16x128xf32>
    %102 = arith.mulf %98, %101 : vector<1x16x128xf32>
    %103 = arith.addf %97, %102 : vector<1x16x128xf32>
    %c0_87 = arith.constant 0 : index
    %c1_88 = arith.constant 1 : index
    %c4_89 = arith.constant 4 : index
    %104 = vector.load %arg1[%c0_87, %c1_88, %c4_89] : memref<1x18x144xf32, #tpu.memory_space<vmem>>, vector<1x16x128xf32>
    %c17 = arith.constant 17 : index
    %c0_90 = arith.constant 0 : index
    %c0_91 = arith.constant 0 : index
    %105 = vector.load %arg2[%c17, %c0_90, %c0_91] : memref<56x16x128xf32, #tpu.memory_space<vmem>>, vector<1x16x128xf32>
    %106 = vector.shape_cast %105 : vector<1x16x128xf32> to vector<16x128xf32>
    %107 = vector.shape_cast %106 : vector<16x128xf32> to vector<1x16x128xf32>
    %108 = arith.mulf %104, %107 : vector<1x16x128xf32>
    %109 = arith.addf %103, %108 : vector<1x16x128xf32>
    %c0_92 = arith.constant 0 : index
    %c1_93 = arith.constant 1 : index
    %c3_94 = arith.constant 3 : index
    %110 = vector.load %arg1[%c0_92, %c1_93, %c3_94] : memref<1x18x144xf32, #tpu.memory_space<vmem>>, vector<1x16x128xf32>
    %c18 = arith.constant 18 : index
    %c0_95 = arith.constant 0 : index
    %c0_96 = arith.constant 0 : index
    %111 = vector.load %arg2[%c18, %c0_95, %c0_96] : memref<56x16x128xf32, #tpu.memory_space<vmem>>, vector<1x16x128xf32>
    %112 = vector.shape_cast %111 : vector<1x16x128xf32> to vector<16x128xf32>
    %113 = vector.shape_cast %112 : vector<16x128xf32> to vector<1x16x128xf32>
    %114 = arith.mulf %110, %113 : vector<1x16x128xf32>
    %115 = arith.addf %109, %114 : vector<1x16x128xf32>
    %c0_97 = arith.constant 0 : index
    %c1_98 = arith.constant 1 : index
    %c2_99 = arith.constant 2 : index
    %116 = vector.load %arg1[%c0_97, %c1_98, %c2_99] : memref<1x18x144xf32, #tpu.memory_space<vmem>>, vector<1x16x128xf32>
    %c19 = arith.constant 19 : index
    %c0_100 = arith.constant 0 : index
    %c0_101 = arith.constant 0 : index
    %117 = vector.load %arg2[%c19, %c0_100, %c0_101] : memref<56x16x128xf32, #tpu.memory_space<vmem>>, vector<1x16x128xf32>
    %118 = vector.shape_cast %117 : vector<1x16x128xf32> to vector<16x128xf32>
    %119 = vector.shape_cast %118 : vector<16x128xf32> to vector<1x16x128xf32>
    %120 = arith.mulf %116, %119 : vector<1x16x128xf32>
    %121 = arith.addf %115, %120 : vector<1x16x128xf32>
    %c0_102 = arith.constant 0 : index
    %c1_103 = arith.constant 1 : index
    %c1_104 = arith.constant 1 : index
    %122 = vector.load %arg1[%c0_102, %c1_103, %c1_104] : memref<1x18x144xf32, #tpu.memory_space<vmem>>, vector<1x16x128xf32>
    %c20 = arith.constant 20 : index
    %c0_105 = arith.constant 0 : index
    %c0_106 = arith.constant 0 : index
    %123 = vector.load %arg2[%c20, %c0_105, %c0_106] : memref<56x16x128xf32, #tpu.memory_space<vmem>>, vector<1x16x128xf32>
    %124 = vector.shape_cast %123 : vector<1x16x128xf32> to vector<16x128xf32>
    %125 = vector.shape_cast %124 : vector<16x128xf32> to vector<1x16x128xf32>
    %126 = arith.mulf %122, %125 : vector<1x16x128xf32>
    %127 = arith.addf %121, %126 : vector<1x16x128xf32>
    %c0_107 = arith.constant 0 : index
    %c1_108 = arith.constant 1 : index
    %c15_109 = arith.constant 15 : index
    %128 = vector.load %arg1[%c0_107, %c1_108, %c15_109] : memref<1x18x144xf32, #tpu.memory_space<vmem>>, vector<1x16x128xf32>
    %c21 = arith.constant 21 : index
    %c0_110 = arith.constant 0 : index
    %c0_111 = arith.constant 0 : index
    %129 = vector.load %arg2[%c21, %c0_110, %c0_111] : memref<56x16x128xf32, #tpu.memory_space<vmem>>, vector<1x16x128xf32>
    %130 = vector.shape_cast %129 : vector<1x16x128xf32> to vector<16x128xf32>
    %131 = vector.shape_cast %130 : vector<16x128xf32> to vector<1x16x128xf32>
    %132 = arith.mulf %128, %131 : vector<1x16x128xf32>
    %133 = arith.addf %127, %132 : vector<1x16x128xf32>
    %c0_112 = arith.constant 0 : index
    %c1_113 = arith.constant 1 : index
    %c14_114 = arith.constant 14 : index
    %134 = vector.load %arg1[%c0_112, %c1_113, %c14_114] : memref<1x18x144xf32, #tpu.memory_space<vmem>>, vector<1x16x128xf32>
    %c22 = arith.constant 22 : index
    %c0_115 = arith.constant 0 : index
    %c0_116 = arith.constant 0 : index
    %135 = vector.load %arg2[%c22, %c0_115, %c0_116] : memref<56x16x128xf32, #tpu.memory_space<vmem>>, vector<1x16x128xf32>
    %136 = vector.shape_cast %135 : vector<1x16x128xf32> to vector<16x128xf32>
    %137 = vector.shape_cast %136 : vector<16x128xf32> to vector<1x16x128xf32>
    %138 = arith.mulf %134, %137 : vector<1x16x128xf32>
    %139 = arith.addf %133, %138 : vector<1x16x128xf32>
    %c0_117 = arith.constant 0 : index
    %c1_118 = arith.constant 1 : index
    %c13_119 = arith.constant 13 : index
    %140 = vector.load %arg1[%c0_117, %c1_118, %c13_119] : memref<1x18x144xf32, #tpu.memory_space<vmem>>, vector<1x16x128xf32>
    %c23 = arith.constant 23 : index
    %c0_120 = arith.constant 0 : index
    %c0_121 = arith.constant 0 : index
    %141 = vector.load %arg2[%c23, %c0_120, %c0_121] : memref<56x16x128xf32, #tpu.memory_space<vmem>>, vector<1x16x128xf32>
    %142 = vector.shape_cast %141 : vector<1x16x128xf32> to vector<16x128xf32>
    %143 = vector.shape_cast %142 : vector<16x128xf32> to vector<1x16x128xf32>
    %144 = arith.mulf %140, %143 : vector<1x16x128xf32>
    %145 = arith.addf %139, %144 : vector<1x16x128xf32>
    %c0_122 = arith.constant 0 : index
    %c1_123 = arith.constant 1 : index
    %c12_124 = arith.constant 12 : index
    %146 = vector.load %arg1[%c0_122, %c1_123, %c12_124] : memref<1x18x144xf32, #tpu.memory_space<vmem>>, vector<1x16x128xf32>
    %c24 = arith.constant 24 : index
    %c0_125 = arith.constant 0 : index
    %c0_126 = arith.constant 0 : index
    %147 = vector.load %arg2[%c24, %c0_125, %c0_126] : memref<56x16x128xf32, #tpu.memory_space<vmem>>, vector<1x16x128xf32>
    %148 = vector.shape_cast %147 : vector<1x16x128xf32> to vector<16x128xf32>
    %149 = vector.shape_cast %148 : vector<16x128xf32> to vector<1x16x128xf32>
    %150 = arith.mulf %146, %149 : vector<1x16x128xf32>
    %151 = arith.addf %145, %150 : vector<1x16x128xf32>
    %c0_127 = arith.constant 0 : index
    %c1_128 = arith.constant 1 : index
    %c11_129 = arith.constant 11 : index
    %152 = vector.load %arg1[%c0_127, %c1_128, %c11_129] : memref<1x18x144xf32, #tpu.memory_space<vmem>>, vector<1x16x128xf32>
    %c25 = arith.constant 25 : index
    %c0_130 = arith.constant 0 : index
    %c0_131 = arith.constant 0 : index
    %153 = vector.load %arg2[%c25, %c0_130, %c0_131] : memref<56x16x128xf32, #tpu.memory_space<vmem>>, vector<1x16x128xf32>
    %154 = vector.shape_cast %153 : vector<1x16x128xf32> to vector<16x128xf32>
    %155 = vector.shape_cast %154 : vector<16x128xf32> to vector<1x16x128xf32>
    %156 = arith.mulf %152, %155 : vector<1x16x128xf32>
    %157 = arith.addf %151, %156 : vector<1x16x128xf32>
    %c0_132 = arith.constant 0 : index
    %c1_133 = arith.constant 1 : index
    %c10_134 = arith.constant 10 : index
    %158 = vector.load %arg1[%c0_132, %c1_133, %c10_134] : memref<1x18x144xf32, #tpu.memory_space<vmem>>, vector<1x16x128xf32>
    %c26 = arith.constant 26 : index
    %c0_135 = arith.constant 0 : index
    %c0_136 = arith.constant 0 : index
    %159 = vector.load %arg2[%c26, %c0_135, %c0_136] : memref<56x16x128xf32, #tpu.memory_space<vmem>>, vector<1x16x128xf32>
    %160 = vector.shape_cast %159 : vector<1x16x128xf32> to vector<16x128xf32>
    %161 = vector.shape_cast %160 : vector<16x128xf32> to vector<1x16x128xf32>
    %162 = arith.mulf %158, %161 : vector<1x16x128xf32>
    %163 = arith.addf %157, %162 : vector<1x16x128xf32>
    %c0_137 = arith.constant 0 : index
    %c1_138 = arith.constant 1 : index
    %c9_139 = arith.constant 9 : index
    %164 = vector.load %arg1[%c0_137, %c1_138, %c9_139] : memref<1x18x144xf32, #tpu.memory_space<vmem>>, vector<1x16x128xf32>
    %c27 = arith.constant 27 : index
    %c0_140 = arith.constant 0 : index
    %c0_141 = arith.constant 0 : index
    %165 = vector.load %arg2[%c27, %c0_140, %c0_141] : memref<56x16x128xf32, #tpu.memory_space<vmem>>, vector<1x16x128xf32>
    %166 = vector.shape_cast %165 : vector<1x16x128xf32> to vector<16x128xf32>
    %167 = vector.shape_cast %166 : vector<16x128xf32> to vector<1x16x128xf32>
    %168 = arith.mulf %164, %167 : vector<1x16x128xf32>
    %169 = arith.addf %163, %168 : vector<1x16x128xf32>
    %c0_142 = arith.constant 0 : index
    %c0_143 = arith.constant 0 : index
    %c0_144 = arith.constant 0 : index
    %c0_145 = arith.constant 0 : index
    %170 = vector.load %arg4[%c0_142, %c0_143, %c0_144, %c0_145] : memref<1x16x2x128xf32, #tpu.memory_space<vmem>>, vector<1x16x1x128xf32>
    %171 = vector.shape_cast %170 : vector<1x16x1x128xf32> to vector<1x16x128xf32>
    %172 = vector.shape_cast %169 : vector<1x16x128xf32> to vector<1x16x1x128xf32>
    tpu.vector_store %arg4[%c0_142, %c0_143, %c0_144, %c0_145], %172 {strides = array<i32>} : memref<1x16x2x128xf32, #tpu.memory_space<vmem>>, vector<1x16x1x128xf32>,
    %c0_146 = arith.constant 0 : index
    %c0_147 = arith.constant 0 : index
    %173 = vector.load %arg3[%c0_146, %c0_147] : memref<16x128xf32, #tpu.memory_space<vmem>>, vector<16x128xf32>
    %174 = vector.shape_cast %173 : vector<16x128xf32> to vector<1x16x128xf32>
    %c0_148 = arith.constant 0 : index
    %c1_149 = arith.constant 1 : index
    %c7_150 = arith.constant 7 : index
    %175 = vector.load %arg1[%c0_148, %c1_149, %c7_150] : memref<1x18x144xf32, #tpu.memory_space<vmem>>, vector<1x16x128xf32>
    %c28 = arith.constant 28 : index
    %c0_151 = arith.constant 0 : index
    %c0_152 = arith.constant 0 : index
    %176 = vector.load %arg2[%c28, %c0_151, %c0_152] : memref<56x16x128xf32, #tpu.memory_space<vmem>>, vector<1x16x128xf32>
    %177 = vector.shape_cast %176 : vector<1x16x128xf32> to vector<16x128xf32>
    %178 = vector.shape_cast %177 : vector<16x128xf32> to vector<1x16x128xf32>
    %179 = arith.mulf %175, %178 : vector<1x16x128xf32>
    %180 = arith.addf %174, %179 : vector<1x16x128xf32>
    %c0_153 = arith.constant 0 : index
    %c1_154 = arith.constant 1 : index
    %c6_155 = arith.constant 6 : index
    %181 = vector.load %arg1[%c0_153, %c1_154, %c6_155] : memref<1x18x144xf32, #tpu.memory_space<vmem>>, vector<1x16x128xf32>
    %c29 = arith.constant 29 : index
    %c0_156 = arith.constant 0 : index
    %c0_157 = arith.constant 0 : index
    %182 = vector.load %arg2[%c29, %c0_156, %c0_157] : memref<56x16x128xf32, #tpu.memory_space<vmem>>, vector<1x16x128xf32>
    %183 = vector.shape_cast %182 : vector<1x16x128xf32> to vector<16x128xf32>
    %184 = vector.shape_cast %183 : vector<16x128xf32> to vector<1x16x128xf32>
    %185 = arith.mulf %181, %184 : vector<1x16x128xf32>
    %186 = arith.addf %180, %185 : vector<1x16x128xf32>
    %c0_158 = arith.constant 0 : index
    %c1_159 = arith.constant 1 : index
    %c5_160 = arith.constant 5 : index
    %187 = vector.load %arg1[%c0_158, %c1_159, %c5_160] : memref<1x18x144xf32, #tpu.memory_space<vmem>>, vector<1x16x128xf32>
    %c30 = arith.constant 30 : index
    %c0_161 = arith.constant 0 : index
    %c0_162 = arith.constant 0 : index
    %188 = vector.load %arg2[%c30, %c0_161, %c0_162] : memref<56x16x128xf32, #tpu.memory_space<vmem>>, vector<1x16x128xf32>
    %189 = vector.shape_cast %188 : vector<1x16x128xf32> to vector<16x128xf32>
    %190 = vector.shape_cast %189 : vector<16x128xf32> to vector<1x16x128xf32>
    %191 = arith.mulf %187, %190 : vector<1x16x128xf32>
    %192 = arith.addf %186, %191 : vector<1x16x128xf32>
    %c0_163 = arith.constant 0 : index
    %c1_164 = arith.constant 1 : index
    %c4_165 = arith.constant 4 : index
    %193 = vector.load %arg1[%c0_163, %c1_164, %c4_165] : memref<1x18x144xf32, #tpu.memory_space<vmem>>, vector<1x16x128xf32>
    %c31 = arith.constant 31 : index
    %c0_166 = arith.constant 0 : index
    %c0_167 = arith.constant 0 : index
    %194 = vector.load %arg2[%c31, %c0_166, %c0_167] : memref<56x16x128xf32, #tpu.memory_space<vmem>>, vector<1x16x128xf32>
    %195 = vector.shape_cast %194 : vector<1x16x128xf32> to vector<16x128xf32>
    %196 = vector.shape_cast %195 : vector<16x128xf32> to vector<1x16x128xf32>
    %197 = arith.mulf %193, %196 : vector<1x16x128xf32>
    %198 = arith.addf %192, %197 : vector<1x16x128xf32>
    %c0_168 = arith.constant 0 : index
    %c1_169 = arith.constant 1 : index
    %c3_170 = arith.constant 3 : index
    %199 = vector.load %arg1[%c0_168, %c1_169, %c3_170] : memref<1x18x144xf32, #tpu.memory_space<vmem>>, vector<1x16x128xf32>
    %c32 = arith.constant 32 : index
    %c0_171 = arith.constant 0 : index
    %c0_172 = arith.constant 0 : index
    %200 = vector.load %arg2[%c32, %c0_171, %c0_172] : memref<56x16x128xf32, #tpu.memory_space<vmem>>, vector<1x16x128xf32>
    %201 = vector.shape_cast %200 : vector<1x16x128xf32> to vector<16x128xf32>
    %202 = vector.shape_cast %201 : vector<16x128xf32> to vector<1x16x128xf32>
    %203 = arith.mulf %199, %202 : vector<1x16x128xf32>
    %204 = arith.addf %198, %203 : vector<1x16x128xf32>
    %c0_173 = arith.constant 0 : index
    %c1_174 = arith.constant 1 : index
    %c2_175 = arith.constant 2 : index
    %205 = vector.load %arg1[%c0_173, %c1_174, %c2_175] : memref<1x18x144xf32, #tpu.memory_space<vmem>>, vector<1x16x128xf32>
    %c33 = arith.constant 33 : index
    %c0_176 = arith.constant 0 : index
    %c0_177 = arith.constant 0 : index
    %206 = vector.load %arg2[%c33, %c0_176, %c0_177] : memref<56x16x128xf32, #tpu.memory_space<vmem>>, vector<1x16x128xf32>
    %207 = vector.shape_cast %206 : vector<1x16x128xf32> to vector<16x128xf32>
    %208 = vector.shape_cast %207 : vector<16x128xf32> to vector<1x16x128xf32>
    %209 = arith.mulf %205, %208 : vector<1x16x128xf32>
    %210 = arith.addf %204, %209 : vector<1x16x128xf32>
    %c0_178 = arith.constant 0 : index
    %c1_179 = arith.constant 1 : index
    %c1_180 = arith.constant 1 : index
    %211 = vector.load %arg1[%c0_178, %c1_179, %c1_180] : memref<1x18x144xf32, #tpu.memory_space<vmem>>, vector<1x16x128xf32>
    %c34 = arith.constant 34 : index
    %c0_181 = arith.constant 0 : index
    %c0_182 = arith.constant 0 : index
    %212 = vector.load %arg2[%c34, %c0_181, %c0_182] : memref<56x16x128xf32, #tpu.memory_space<vmem>>, vector<1x16x128xf32>
    %213 = vector.shape_cast %212 : vector<1x16x128xf32> to vector<16x128xf32>
    %214 = vector.shape_cast %213 : vector<16x128xf32> to vector<1x16x128xf32>
    %215 = arith.mulf %211, %214 : vector<1x16x128xf32>
    %216 = arith.addf %210, %215 : vector<1x16x128xf32>
    %c0_183 = arith.constant 0 : index
    %c1_184 = arith.constant 1 : index
    %c15_185 = arith.constant 15 : index
    %217 = vector.load %arg1[%c0_183, %c1_184, %c15_185] : memref<1x18x144xf32, #tpu.memory_space<vmem>>, vector<1x16x128xf32>
    %c35 = arith.constant 35 : index
    %c0_186 = arith.constant 0 : index
    %c0_187 = arith.constant 0 : index
    %218 = vector.load %arg2[%c35, %c0_186, %c0_187] : memref<56x16x128xf32, #tpu.memory_space<vmem>>, vector<1x16x128xf32>
    %219 = vector.shape_cast %218 : vector<1x16x128xf32> to vector<16x128xf32>
    %220 = vector.shape_cast %219 : vector<16x128xf32> to vector<1x16x128xf32>
    %221 = arith.mulf %217, %220 : vector<1x16x128xf32>
    %222 = arith.addf %216, %221 : vector<1x16x128xf32>
    %c0_188 = arith.constant 0 : index
    %c1_189 = arith.constant 1 : index
    %c14_190 = arith.constant 14 : index
    %223 = vector.load %arg1[%c0_188, %c1_189, %c14_190] : memref<1x18x144xf32, #tpu.memory_space<vmem>>, vector<1x16x128xf32>
    %c36 = arith.constant 36 : index
    %c0_191 = arith.constant 0 : index
    %c0_192 = arith.constant 0 : index
    %224 = vector.load %arg2[%c36, %c0_191, %c0_192] : memref<56x16x128xf32, #tpu.memory_space<vmem>>, vector<1x16x128xf32>
    %225 = vector.shape_cast %224 : vector<1x16x128xf32> to vector<16x128xf32>
    %226 = vector.shape_cast %225 : vector<16x128xf32> to vector<1x16x128xf32>
    %227 = arith.mulf %223, %226 : vector<1x16x128xf32>
    %228 = arith.addf %222, %227 : vector<1x16x128xf32>
    %c0_193 = arith.constant 0 : index
    %c1_194 = arith.constant 1 : index
    %c13_195 = arith.constant 13 : index
    %229 = vector.load %arg1[%c0_193, %c1_194, %c13_195] : memref<1x18x144xf32, #tpu.memory_space<vmem>>, vector<1x16x128xf32>
    %c37 = arith.constant 37 : index
    %c0_196 = arith.constant 0 : index
    %c0_197 = arith.constant 0 : index
    %230 = vector.load %arg2[%c37, %c0_196, %c0_197] : memref<56x16x128xf32, #tpu.memory_space<vmem>>, vector<1x16x128xf32>
    %231 = vector.shape_cast %230 : vector<1x16x128xf32> to vector<16x128xf32>
    %232 = vector.shape_cast %231 : vector<16x128xf32> to vector<1x16x128xf32>
    %233 = arith.mulf %229, %232 : vector<1x16x128xf32>
    %234 = arith.addf %228, %233 : vector<1x16x128xf32>
    %c0_198 = arith.constant 0 : index
    %c1_199 = arith.constant 1 : index
    %c12_200 = arith.constant 12 : index
    %235 = vector.load %arg1[%c0_198, %c1_199, %c12_200] : memref<1x18x144xf32, #tpu.memory_space<vmem>>, vector<1x16x128xf32>
    %c38 = arith.constant 38 : index
    %c0_201 = arith.constant 0 : index
    %c0_202 = arith.constant 0 : index
    %236 = vector.load %arg2[%c38, %c0_201, %c0_202] : memref<56x16x128xf32, #tpu.memory_space<vmem>>, vector<1x16x128xf32>
    %237 = vector.shape_cast %236 : vector<1x16x128xf32> to vector<16x128xf32>
    %238 = vector.shape_cast %237 : vector<16x128xf32> to vector<1x16x128xf32>
    %239 = arith.mulf %235, %238 : vector<1x16x128xf32>
    %240 = arith.addf %234, %239 : vector<1x16x128xf32>
    %c0_203 = arith.constant 0 : index
    %c1_204 = arith.constant 1 : index
    %c11_205 = arith.constant 11 : index
    %241 = vector.load %arg1[%c0_203, %c1_204, %c11_205] : memref<1x18x144xf32, #tpu.memory_space<vmem>>, vector<1x16x128xf32>
    %c39 = arith.constant 39 : index
    %c0_206 = arith.constant 0 : index
    %c0_207 = arith.constant 0 : index
    %242 = vector.load %arg2[%c39, %c0_206, %c0_207] : memref<56x16x128xf32, #tpu.memory_space<vmem>>, vector<1x16x128xf32>
    %243 = vector.shape_cast %242 : vector<1x16x128xf32> to vector<16x128xf32>
    %244 = vector.shape_cast %243 : vector<16x128xf32> to vector<1x16x128xf32>
    %245 = arith.mulf %241, %244 : vector<1x16x128xf32>
    %246 = arith.addf %240, %245 : vector<1x16x128xf32>
    %c0_208 = arith.constant 0 : index
    %c1_209 = arith.constant 1 : index
    %c10_210 = arith.constant 10 : index
    %247 = vector.load %arg1[%c0_208, %c1_209, %c10_210] : memref<1x18x144xf32, #tpu.memory_space<vmem>>, vector<1x16x128xf32>
    %c40 = arith.constant 40 : index
    %c0_211 = arith.constant 0 : index
    %c0_212 = arith.constant 0 : index
    %248 = vector.load %arg2[%c40, %c0_211, %c0_212] : memref<56x16x128xf32, #tpu.memory_space<vmem>>, vector<1x16x128xf32>
    %249 = vector.shape_cast %248 : vector<1x16x128xf32> to vector<16x128xf32>
    %250 = vector.shape_cast %249 : vector<16x128xf32> to vector<1x16x128xf32>
    %251 = arith.mulf %247, %250 : vector<1x16x128xf32>
    %252 = arith.addf %246, %251 : vector<1x16x128xf32>
    %c0_213 = arith.constant 0 : index
    %c1_214 = arith.constant 1 : index
    %c9_215 = arith.constant 9 : index
    %253 = vector.load %arg1[%c0_213, %c1_214, %c9_215] : memref<1x18x144xf32, #tpu.memory_space<vmem>>, vector<1x16x128xf32>
    %c41 = arith.constant 41 : index
    %c0_216 = arith.constant 0 : index
    %c0_217 = arith.constant 0 : index
    %254 = vector.load %arg2[%c41, %c0_216, %c0_217] : memref<56x16x128xf32, #tpu.memory_space<vmem>>, vector<1x16x128xf32>
    %255 = vector.shape_cast %254 : vector<1x16x128xf32> to vector<16x128xf32>
    %256 = vector.shape_cast %255 : vector<16x128xf32> to vector<1x16x128xf32>
    %257 = arith.mulf %253, %256 : vector<1x16x128xf32>
    %258 = arith.addf %252, %257 : vector<1x16x128xf32>
    %c0_218 = arith.constant 0 : index
    %c2_219 = arith.constant 2 : index
    %c7_220 = arith.constant 7 : index
    %259 = vector.load %arg1[%c0_218, %c2_219, %c7_220] : memref<1x18x144xf32, #tpu.memory_space<vmem>>, vector<1x16x128xf32>
    %c42 = arith.constant 42 : index
    %c0_221 = arith.constant 0 : index
    %c0_222 = arith.constant 0 : index
    %260 = vector.load %arg2[%c42, %c0_221, %c0_222] : memref<56x16x128xf32, #tpu.memory_space<vmem>>, vector<1x16x128xf32>
    %261 = vector.shape_cast %260 : vector<1x16x128xf32> to vector<16x128xf32>
    %262 = vector.shape_cast %261 : vector<16x128xf32> to vector<1x16x128xf32>
    %263 = arith.mulf %259, %262 : vector<1x16x128xf32>
    %264 = arith.addf %258, %263 : vector<1x16x128xf32>
    %c0_223 = arith.constant 0 : index
    %c2_224 = arith.constant 2 : index
    %c6_225 = arith.constant 6 : index
    %265 = vector.load %arg1[%c0_223, %c2_224, %c6_225] : memref<1x18x144xf32, #tpu.memory_space<vmem>>, vector<1x16x128xf32>
    %c43 = arith.constant 43 : index
    %c0_226 = arith.constant 0 : index
    %c0_227 = arith.constant 0 : index
    %266 = vector.load %arg2[%c43, %c0_226, %c0_227] : memref<56x16x128xf32, #tpu.memory_space<vmem>>, vector<1x16x128xf32>
    %267 = vector.shape_cast %266 : vector<1x16x128xf32> to vector<16x128xf32>
    %268 = vector.shape_cast %267 : vector<16x128xf32> to vector<1x16x128xf32>
    %269 = arith.mulf %265, %268 : vector<1x16x128xf32>
    %270 = arith.addf %264, %269 : vector<1x16x128xf32>
    %c0_228 = arith.constant 0 : index
    %c2_229 = arith.constant 2 : index
    %c5_230 = arith.constant 5 : index
    %271 = vector.load %arg1[%c0_228, %c2_229, %c5_230] : memref<1x18x144xf32, #tpu.memory_space<vmem>>, vector<1x16x128xf32>
    %c44 = arith.constant 44 : index
    %c0_231 = arith.constant 0 : index
    %c0_232 = arith.constant 0 : index
    %272 = vector.load %arg2[%c44, %c0_231, %c0_232] : memref<56x16x128xf32, #tpu.memory_space<vmem>>, vector<1x16x128xf32>
    %273 = vector.shape_cast %272 : vector<1x16x128xf32> to vector<16x128xf32>
    %274 = vector.shape_cast %273 : vector<16x128xf32> to vector<1x16x128xf32>
    %275 = arith.mulf %271, %274 : vector<1x16x128xf32>
    %276 = arith.addf %270, %275 : vector<1x16x128xf32>
    %c0_233 = arith.constant 0 : index
    %c2_234 = arith.constant 2 : index
    %c4_235 = arith.constant 4 : index
    %277 = vector.load %arg1[%c0_233, %c2_234, %c4_235] : memref<1x18x144xf32, #tpu.memory_space<vmem>>, vector<1x16x128xf32>
    %c45 = arith.constant 45 : index
    %c0_236 = arith.constant 0 : index
    %c0_237 = arith.constant 0 : index
    %278 = vector.load %arg2[%c45, %c0_236, %c0_237] : memref<56x16x128xf32, #tpu.memory_space<vmem>>, vector<1x16x128xf32>
    %279 = vector.shape_cast %278 : vector<1x16x128xf32> to vector<16x128xf32>
    %280 = vector.shape_cast %279 : vector<16x128xf32> to vector<1x16x128xf32>
    %281 = arith.mulf %277, %280 : vector<1x16x128xf32>
    %282 = arith.addf %276, %281 : vector<1x16x128xf32>
    %c0_238 = arith.constant 0 : index
    %c2_239 = arith.constant 2 : index
    %c3_240 = arith.constant 3 : index
    %283 = vector.load %arg1[%c0_238, %c2_239, %c3_240] : memref<1x18x144xf32, #tpu.memory_space<vmem>>, vector<1x16x128xf32>
    %c46 = arith.constant 46 : index
    %c0_241 = arith.constant 0 : index
    %c0_242 = arith.constant 0 : index
    %284 = vector.load %arg2[%c46, %c0_241, %c0_242] : memref<56x16x128xf32, #tpu.memory_space<vmem>>, vector<1x16x128xf32>
    %285 = vector.shape_cast %284 : vector<1x16x128xf32> to vector<16x128xf32>
    %286 = vector.shape_cast %285 : vector<16x128xf32> to vector<1x16x128xf32>
    %287 = arith.mulf %283, %286 : vector<1x16x128xf32>
    %288 = arith.addf %282, %287 : vector<1x16x128xf32>
    %c0_243 = arith.constant 0 : index
    %c2_244 = arith.constant 2 : index
    %c2_245 = arith.constant 2 : index
    %289 = vector.load %arg1[%c0_243, %c2_244, %c2_245] : memref<1x18x144xf32, #tpu.memory_space<vmem>>, vector<1x16x128xf32>
    %c47 = arith.constant 47 : index
    %c0_246 = arith.constant 0 : index
    %c0_247 = arith.constant 0 : index
    %290 = vector.load %arg2[%c47, %c0_246, %c0_247] : memref<56x16x128xf32, #tpu.memory_space<vmem>>, vector<1x16x128xf32>
    %291 = vector.shape_cast %290 : vector<1x16x128xf32> to vector<16x128xf32>
    %292 = vector.shape_cast %291 : vector<16x128xf32> to vector<1x16x128xf32>
    %293 = arith.mulf %289, %292 : vector<1x16x128xf32>
    %294 = arith.addf %288, %293 : vector<1x16x128xf32>
    %c0_248 = arith.constant 0 : index
    %c2_249 = arith.constant 2 : index
    %c1_250 = arith.constant 1 : index
    %295 = vector.load %arg1[%c0_248, %c2_249, %c1_250] : memref<1x18x144xf32, #tpu.memory_space<vmem>>, vector<1x16x128xf32>
    %c48 = arith.constant 48 : index
    %c0_251 = arith.constant 0 : index
    %c0_252 = arith.constant 0 : index
    %296 = vector.load %arg2[%c48, %c0_251, %c0_252] : memref<56x16x128xf32, #tpu.memory_space<vmem>>, vector<1x16x128xf32>
    %297 = vector.shape_cast %296 : vector<1x16x128xf32> to vector<16x128xf32>
    %298 = vector.shape_cast %297 : vector<16x128xf32> to vector<1x16x128xf32>
    %299 = arith.mulf %295, %298 : vector<1x16x128xf32>
    %300 = arith.addf %294, %299 : vector<1x16x128xf32>
    %c0_253 = arith.constant 0 : index
    %c2_254 = arith.constant 2 : index
    %c15_255 = arith.constant 15 : index
    %301 = vector.load %arg1[%c0_253, %c2_254, %c15_255] : memref<1x18x144xf32, #tpu.memory_space<vmem>>, vector<1x16x128xf32>
    %c49 = arith.constant 49 : index
    %c0_256 = arith.constant 0 : index
    %c0_257 = arith.constant 0 : index
    %302 = vector.load %arg2[%c49, %c0_256, %c0_257] : memref<56x16x128xf32, #tpu.memory_space<vmem>>, vector<1x16x128xf32>
    %303 = vector.shape_cast %302 : vector<1x16x128xf32> to vector<16x128xf32>
    %304 = vector.shape_cast %303 : vector<16x128xf32> to vector<1x16x128xf32>
    %305 = arith.mulf %301, %304 : vector<1x16x128xf32>
    %306 = arith.addf %300, %305 : vector<1x16x128xf32>
    %c0_258 = arith.constant 0 : index
    %c2_259 = arith.constant 2 : index
    %c14_260 = arith.constant 14 : index
    %307 = vector.load %arg1[%c0_258, %c2_259, %c14_260] : memref<1x18x144xf32, #tpu.memory_space<vmem>>, vector<1x16x128xf32>
    %c50 = arith.constant 50 : index
    %c0_261 = arith.constant 0 : index
    %c0_262 = arith.constant 0 : index
    %308 = vector.load %arg2[%c50, %c0_261, %c0_262] : memref<56x16x128xf32, #tpu.memory_space<vmem>>, vector<1x16x128xf32>
    %309 = vector.shape_cast %308 : vector<1x16x128xf32> to vector<16x128xf32>
    %310 = vector.shape_cast %309 : vector<16x128xf32> to vector<1x16x128xf32>
    %311 = arith.mulf %307, %310 : vector<1x16x128xf32>
    %312 = arith.addf %306, %311 : vector<1x16x128xf32>
    %c0_263 = arith.constant 0 : index
    %c2_264 = arith.constant 2 : index
    %c13_265 = arith.constant 13 : index
    %313 = vector.load %arg1[%c0_263, %c2_264, %c13_265] : memref<1x18x144xf32, #tpu.memory_space<vmem>>, vector<1x16x128xf32>
    %c51 = arith.constant 51 : index
    %c0_266 = arith.constant 0 : index
    %c0_267 = arith.constant 0 : index
    %314 = vector.load %arg2[%c51, %c0_266, %c0_267] : memref<56x16x128xf32, #tpu.memory_space<vmem>>, vector<1x16x128xf32>
    %315 = vector.shape_cast %314 : vector<1x16x128xf32> to vector<16x128xf32>
    %316 = vector.shape_cast %315 : vector<16x128xf32> to vector<1x16x128xf32>
    %317 = arith.mulf %313, %316 : vector<1x16x128xf32>
    %318 = arith.addf %312, %317 : vector<1x16x128xf32>
    %c0_268 = arith.constant 0 : index
    %c2_269 = arith.constant 2 : index
    %c12_270 = arith.constant 12 : index
    %319 = vector.load %arg1[%c0_268, %c2_269, %c12_270] : memref<1x18x144xf32, #tpu.memory_space<vmem>>, vector<1x16x128xf32>
    %c52 = arith.constant 52 : index
    %c0_271 = arith.constant 0 : index
    %c0_272 = arith.constant 0 : index
    %320 = vector.load %arg2[%c52, %c0_271, %c0_272] : memref<56x16x128xf32, #tpu.memory_space<vmem>>, vector<1x16x128xf32>
    %321 = vector.shape_cast %320 : vector<1x16x128xf32> to vector<16x128xf32>
    %322 = vector.shape_cast %321 : vector<16x128xf32> to vector<1x16x128xf32>
    %323 = arith.mulf %319, %322 : vector<1x16x128xf32>
    %324 = arith.addf %318, %323 : vector<1x16x128xf32>
    %c0_273 = arith.constant 0 : index
    %c2_274 = arith.constant 2 : index
    %c11_275 = arith.constant 11 : index
    %325 = vector.load %arg1[%c0_273, %c2_274, %c11_275] : memref<1x18x144xf32, #tpu.memory_space<vmem>>, vector<1x16x128xf32>
    %c53 = arith.constant 53 : index
    %c0_276 = arith.constant 0 : index
    %c0_277 = arith.constant 0 : index
    %326 = vector.load %arg2[%c53, %c0_276, %c0_277] : memref<56x16x128xf32, #tpu.memory_space<vmem>>, vector<1x16x128xf32>
    %327 = vector.shape_cast %326 : vector<1x16x128xf32> to vector<16x128xf32>
    %328 = vector.shape_cast %327 : vector<16x128xf32> to vector<1x16x128xf32>
    %329 = arith.mulf %325, %328 : vector<1x16x128xf32>
    %330 = arith.addf %324, %329 : vector<1x16x128xf32>
    %c0_278 = arith.constant 0 : index
    %c2_279 = arith.constant 2 : index
    %c10_280 = arith.constant 10 : index
    %331 = vector.load %arg1[%c0_278, %c2_279, %c10_280] : memref<1x18x144xf32, #tpu.memory_space<vmem>>, vector<1x16x128xf32>
    %c54 = arith.constant 54 : index
    %c0_281 = arith.constant 0 : index
    %c0_282 = arith.constant 0 : index
    %332 = vector.load %arg2[%c54, %c0_281, %c0_282] : memref<56x16x128xf32, #tpu.memory_space<vmem>>, vector<1x16x128xf32>
    %333 = vector.shape_cast %332 : vector<1x16x128xf32> to vector<16x128xf32>
    %334 = vector.shape_cast %333 : vector<16x128xf32> to vector<1x16x128xf32>
    %335 = arith.mulf %331, %334 : vector<1x16x128xf32>
    %336 = arith.addf %330, %335 : vector<1x16x128xf32>
    %c0_283 = arith.constant 0 : index
    %c2_284 = arith.constant 2 : index
    %c9_285 = arith.constant 9 : index
    %337 = vector.load %arg1[%c0_283, %c2_284, %c9_285] : memref<1x18x144xf32, #tpu.memory_space<vmem>>, vector<1x16x128xf32>
    %c55 = arith.constant 55 : index
    %c0_286 = arith.constant 0 : index
    %c0_287 = arith.constant 0 : index
    %338 = vector.load %arg2[%c55, %c0_286, %c0_287] : memref<56x16x128xf32, #tpu.memory_space<vmem>>, vector<1x16x128xf32>
    %339 = vector.shape_cast %338 : vector<1x16x128xf32> to vector<16x128xf32>
    %340 = vector.shape_cast %339 : vector<16x128xf32> to vector<1x16x128xf32>
    %341 = arith.mulf %337, %340 : vector<1x16x128xf32>
    %342 = arith.addf %336, %341 : vector<1x16x128xf32>
    %c0_288 = arith.constant 0 : index
    %c0_289 = arith.constant 0 : index
    %c1_290 = arith.constant 1 : index
    %c0_291 = arith.constant 0 : index
    %343 = vector.load %arg4[%c0_288, %c0_289, %c1_290, %c0_291] : memref<1x16x2x128xf32, #tpu.memory_space<vmem>>, vector<1x16x1x128xf32>
    %344 = vector.shape_cast %343 : vector<1x16x1x128xf32> to vector<1x16x128xf32>
    %345 = vector.shape_cast %342 : vector<1x16x128xf32> to vector<1x16x1x128xf32>
    tpu.vector_store %arg4[%c0_288, %c0_289, %c1_290, %c0_291], %345 {strides = array<i32>} : memref<1x16x2x128xf32, #tpu.memory_space<vmem>>, vector<1x16x1x128xf32>,
    return
  }
  func.func @transform_0(%arg0: i32) -> (i32, i32, i32) {
    %c0_i32 = arith.constant 0 : i32
    %c0_i32_0 = arith.constant 0 : i32
    %c0_i32_1 = arith.constant 0 : i32
    return %arg0, %c0_i32, %c0_i32_0 : i32, i32, i32
  }
  func.func @transform_1(%arg0: i32) -> (i32, i32, i32) {
    %c0_i32 = arith.constant 0 : i32
    %c0_i32_0 = arith.constant 0 : i32
    %c0_i32_1 = arith.constant 0 : i32
    %c0_i32_2 = arith.constant 0 : i32
    return %c0_i32, %c0_i32_0, %c0_i32_1 : i32, i32, i32
  }
  func.func @transform_2(%arg0: i32) -> (i32, i32) {
    %c0_i32 = arith.constant 0 : i32
    %c0_i32_0 = arith.constant 0 : i32
    %c0_i32_1 = arith.constant 0 : i32
    return %c0_i32, %c0_i32_0 : i32, i32
  }
  func.func @transform_3(%arg0: i32) -> (i32, i32, i32, i32) {
    %c0_i32 = arith.constant 0 : i32
    %c0_i32_0 = arith.constant 0 : i32
    %c0_i32_1 = arith.constant 0 : i32
    %c0_i32_2 = arith.constant 0 : i32
    return %arg0, %c0_i32, %c0_i32_0, %c0_i32_1 : i32, i32, i32, i32
  }
}

</mosaic_0001>

<bundles_post_ra>
// kernel: tile.20
= control target key start
LH: loop header
LB: loop body
LE: loop exit
PB: predicated region body
PF: predicated region fallthrough
CT: control target
= control target key end

     0   :  { %s22_s0 = inlined_call_operand.vmem [shape: f32[4], index: 0, kind: input, shape index: {}]   ;;  %s23_s1 = inlined_call_operand.vmem [shape: f32[2,4], index: 1, kind: output, shape index: {}]  }
   0x1   :  { %v4_v0 = vld [vmem:[%s22_s0] ss:$0 sm:$0xff] }
   0x2   :  { %5 = vst [vmem:[%s23_s1] sm:$0x3] %v4_v0 }

// kernel: tile.23
= control target key start
LH: loop header
LB: loop body
LE: loop exit
PB: predicated region body
PF: predicated region fallthrough
CT: control target
= control target key end

     0   :  { %vm8_vm0 = vcmask 31744   ;;  %vm14_vm1 = vcmask 64544   ;;  %s42_s0 = inlined_call_operand.vmem [shape: f32[2,4], index: 0, kind: input, shape index: {}]   ;;  %s43_s1 = inlined_call_operand.vmem [shape: f32[8], index: 1, kind: output, shape index: {}]  }
   0x1   :  { %v5_v0 = vld [vmem:[%s42_s0] sm:$0x3]  ;;  %s25_s0 = smov 4  }
   0x2   :  { %6 = vst [vmem:[#allocation1] sm:$0x3] %v5_v0 }
   0x9   :  { %v11_v1 = vld [vmem:[#allocation1 + $0x1] sm:$0x1]   ;;  %v7_v2 = vld [vmem:[#allocation1] sm:$0x1]  }
   0xa   :  { %12 = vrot.lane.b32.xlu0 %v11_v1, %s25_s0  ;;  %9 = vst.msk [vmem:[#allocation0] sm:$0x1] %vm8_vm0, %v7_v2  }
  0x7c   :  { %v13_v3 = vpop.permute.xlu0 %12  }
  0x7d   :  { %15 = vst.msk [vmem:[#allocation0] sm:$0x1] %vm14_vm1, %v13_v3  }
  0x84   :  { %v20_v4 = vld [vmem:[#allocation0] sm:$0x1] }
  0x85   :  { %23 = vst [vmem:[%s43_s1] sm:$0x1] %v20_v4 }

// kernel: tile.24
= control target key start
LH: loop header
LB: loop body
LE: loop exit
PB: predicated region body
PF: predicated region fallthrough
CT: control target
= control target key end

     0   :  { %s28_s0 = inlined_call_operand.vmem [shape: f32[8], index: 0, kind: input, shape index: {}]   ;;  %s29_s1 = inlined_call_operand.vmem [shape: f32[16,8], index: 1, kind: output, shape index: {}]  }
   0x1   :  { %v4_v0 = vld [vmem:[%s28_s0] ss:$0 sm:$0xff] }
   0x2   :  { %5 = vst [vmem:[%s29_s1] sm:$0xff] %v4_v0  ;;  %8 = vst [vmem:[%s29_s1 + $0x8] sm:$0xff] %v4_v0 }

// kernel: upsample_forward.1
= control target key start
LH: loop header
LB: loop body
LE: loop exit
PB: predicated region body
PF: predicated region fallthrough
CT: control target
= control target key end

     0   :  { %s3453_s12 = smov 0   ;;  %s5472_s0 = inlined_call_operand.vmem [shape: f32[2,18,144], index: 0, kind: input, shape index: {}]   ;;  %s5473_s1 = inlined_call_operand.vmem [shape: f32[56,16,128], index: 1, kind: input, shape index: {}]   ;;  %s5474_s2 = inlined_call_operand.vmem [shape: f32[16,128], index: 2, kind: input, shape index: {}]   ;;  %s5475_s3 = inlined_call_operand.vmem [shape: f32[2,16,2,128], index: 3, kind: output, shape index: {}]  }
   0x1 LB: > { %s3217_s13 = sadd.s32 4294967295, %s3402_s12   ;;  %p3221_p0 = scmp.ge.s32.totalorder %s3402_s12, 1  ;;  %s3402_s12 = sphi %s3453_s12, %s13_s12  }
   0x2   : > { %p137_p1 = scmp.lt.s32.totalorder %s3402_s12, 3 }
   0x4   : > { %p138_p2 = pnand %p3221_p0, %p137_p1 }
   0x6   : > { %141 = sbr.rel (%p138_p2) target bundleno = 5016 (0x1398), region = 32 }
   0xb   : > { %v177_v0 = vld [vmem:[%s5473_s1] sm:$0xff]  ;;  %s3404_s16 = smov 7   ;;  %v3226_v1 = vld [vmem:[%s5473_s1 + $0x18] sm:$0xff]  ;;  %v178_v2 = vld [vmem:[%s5473_s1 + $0x8] sm:$0xff]  ;;  %s3405_s21 = smov 6   ;;  %vm661_vm0 = vcmask 1040384  }
   0xc   : > { %181 = vrot.lane.b32.xlu0 %v177_v0, %s3404_s16  ;;  %217 = vrot.lane.b32.xlu1 %v3226_v1, %s3405_s21  ;;  %v3228_v3 = vld [vmem:[%s5473_s1 + $0x28] sm:$0xff]  ;;  %v3225_v4 = vld [vmem:[%s5473_s1 + $0x10] sm:$0xff]  ;;  %s5520_s26 = smov 5   ;;  %s5516_s4 = smov 4   ;;  %vm686_vm1 = vcmask 1046528   ;;  %vm203_vm2 = vcmask 990208  }
   0xd   : > { %v3230_v5 = vld [vmem:[%s5473_s1 + $0x38] sm:$0xff]  ;;  %v3227_v6 = vld [vmem:[%s5473_s1 + $0x20] sm:$0xff]  ;;  %v3232_v7 = vld [vmem:[%s5473_s1 + $0x48] sm:$0xff]  ;;  %s5514_s9 = smov 3   ;;  %s5512_s17 = smov 2   ;;  %vm237_vm3 = vcmask 998400  }
   0xe   : > { %v3229_v8 = vld [vmem:[%s5473_s1 + $0x30] sm:$0xff]  ;;  %v3234_v9 = vld [vmem:[%s5473_s1 + $0x58] sm:$0xff]  ;;  %v3231_v10 = vld [vmem:[%s5473_s1 + $0x40] sm:$0xff]  ;;  %s5502_s23 = smov 1   ;;  %s5498_s29 = smov 15   ;;  %vm271_vm4 = vcmask 1006592  }
   0xf   : > { %v3236_v11 = vld [vmem:[%s5473_s1 + $0x68] sm:$0xff]  ;;  %v3233_v12 = vld [vmem:[%s5473_s1 + $0x50] sm:$0xff]  ;;  %v3238_v13 = vld [vmem:[%s5473_s1 + $0x78] sm:$0xff]  ;;  %s5494_s8 = smov 14   ;;  %s5476_s18 = smov 13   ;;  %vm305_vm5 = vcmask 1014784  }
  0x10   : > { %183 = vrot.lane.b32.xlu0 %v178_v2, %s3404_s16  ;;  %251 = vrot.lane.b32.xlu1 %v3228_v3, %s5520_s26  ;;  %v3235_v14 = vld [vmem:[%s5473_s1 + $0x60] sm:$0xff]  ;;  %v3240_v15 = vld [vmem:[%s5473_s1 + $0x88] sm:$0xff]  ;;  %p161_p3 = scmp.lt.s32.totalorder %s3217_s13, 1  ;;  %s3414_s28 = smov 121   ;;  %vm339_vm6 = vcmask 1022976   ;;  %vm373_vm7 = vcmask 1031168  }
  0x11   : > { %v3237_v16 = vld [vmem:[%s5473_s1 + $0x70] sm:$0xff]  ;;  %v3242_v17 = vld [vmem:[%s5473_s1 + $0x98] sm:$0xff]  ;;  %v3239_v18 = vld [vmem:[%s5473_s1 + $0x80] sm:$0xff]  ;;  %s5524_s30 = smov 122   ;;  %s5518_s5 = smov 123   ;;  %vm407_vm8 = vcmask 1039360  }
  0x12   : > { %v3241_v19 = vld [vmem:[%s5473_s1 + $0x90] sm:$0xff]  ;;  %s5717_s13 = smov (!%p161_p3, %s3217_s13), 1  ;;  %s5510_s6 = smov 124   ;;  %vm441_vm9 = vcmask 924672   ;;  %vm475_vm10 = vcmask 932864   ;;  %vm509_vm11 = vcmask 941056  }
  0x13   : > { %s3354_s22 = smul.u32 48, %s5717_s13  ;;  %s5508_s7 = smov 125   ;;  %vm543_vm12 = vcmask 949248   ;;  %vm577_vm13 = vcmask 957440   ;;  %vm611_vm14 = vcmask 965632   ;;  %vm645_vm15 = vcmask 973824  }
  0x14   : > { %215 = vrot.lane.b32.xlu0 %v3225_v4, %s3405_s21  ;;  %285 = vrot.lane.b32.xlu1 %v3230_v5, %s5516_s4  ;;  %s5504_s10 = smov 126   ;;  %s5500_s11 = smov 127  }
  0x15   : > { %s3551_s27 = scalar_lea.vmem %s5472_s0, %s3354_s22  ;;  %s5496_s14 = smov 113  }
  0x16   : > { %v3554_v20 = vld [vmem:[%s3551_s27] sm:$0xff]  ;;  %v3558_v23 = vld [vmem:[%s3551_s27 + $0x8] sm:$0xff]  ;;  %v3561_v24 = vld [vmem:[%s3551_s27 + $0x10] sm:$0xff]  ;;  %s5492_s15 = smov 114   ;;  %s5480_s19 = smov 115  }
  0x17   : > { %v3567_v28 = vld [vmem:[%s3551_s27 + $0x18] sm:$0xff]  ;;  %s5478_s24 = smov 12   ;;  %s5666_s25 = smov 1  }
  0x18   : > { %249 = vrot.lane.b32.xlu0 %v3227_v6, %s5520_s26  ;;  %319 = vrot.lane.b32.xlu1 %v3232_v7, %s5514_s9  ;;  %s5710_s22 = smov 4  }
  0x1c   : > { %283 = vrot.lane.b32.xlu0 %v3229_v8, %s5516_s4  ;;  %353 = vrot.lane.b32.xlu1 %v3234_v9, %s5512_s17 }
  0x20   : > { %317 = vrot.lane.b32.xlu0 %v3231_v10, %s5514_s9  ;;  %387 = vrot.lane.b32.xlu1 %v3236_v11, %s5502_s23 }
  0x24   : > { %351 = vrot.lane.b32.xlu0 %v3233_v12, %s5512_s17  ;;  %421 = vrot.lane.b32.xlu1 %v3238_v13, %s5498_s29 }
  0x28   : > { %385 = vrot.lane.b32.xlu0 %v3235_v14, %s5502_s23  ;;  %455 = vrot.lane.b32.xlu1 %v3240_v15, %s5494_s8 }
  0x2c   : > { %419 = vrot.lane.b32.xlu0 %v3237_v16, %s5498_s29  ;;  %489 = vrot.lane.b32.xlu1 %v3242_v17, %s5476_s18 }
  0x30   : > { %453 = vrot.lane.b32.xlu0 %v3239_v18, %s5494_s8 }
  0x34   : > { %487 = vrot.lane.b32.xlu0 %v3241_v19, %s5476_s18  ;;  %v3243_v19 = vld [vmem:[%s5473_s1 + $0xa0] sm:$0xff]  ;;  %s5484_s18 = smov 116  }
  0x7e   : > { %v182_v21 = vpop.permute.xlu0 %181  ;;  %v218_v30 = vpop.permute.xlu1 %217 }
  0x7f   : > { %v187_v22 = vmul.f32 %v182_v21, %v3554_v20  ;;  %v188_v26 = vmul.f32 %v182_v21, %v3558_v23  ;;  %v223_v33 = vmul.f32 %v218_v30, %v3561_v24  ;;  %v224_v38 = vmul.f32 %v218_v30, %v3567_v28 }
  0x81   : > { %195 = vrot.lane.b32.xlu1 %v187_v22, %s3414_s28  ;;  %v3244_v22 = vld [vmem:[%s5473_s1 + $0xa8] sm:$0xff] }
  0x82   : > { %v184_v25 = vpop.permute.xlu0 %183  ;;  %v252_v37 = vpop.permute.xlu1 %251 }
  0x83   : > { %v189_v27 = vmul.f32 %v184_v25, %v3561_v24  ;;  %v190_v31 = vmul.f32 %v184_v25, %v3567_v28  ;;  %v257_v39 = vmul.f32 %v252_v37, %v3561_v24  ;;  %v258_v44 = vmul.f32 %v252_v37, %v3567_v28 }
  0x85   : > { %199 = vrot.lane.b32.xlu0 %v189_v27, %s3414_s28  ;;  %197 = vrot.lane.b32.xlu1 %v188_v26, %s3414_s28 }
  0x86   : > { %v216_v29 = vpop.permute.xlu0 %215  ;;  %v286_v43 = vpop.permute.xlu1 %285 }
  0x87   : > { %v221_v32 = vmul.f32 %v216_v29, %v3554_v20  ;;  %v222_v35 = vmul.f32 %v216_v29, %v3558_v23  ;;  %v291_v45 = vmul.f32 %v286_v43, %v3561_v24  ;;  %v292_v50 = vmul.f32 %v286_v43, %v3567_v28 }
  0x89   : > { %229 = vrot.lane.b32.xlu0 %v221_v32, %s5524_s30  ;;  %201 = vrot.lane.b32.xlu1 %v190_v31, %s3414_s28 }
  0x8a   : > { %v250_v34 = vpop.permute.xlu0 %249  ;;  %v320_v49 = vpop.permute.xlu1 %319 }
  0x8b   : > { %v255_v36 = vmul.f32 %v250_v34, %v3554_v20  ;;  %v256_v41 = vmul.f32 %v250_v34, %v3558_v23  ;;  %v325_v51 = vmul.f32 %v320_v49, %v3561_v24  ;;  %v326_v56 = vmul.f32 %v320_v49, %v3567_v28 }
  0x8d   : > { %233 = vrot.lane.b32.xlu0 %v223_v33, %s5524_s30  ;;  %231 = vrot.lane.b32.xlu1 %v222_v35, %s5524_s30 }
  0x8e   : > { %v284_v40 = vpop.permute.xlu0 %283  ;;  %v354_v55 = vpop.permute.xlu1 %353 }
  0x8f   : > { %v289_v42 = vmul.f32 %v284_v40, %v3554_v20  ;;  %v290_v47 = vmul.f32 %v284_v40, %v3558_v23  ;;  %v359_v57 = vmul.f32 %v354_v55, %v3561_v24  ;;  %v360_v62 = vmul.f32 %v354_v55, %v3567_v28 }
  0x91   : > { %263 = vrot.lane.b32.xlu0 %v255_v36, %s5518_s5  ;;  %235 = vrot.lane.b32.xlu1 %v224_v38, %s5524_s30 }
  0x92   : > { %v318_v46 = vpop.permute.xlu0 %317  ;;  %v388_v61 = vpop.permute.xlu1 %387 }
  0x93   : > { %v323_v48 = vmul.f32 %v318_v46, %v3554_v20  ;;  %v324_v53 = vmul.f32 %v318_v46, %v3558_v23  ;;  %v393_v63 = vmul.f32 %v388_v61, %v3561_v24  ;;  %v394_v4 = vmul.f32 %v388_v61, %v3567_v28 }
  0x95   : > { %267 = vrot.lane.b32.xlu0 %v257_v39, %s5518_s5  ;;  %265 = vrot.lane.b32.xlu1 %v256_v41, %s5518_s5 }
  0x96   : > { %v352_v52 = vpop.permute.xlu0 %351  ;;  %v422_v3 = vpop.permute.xlu1 %421 }
  0x97   : > { %v357_v54 = vmul.f32 %v352_v52, %v3554_v20  ;;  %v358_v59 = vmul.f32 %v352_v52, %v3558_v23  ;;  %v427_v5 = vmul.f32 %v422_v3, %v3561_v24  ;;  %v428_v10 = vmul.f32 %v422_v3, %v3567_v28 }
  0x99   : > { %297 = vrot.lane.b32.xlu0 %v289_v42, %s5510_s6  ;;  %269 = vrot.lane.b32.xlu1 %v258_v44, %s5518_s5 }
  0x9a   : > { %v386_v58 = vpop.permute.xlu0 %385  ;;  %v456_v9 = vpop.permute.xlu1 %455 }
  0x9b   : > { %v391_v60 = vmul.f32 %v386_v58, %v3554_v20  ;;  %v392_v1 = vmul.f32 %v386_v58, %v3558_v23  ;;  %v461_v11 = vmul.f32 %v456_v9, %v3561_v24  ;;  %v462_v16 = vmul.f32 %v456_v9, %v3567_v28  ;;  %v3246_v9 = vld [vmem:[%s5473_s1 + $0xb8] sm:$0xff] }
  0x9d   : > { %301 = vrot.lane.b32.xlu0 %v291_v45, %s5510_s6  ;;  %299 = vrot.lane.b32.xlu1 %v290_v47, %s5510_s6 }
  0x9e   : > { %v420_v0 = vpop.permute.xlu0 %419  ;;  %v490_v15 = vpop.permute.xlu1 %489 }
  0x9f   : > { %v425_v2 = vmul.f32 %v420_v0, %v3554_v20  ;;  %v426_v7 = vmul.f32 %v420_v0, %v3558_v23  ;;  %v495_v17 = vmul.f32 %v490_v15, %v3561_v24  ;;  %v496_v21 = vmul.f32 %v490_v15, %v3567_v28 }
  0xa1   : > { %331 = vrot.lane.b32.xlu0 %v323_v48, %s5508_s7  ;;  %303 = vrot.lane.b32.xlu1 %v292_v50, %s5510_s6 }
  0xa2   : > { %v454_v6 = vpop.permute.xlu0 %453 }
  0xa3   : > { %v459_v8 = vmul.f32 %v454_v6, %v3554_v20  ;;  %v460_v13 = vmul.f32 %v454_v6, %v3558_v23 }
  0xa5   : > { %335 = vrot.lane.b32.xlu0 %v325_v51, %s5508_s7  ;;  %333 = vrot.lane.b32.xlu1 %v324_v53, %s5508_s7 }
  0xa6   : > { %v488_v12 = vpop.permute.xlu0 %487 }
  0xa7   : > { %v493_v14 = vmul.f32 %v488_v12, %v3554_v20  ;;  %v494_v18 = vmul.f32 %v488_v12, %v3558_v23 }
  0xa9   : > { %365 = vrot.lane.b32.xlu0 %v357_v54, %s5504_s10  ;;  %337 = vrot.lane.b32.xlu1 %v326_v56, %s5508_s7 }
  0xad   : > { %369 = vrot.lane.b32.xlu0 %v359_v57, %s5504_s10  ;;  %367 = vrot.lane.b32.xlu1 %v358_v59, %s5504_s10 }
  0xb1   : > { %399 = vrot.lane.b32.xlu0 %v391_v60, %s5500_s11  ;;  %371 = vrot.lane.b32.xlu1 %v360_v62, %s5504_s10 }
  0xb5   : > { %403 = vrot.lane.b32.xlu0 %v393_v63, %s5500_s11  ;;  %401 = vrot.lane.b32.xlu1 %v392_v1, %s5500_s11 }
  0xb9   : > { %433 = vrot.lane.b32.xlu0 %v425_v2, %s5496_s14  ;;  %405 = vrot.lane.b32.xlu1 %v394_v4, %s5500_s11 }
  0xbd   : > { %437 = vrot.lane.b32.xlu0 %v427_v5, %s5496_s14  ;;  %435 = vrot.lane.b32.xlu1 %v426_v7, %s5496_s14 }
  0xc1   : > { %467 = vrot.lane.b32.xlu0 %v459_v8, %s5492_s15  ;;  %439 = vrot.lane.b32.xlu1 %v428_v10, %s5496_s14  ;;  %v3245_v8 = vld [vmem:[%s5473_s1 + $0xb0] sm:$0xff] }
  0xc5   : > { %471 = vrot.lane.b32.xlu0 %v461_v11, %s5492_s15  ;;  %469 = vrot.lane.b32.xlu1 %v460_v13, %s5492_s15 }
  0xc9   : > { %501 = vrot.lane.b32.xlu0 %v493_v14, %s5480_s19  ;;  %473 = vrot.lane.b32.xlu1 %v462_v16, %s5492_s15 }
  0xcd   : > { %505 = vrot.lane.b32.xlu0 %v495_v17, %s5480_s19  ;;  %503 = vrot.lane.b32.xlu1 %v494_v18, %s5480_s19 }
  0xd1   : > { %521 = vrot.lane.b32.xlu0 %v3243_v19, %s5478_s24  ;;  %507 = vrot.lane.b32.xlu1 %v496_v21, %s5480_s19  ;;  %s5482_s19 = smov 11   ;;  %v3247_v21 = vld [vmem:[%s5473_s1 + $0xc0] sm:$0xff] }
  0xd5   : > { %523 = vrot.lane.b32.xlu1 %v3244_v22, %s5478_s24  ;;  %s5488_s24 = smov 117   ;;  %v3248_v22 = vld [vmem:[%s5473_s1 + $0xc8] sm:$0xff] }
  0xf3   : > { %v3653_v25 = vpop.permute.xlu1 %195 }
  0xf7   : > { %v3655_v26 = vpop.permute.xlu0 %199  ;;  %v3657_v27 = vpop.permute.xlu1 %197 }
  0xfb   : > { %v3659_v29 = vpop.permute.xlu0 %229  ;;  %v3661_v30 = vpop.permute.xlu1 %201 }
  0xff   : > { %v3663_v31 = vpop.permute.xlu0 %233  ;;  %v3665_v32 = vpop.permute.xlu1 %231 }
 0x103   : > { %v3667_v33 = vpop.permute.xlu0 %263  ;;  %v3669_v34 = vpop.permute.xlu1 %235 }
 0x107   : > { %v3671_v35 = vpop.permute.xlu0 %267  ;;  %v3673_v36 = vpop.permute.xlu1 %265 }
 0x10b   : > { %v3675_v37 = vpop.permute.xlu0 %297  ;;  %v3677_v38 = vpop.permute.xlu1 %269 }
 0x10f   : > { %v3679_v39 = vpop.permute.xlu0 %301  ;;  %v3681_v40 = vpop.permute.xlu1 %299 }
 0x113   : > { %v3683_v41 = vpop.permute.xlu0 %331  ;;  %v3685_v42 = vpop.permute.xlu1 %303 }
 0x117   : > { %v3687_v43 = vpop.permute.xlu0 %335  ;;  %v3689_v44 = vpop.permute.xlu1 %333 }
 0x11b   : > { %v3691_v45 = vpop.permute.xlu0 %365  ;;  %v3693_v46 = vpop.permute.xlu1 %337 }
 0x11f   : > { %v3695_v47 = vpop.permute.xlu0 %369  ;;  %v3697_v48 = vpop.permute.xlu1 %367 }
 0x123   : > { %v3699_v49 = vpop.permute.xlu0 %399  ;;  %v3701_v50 = vpop.permute.xlu1 %371 }
 0x127   : > { %v3703_v51 = vpop.permute.xlu0 %403  ;;  %v3705_v52 = vpop.permute.xlu1 %401 }
 0x12b   : > { %v3707_v53 = vpop.permute.xlu0 %433  ;;  %v3709_v54 = vpop.permute.xlu1 %405 }
 0x12f   : > { %v3711_v55 = vpop.permute.xlu0 %437  ;;  %v3713_v56 = vpop.permute.xlu1 %435 }
 0x133   : > { %v3715_v57 = vpop.permute.xlu0 %467  ;;  %v3717_v58 = vpop.permute.xlu1 %439 }
 0x137   : > { %v3719_v59 = vpop.permute.xlu0 %471  ;;  %v3721_v60 = vpop.permute.xlu1 %469 }
 0x13b   : > { %v3723_v61 = vpop.permute.xlu0 %501  ;;  %v3725_v62 = vpop.permute.xlu1 %473 }
 0x13f   : > { %v3727_v63 = vpop.permute.xlu0 %505  ;;  %v3729_v0 = vpop.permute.xlu1 %503 }
 0x140   : > { %5530 = vst [vmem:[#allocation2_spill] sm:$0xff] %v3727_v63 }
 0x143   : > { %v522_v1 = vpop.permute.xlu0 %521  ;;  %v3731_v2 = vpop.permute.xlu1 %507 }
 0x144   : > { %v527_v3 = vmul.f32 %v522_v1, %v3554_v20  ;;  %v528_v4 = vmul.f32 %v522_v1, %v3558_v23 }
 0x146   : > { %535 = vrot.lane.b32.xlu0 %v527_v3, %s5484_s18  ;;  %537 = vrot.lane.b32.xlu1 %v528_v4, %s5484_s18 }
 0x147   : > { %v524_v5 = vpop.permute.xlu1 %523 }
 0x148   : > { %v529_v6 = vmul.f32 %v524_v5, %v3561_v24  ;;  %v530_v7 = vmul.f32 %v524_v5, %v3567_v28 }
 0x14a   : > { %541 = vrot.lane.b32.xlu1 %v530_v7, %s5484_s18  ;;  %539 = vrot.lane.b32.xlu0 %v529_v6, %s5484_s18  ;;  %s5486_s18 = smov 10  }
 0x14e   : > { %555 = vrot.lane.b32.xlu0 %v3245_v8, %s5482_s19  ;;  %557 = vrot.lane.b32.xlu1 %v3246_v9, %s5482_s19  ;;  %s5506_s19 = smov 118  }
 0x1b8   : > { %v3749_v10 = vpop.permute.xlu0 %535  ;;  %v3751_v11 = vpop.permute.xlu1 %537 }
 0x1bc   : > { %v3753_v12 = vpop.permute.xlu0 %539  ;;  %v3755_v13 = vpop.permute.xlu1 %541 }
 0x1bd   : > { %5531 = vst [vmem:[#allocation3_spill] sm:$0xff] %v3753_v12  ;;  %5532 = vst [vmem:[#allocation4_spill] sm:$0xff] %v3755_v13 }
 0x1c0   : > { %v556_v14 = vpop.permute.xlu0 %555  ;;  %v558_v15 = vpop.permute.xlu1 %557 }
 0x1c1   : > { %v561_v16 = vmul.f32 %v556_v14, %v3554_v20  ;;  %v562_v17 = vmul.f32 %v556_v14, %v3558_v23  ;;  %v563_v18 = vmul.f32 %v558_v15, %v3561_v24  ;;  %v564_v19 = vmul.f32 %v558_v15, %v3567_v28 }
 0x1c3   : > { %571 = vrot.lane.b32.xlu1 %v562_v17, %s5488_s24  ;;  %569 = vrot.lane.b32.xlu0 %v561_v16, %s5488_s24  ;;  %v3249_v16 = vld [vmem:[%s5473_s1 + $0xd0] sm:$0xff]  ;;  %v3250_v17 = vld [vmem:[%s5473_s1 + $0xd8] sm:$0xff] }
 0x1c7   : > { %575 = vrot.lane.b32.xlu1 %v564_v19, %s5488_s24  ;;  %573 = vrot.lane.b32.xlu0 %v563_v18, %s5488_s24  ;;  %s5490_s24 = smov 9  }
 0x1cb   : > { %589 = vrot.lane.b32.xlu0 %v3247_v21, %s5486_s18  ;;  %591 = vrot.lane.b32.xlu1 %v3248_v22, %s5486_s18  ;;  %s5577_s18 = smov 13  }
 0x235   : > { %v3773_v1 = vpop.permute.xlu0 %569  ;;  %v3775_v3 = vpop.permute.xlu1 %571 }
 0x236   : > { %5533 = vst [vmem:[#allocation5_spill] sm:$0xff] %v3773_v1  ;;  %5534 = vst [vmem:[#allocation6_spill] sm:$0xff] %v3775_v3 }
 0x239   : > { %v3777_v4 = vpop.permute.xlu0 %573  ;;  %v3779_v5 = vpop.permute.xlu1 %575 }
 0x23a   : > { %5535 = vst [vmem:[#allocation7_spill] sm:$0xff] %v3777_v4  ;;  %5536 = vst [vmem:[#allocation8_spill] sm:$0xff] %v3779_v5 }
 0x23d   : > { %v590_v6 = vpop.permute.xlu0 %589  ;;  %v592_v7 = vpop.permute.xlu1 %591 }
 0x23e   : > { %v595_v8 = vmul.f32 %v590_v6, %v3554_v20  ;;  %v596_v9 = vmul.f32 %v590_v6, %v3558_v23  ;;  %v597_v14 = vmul.f32 %v592_v7, %v3561_v24  ;;  %v598_v15 = vmul.f32 %v592_v7, %v3567_v28 }
 0x240   : > { %605 = vrot.lane.b32.xlu1 %v596_v9, %s5506_s19  ;;  %603 = vrot.lane.b32.xlu0 %v595_v8, %s5506_s19 }
 0x244   : > { %609 = vrot.lane.b32.xlu1 %v598_v15, %s5506_s19  ;;  %607 = vrot.lane.b32.xlu0 %v597_v14, %s5506_s19  ;;  %v3251_v14 = vld [vmem:[%s5473_s1 + $0xe0] sm:$0xff]  ;;  %v3252_v15 = vld [vmem:[%s5473_s1 + $0xe8] sm:$0xff] }
 0x248   : > { %623 = vrot.lane.b32.xlu0 %v3249_v16, %s5490_s24  ;;  %625 = vrot.lane.b32.xlu1 %v3250_v17, %s5490_s24  ;;  %s3431_s24 = smov 119   ;;  %v663_v17 = vrot.slane %v3252_v15, 7  ;;  %v3832_v15 = vld [vmem:[%s3551_s27] sm:$0xfe] }
 0x2b2   : > { %v3797_v18 = vpop.permute.xlu0 %603  ;;  %v3799_v19 = vpop.permute.xlu1 %605 }
 0x2b3   : > { %5537 = vst [vmem:[#allocation9_spill] sm:$0xff] %v3797_v18  ;;  %5538 = vst [vmem:[#allocation10_spill] sm:$0xff] %v3799_v19  ;;  %v3253_v19 = vld [vmem:[%s5473_s1 + $0xf0] sm:$0xff] }
 0x2b6   : > { %v3801_v21 = vpop.permute.xlu0 %607  ;;  %v3803_v22 = vpop.permute.xlu1 %609 }
 0x2b7   : > { %5539 = vst [vmem:[#allocation11_spill] sm:$0xff] %v3801_v21  ;;  %5540 = vst [vmem:[#allocation12_spill] sm:$0xff] %v3803_v22 }
 0x2ba   : > { %v624_v6 = vpop.permute.xlu0 %623  ;;  %v626_v7 = vpop.permute.xlu1 %625 }
 0x2bb   : > { %v629_v8 = vmul.f32 %v624_v6, %v3554_v20  ;;  %v630_v9 = vmul.f32 %v624_v6, %v3558_v23  ;;  %v631_v16 = vmul.f32 %v626_v7, %v3561_v24  ;;  %v632_v20 = vmul.f32 %v626_v7, %v3567_v28 }
 0x2bc   : > { %v662_v23 = vrot.slane %v3251_v14, 7 }
 0x2bd   : > { %639 = vrot.lane.b32.xlu1 %v630_v9, %s3431_s24  ;;  %637 = vrot.lane.b32.xlu0 %v629_v8, %s3431_s24 }
 0x2be   : > { %v664_v6 = vsel %vm661_vm0, %v662_v23, %v663_v17 }
 0x2c1   : > { %643 = vrot.lane.b32.xlu1 %v632_v20, %s3431_s24  ;;  %641 = vrot.lane.b32.xlu0 %v631_v16, %s3431_s24  ;;  %v3835_v16 = vld [vmem:[%s3551_s27 + $0x8] sm:$0xfe] }
 0x2c5   : > { %667 = vrot.lane.b32.xlu1 %v664_v6, %s3404_s16  ;;  %665 = vrot.lane.b32.xlu0 %v662_v23, %s3404_s16 }
 0x2c9   : > { %669 = vrot.lane.b32.xlu0 %v663_v17, %s3404_s16 }
 0x32f   : > { %v3823_v8 = vpop.permute.xlu0 %637  ;;  %v3825_v7 = vpop.permute.xlu1 %639 }
 0x330   : > { %5541 = vst [vmem:[#allocation13_spill] sm:$0xff] %v3823_v8  ;;  %5542 = vst [vmem:[#allocation14_spill] sm:$0xff] %v3825_v7  ;;  %v3842_v8 = vld [vmem:[%s3551_s27 + $0x20] sm:$0x1]  ;;  %v3845_v7 = vld [vmem:[%s3551_s27 + $0x28] sm:$0x1] }
 0x333   : > { %v3827_v9 = vpop.permute.xlu0 %641  ;;  %v3829_v14 = vpop.permute.xlu1 %643 }
 0x334   : > { %5543 = vst [vmem:[#allocation15_spill] sm:$0xff] %v3827_v9  ;;  %5544 = vst [vmem:[#allocation16_spill] sm:$0xff] %v3829_v14 }
 0x337   : > { %v666_v20 = vpop.permute.xlu0 %665  ;;  %v668_v21 = vpop.permute.xlu1 %667 }
 0x338   : > { %v674_v6 = vmul.f32 %v666_v20, %v3832_v15  ;;  %v675_v23 = vmul.f32 %v666_v20, %v3835_v16  ;;  %v676_v17 = vmul.f32 %v668_v21, %v3561_v24  ;;  %v677_v22 = vmul.f32 %v668_v21, %v3567_v28  ;;  %v3254_v20 = vld [vmem:[%s5473_s1 + $0xf8] sm:$0xff] }
 0x339   : > { %v717_v1 = vrot.slane %v3254_v20, 7 }
 0x33a   : > { %v687_v9 = vrot.slane %v674_v6, 1  ;;  %v690_v14 = vrot.slane %v675_v23, 1  ;;  %v688_v4 = vrot.slane %v676_v17, 1  ;;  %v691_v5 = vrot.slane %v677_v22, 1 }
 0x33b   : > { %v670_v18 = vpop.permute.xlu0 %669  ;;  %v716_v17 = vrot.slane %v3253_v19, 7 }
 0x33c   : > { %v678_v21 = vmul.f32 %v670_v18, %v3842_v8  ;;  %v679_v12 = vmul.f32 %v670_v18, %v3845_v7  ;;  %v692_v13 = vsel %vm686_vm1, %v690_v14, %v691_v5  ;;  %v689_v6 = vsel %vm686_vm1, %v687_v9, %v688_v4 }
 0x33d   : > { %699 = vrot.lane.b32.xlu0 %v692_v13, %s3414_s28  ;;  %697 = vrot.lane.b32.xlu1 %v689_v6, %s3414_s28  ;;  %v718_v18 = vsel %vm661_vm0, %v716_v17, %v717_v1 }
 0x33e   : > { %v693_v22 = vrot.slane %v678_v21, 1  ;;  %v695_v23 = vrot.slane %v679_v12, 1 }
 0x340   : > { %v696_v3 = vsel %vm686_vm1, %v691_v5, %v695_v23  ;;  %v694_v63 = vsel %vm686_vm1, %v688_v4, %v693_v22 }
 0x341   : > { %703 = vrot.lane.b32.xlu0 %v696_v3, %s3414_s28  ;;  %701 = vrot.lane.b32.xlu1 %v694_v63, %s3414_s28 }
 0x345   : > { %721 = vrot.lane.b32.xlu0 %v718_v18, %s3405_s21  ;;  %719 = vrot.lane.b32.xlu1 %v716_v17, %s3405_s21  ;;  %v3255_v17 = vld [vmem:[%s5473_s1 + $0x100] sm:$0xff]  ;;  %v3256_v18 = vld [vmem:[%s5473_s1 + $0x108] sm:$0xff] }
 0x349   : > { %723 = vrot.lane.b32.xlu1 %v717_v1, %s3405_s21 }
 0x3af   : > { %v3867_v13 = vpop.permute.xlu0 %699  ;;  %v3869_v12 = vpop.permute.xlu1 %697 }
 0x3b0   : > { %5545 = vst [vmem:[#allocation17_spill] sm:$0xff] %v3867_v13  ;;  %5546 = vst [vmem:[#allocation18_spill] sm:$0xff] %v3869_v12 }
 0x3b3   : > { %v3871_v19 = vpop.permute.xlu0 %703  ;;  %v3873_v5 = vpop.permute.xlu1 %701 }
 0x3b4   : > { %5547 = vst [vmem:[#allocation19_spill] sm:$0xff] %v3871_v19  ;;  %5548 = vst [vmem:[#allocation20_spill] sm:$0xff] %v3873_v5 }
 0x3b7   : > { %v722_v4 = vpop.permute.xlu0 %721  ;;  %v720_v3 = vpop.permute.xlu1 %719 }
 0x3b8   : > { %v730_v63 = vmul.f32 %v722_v4, %v3561_v24  ;;  %v731_v9 = vmul.f32 %v722_v4, %v3567_v28  ;;  %v728_v14 = vmul.f32 %v720_v3, %v3832_v15  ;;  %v729_v20 = vmul.f32 %v720_v3, %v3835_v16 }
 0x3ba   : > { %v741_v21 = vrot.slane %v730_v63, 1  ;;  %v744_v1 = vrot.slane %v731_v9, 1  ;;  %v740_v6 = vrot.slane %v728_v14, 1  ;;  %v743_v22 = vrot.slane %v729_v20, 1 }
 0x3bb   : > { %v724_v23 = vpop.permute.xlu1 %723  ;;  %v769_v14 = vrot.slane %v3255_v17, 7  ;;  %v770_v20 = vrot.slane %v3256_v18, 7 }
 0x3bc   : > { %v732_v5 = vmul.f32 %v724_v23, %v3842_v8  ;;  %v733_v4 = vmul.f32 %v724_v23, %v3845_v7  ;;  %v745_v19 = vsel %vm686_vm1, %v743_v22, %v744_v1  ;;  %v742_v3 = vsel %vm686_vm1, %v740_v6, %v741_v21 }
 0x3bd   : > { %752 = vrot.lane.b32.xlu1 %v745_v19, %s5524_s30  ;;  %750 = vrot.lane.b32.xlu0 %v742_v3, %s5524_s30  ;;  %v771_v22 = vsel %vm661_vm0, %v769_v14, %v770_v20 }
 0x3be   : > { %v746_v63 = vrot.slane %v732_v5, 1  ;;  %v748_v9 = vrot.slane %v733_v4, 1 }
 0x3c0   : > { %v749_v12 = vsel %vm686_vm1, %v744_v1, %v748_v9  ;;  %v747_v13 = vsel %vm686_vm1, %v741_v21, %v746_v63 }
 0x3c1   : > { %756 = vrot.lane.b32.xlu1 %v749_v12, %s5524_s30  ;;  %754 = vrot.lane.b32.xlu0 %v747_v13, %s5524_s30 }
 0x3c5   : > { %774 = vrot.lane.b32.xlu1 %v771_v22, %s5520_s26  ;;  %772 = vrot.lane.b32.xlu0 %v769_v14, %s5520_s26  ;;  %v3258_v22 = vld [vmem:[%s5473_s1 + $0x118] sm:$0xff] }
 0x3c9   : > { %776 = vrot.lane.b32.xlu0 %v770_v20, %s5520_s26  ;;  %v3257_v20 = vld [vmem:[%s5473_s1 + $0x110] sm:$0xff] }
 0x42f   : > { %v3899_v19 = vpop.permute.xlu0 %750  ;;  %v3901_v5 = vpop.permute.xlu1 %752 }
 0x430   : > { %5549 = vst [vmem:[#allocation21_spill] sm:$0xff] %v3899_v19  ;;  %5550 = vst [vmem:[#allocation22_spill] sm:$0xff] %v3901_v5 }
 0x433   : > { %v3903_v6 = vpop.permute.xlu0 %754  ;;  %v3905_v1 = vpop.permute.xlu1 %756 }
 0x434   : > { %5551 = vst [vmem:[#allocation23_spill] sm:$0xff] %v3903_v6  ;;  %5552 = vst [vmem:[#allocation24_spill] sm:$0xff] %v3905_v1 }
 0x437   : > { %v773_v21 = vpop.permute.xlu0 %772  ;;  %v775_v12 = vpop.permute.xlu1 %774 }
 0x438   : > { %v781_v13 = vmul.f32 %v773_v21, %v3832_v15  ;;  %v782_v23 = vmul.f32 %v773_v21, %v3835_v16  ;;  %v783_v17 = vmul.f32 %v775_v12, %v3561_v24  ;;  %v784_v18 = vmul.f32 %v775_v12, %v3567_v28 }
 0x43a   : > { %v793_v4 = vrot.slane %v781_v13, 1  ;;  %v796_v3 = vrot.slane %v782_v23, 1  ;;  %v794_v63 = vrot.slane %v783_v17, 1  ;;  %v797_v9 = vrot.slane %v784_v18, 1 }
 0x43b   : > { %v777_v14 = vpop.permute.xlu0 %776  ;;  %v822_v17 = vrot.slane %v3257_v20, 7  ;;  %v823_v18 = vrot.slane %v3258_v22, 7 }
 0x43c   : > { %v785_v6 = vmul.f32 %v777_v14, %v3842_v8  ;;  %v786_v21 = vmul.f32 %v777_v14, %v3845_v7  ;;  %v798_v1 = vsel %vm686_vm1, %v796_v3, %v797_v9  ;;  %v795_v12 = vsel %vm686_vm1, %v793_v4, %v794_v63 }
 0x43d   : > { %805 = vrot.lane.b32.xlu0 %v798_v1, %s5518_s5  ;;  %803 = vrot.lane.b32.xlu1 %v795_v12, %s5518_s5  ;;  %v824_v3 = vsel %vm661_vm0, %v822_v17, %v823_v18 }
 0x43e   : > { %v799_v13 = vrot.slane %v785_v6, 1  ;;  %v801_v23 = vrot.slane %v786_v21, 1 }
 0x440   : > { %v802_v19 = vsel %vm686_vm1, %v797_v9, %v801_v23  ;;  %v800_v5 = vsel %vm686_vm1, %v794_v63, %v799_v13 }
 0x441   : > { %809 = vrot.lane.b32.xlu0 %v802_v19, %s5518_s5  ;;  %807 = vrot.lane.b32.xlu1 %v800_v5, %s5518_s5 }
 0x445   : > { %827 = vrot.lane.b32.xlu0 %v824_v3, %s5516_s4  ;;  %825 = vrot.lane.b32.xlu1 %v822_v17, %s5516_s4  ;;  %v3260_v3 = vld [vmem:[%s5473_s1 + $0x128] sm:$0xff] }
 0x449   : > { %829 = vrot.lane.b32.xlu1 %v823_v18, %s5516_s4  ;;  %v3259_v18 = vld [vmem:[%s5473_s1 + $0x120] sm:$0xff] }
 0x4af   : > { %v3931_v6 = vpop.permute.xlu0 %805  ;;  %v3933_v1 = vpop.permute.xlu1 %803 }
 0x4b0   : > { %5553 = vst [vmem:[#allocation25_spill] sm:$0xff] %v3931_v6  ;;  %5554 = vst [vmem:[#allocation26_spill] sm:$0xff] %v3933_v1 }
 0x4b3   : > { %v3935_v4 = vpop.permute.xlu0 %809  ;;  %v3937_v9 = vpop.permute.xlu1 %807 }
 0x4b4   : > { %5555 = vst [vmem:[#allocation27_spill] sm:$0xff] %v3935_v4  ;;  %5556 = vst [vmem:[#allocation28_spill] sm:$0xff] %v3937_v9 }
 0x4b7   : > { %v828_v63 = vpop.permute.xlu0 %827  ;;  %v826_v19 = vpop.permute.xlu1 %825 }
 0x4b8   : > { %v836_v5 = vmul.f32 %v828_v63, %v3561_v24  ;;  %v837_v14 = vmul.f32 %v828_v63, %v3567_v28  ;;  %v834_v20 = vmul.f32 %v826_v19, %v3832_v15  ;;  %v835_v22 = vmul.f32 %v826_v19, %v3835_v16 }
 0x4ba   : > { %v847_v21 = vrot.slane %v836_v5, 1  ;;  %v850_v12 = vrot.slane %v837_v14, 1  ;;  %v846_v13 = vrot.slane %v834_v20, 1  ;;  %v849_v23 = vrot.slane %v835_v22, 1 }
 0x4bb   : > { %v830_v17 = vpop.permute.xlu1 %829  ;;  %v875_v20 = vrot.slane %v3259_v18, 7  ;;  %v876_v22 = vrot.slane %v3260_v3, 7 }
 0x4bc   : > { %v838_v9 = vmul.f32 %v830_v17, %v3842_v8  ;;  %v839_v63 = vmul.f32 %v830_v17, %v3845_v7  ;;  %v851_v4 = vsel %vm686_vm1, %v849_v23, %v850_v12  ;;  %v848_v19 = vsel %vm686_vm1, %v846_v13, %v847_v21 }
 0x4bd   : > { %858 = vrot.lane.b32.xlu1 %v851_v4, %s5510_s6  ;;  %856 = vrot.lane.b32.xlu0 %v848_v19, %s5510_s6  ;;  %v877_v23 = vsel %vm661_vm0, %v875_v20, %v876_v22 }
 0x4be   : > { %v852_v5 = vrot.slane %v838_v9, 1  ;;  %v854_v14 = vrot.slane %v839_v63, 1 }
 0x4c0   : > { %v855_v1 = vsel %vm686_vm1, %v850_v12, %v854_v14  ;;  %v853_v6 = vsel %vm686_vm1, %v847_v21, %v852_v5 }
 0x4c1   : > { %862 = vrot.lane.b32.xlu1 %v855_v1, %s5510_s6  ;;  %860 = vrot.lane.b32.xlu0 %v853_v6, %s5510_s6 }
 0x4c5   : > { %880 = vrot.lane.b32.xlu1 %v877_v23, %s5514_s9  ;;  %878 = vrot.lane.b32.xlu0 %v875_v20, %s5514_s9  ;;  %v3262_v23 = vld [vmem:[%s5473_s1 + $0x138] sm:$0xff] }
 0x4c9   : > { %882 = vrot.lane.b32.xlu0 %v876_v22, %s5514_s9  ;;  %v3261_v22 = vld [vmem:[%s5473_s1 + $0x130] sm:$0xff] }
 0x52f   : > { %v3963_v4 = vpop.permute.xlu0 %856  ;;  %v3965_v9 = vpop.permute.xlu1 %858 }
 0x530   : > { %5557 = vst [vmem:[#allocation29_spill] sm:$0xff] %v3963_v4  ;;  %5558 = vst [vmem:[#allocation30_spill] sm:$0xff] %v3965_v9 }
 0x533   : > { %v3967_v13 = vpop.permute.xlu0 %860  ;;  %v3969_v12 = vpop.permute.xlu1 %862 }
 0x534   : > { %5559 = vst [vmem:[#allocation31_spill] sm:$0xff] %v3967_v13  ;;  %5560 = vst [vmem:[#allocation32_spill] sm:$0xff] %v3969_v12 }
 0x537   : > { %v879_v21 = vpop.permute.xlu0 %878  ;;  %v881_v1 = vpop.permute.xlu1 %880 }
 0x538   : > { %v887_v6 = vmul.f32 %v879_v21, %v3832_v15  ;;  %v888_v17 = vmul.f32 %v879_v21, %v3835_v16  ;;  %v889_v18 = vmul.f32 %v881_v1, %v3561_v24  ;;  %v890_v3 = vmul.f32 %v881_v1, %v3567_v28 }
 0x53a   : > { %v899_v63 = vrot.slane %v887_v6, 1  ;;  %v902_v19 = vrot.slane %v888_v17, 1  ;;  %v900_v5 = vrot.slane %v889_v18, 1  ;;  %v903_v14 = vrot.slane %v890_v3, 1 }
 0x53b   : > { %v883_v20 = vpop.permute.xlu0 %882  ;;  %v928_v18 = vrot.slane %v3261_v22, 7  ;;  %v929_v3 = vrot.slane %v3262_v23, 7 }
 0x53c   : > { %v891_v13 = vmul.f32 %v883_v20, %v3842_v8  ;;  %v892_v21 = vmul.f32 %v883_v20, %v3845_v7  ;;  %v904_v12 = vsel %vm686_vm1, %v902_v19, %v903_v14  ;;  %v901_v1 = vsel %vm686_vm1, %v899_v63, %v900_v5 }
 0x53d   : > { %911 = vrot.lane.b32.xlu0 %v904_v12, %s5508_s7  ;;  %909 = vrot.lane.b32.xlu1 %v901_v1, %s5508_s7  ;;  %v930_v19 = vsel %vm661_vm0, %v928_v18, %v929_v3 }
 0x53e   : > { %v905_v6 = vrot.slane %v891_v13, 1  ;;  %v907_v17 = vrot.slane %v892_v21, 1 }
 0x540   : > { %v908_v4 = vsel %vm686_vm1, %v903_v14, %v907_v17  ;;  %v906_v9 = vsel %vm686_vm1, %v900_v5, %v905_v6 }
 0x541   : > { %915 = vrot.lane.b32.xlu0 %v908_v4, %s5508_s7  ;;  %913 = vrot.lane.b32.xlu1 %v906_v9, %s5508_s7 }
 0x545   : > { %933 = vrot.lane.b32.xlu0 %v930_v19, %s5512_s17  ;;  %931 = vrot.lane.b32.xlu1 %v928_v18, %s5512_s17  ;;  %v3264_v19 = vld [vmem:[%s5473_s1 + $0x148] sm:$0xff] }
 0x549   : > { %935 = vrot.lane.b32.xlu1 %v929_v3, %s5512_s17  ;;  %v3263_v3 = vld [vmem:[%s5473_s1 + $0x140] sm:$0xff] }
 0x5af   : > { %v3995_v13 = vpop.permute.xlu0 %911  ;;  %v3997_v12 = vpop.permute.xlu1 %909 }
 0x5b0   : > { %5561 = vst [vmem:[#allocation33_spill] sm:$0xff] %v3995_v13  ;;  %5562 = vst [vmem:[#allocation34_spill] sm:$0xff] %v3997_v12 }
 0x5b3   : > { %v3999_v63 = vpop.permute.xlu0 %915  ;;  %v4001_v14 = vpop.permute.xlu1 %913 }
 0x5b4   : > { %5563 = vst [vmem:[#allocation35_spill] sm:$0xff] %v3999_v63  ;;  %5564 = vst [vmem:[#allocation36_spill] sm:$0xff] %v4001_v14 }
 0x5b7   : > { %v934_v5 = vpop.permute.xlu0 %933  ;;  %v932_v4 = vpop.permute.xlu1 %931 }
 0x5b8   : > { %v942_v9 = vmul.f32 %v934_v5, %v3561_v24  ;;  %v943_v20 = vmul.f32 %v934_v5, %v3567_v28  ;;  %v940_v22 = vmul.f32 %v932_v4, %v3832_v15  ;;  %v941_v23 = vmul.f32 %v932_v4, %v3835_v16 }
 0x5ba   : > { %v953_v21 = vrot.slane %v942_v9, 1  ;;  %v956_v1 = vrot.slane %v943_v20, 1  ;;  %v952_v6 = vrot.slane %v940_v22, 1  ;;  %v955_v17 = vrot.slane %v941_v23, 1 }
 0x5bb   : > { %v936_v18 = vpop.permute.xlu1 %935  ;;  %v981_v22 = vrot.slane %v3263_v3, 7  ;;  %v982_v23 = vrot.slane %v3264_v19, 7 }
 0x5bc   : > { %v944_v14 = vmul.f32 %v936_v18, %v3842_v8  ;;  %v945_v5 = vmul.f32 %v936_v18, %v3845_v7  ;;  %v957_v63 = vsel %vm686_vm1, %v955_v17, %v956_v1  ;;  %v954_v4 = vsel %vm686_vm1, %v952_v6, %v953_v21 }
 0x5bd   : > { %964 = vrot.lane.b32.xlu1 %v957_v63, %s5504_s10  ;;  %962 = vrot.lane.b32.xlu0 %v954_v4, %s5504_s10  ;;  %v983_v17 = vsel %vm661_vm0, %v981_v22, %v982_v23 }
 0x5be   : > { %v958_v9 = vrot.slane %v944_v14, 1  ;;  %v960_v20 = vrot.slane %v945_v5, 1 }
 0x5c0   : > { %v961_v12 = vsel %vm686_vm1, %v956_v1, %v960_v20  ;;  %v959_v13 = vsel %vm686_vm1, %v953_v21, %v958_v9 }
 0x5c1   : > { %968 = vrot.lane.b32.xlu1 %v961_v12, %s5504_s10  ;;  %966 = vrot.lane.b32.xlu0 %v959_v13, %s5504_s10  ;;  %s5600_s10 = smov 9  }
 0x5c5   : > { %986 = vrot.lane.b32.xlu1 %v983_v17, %s5502_s23  ;;  %984 = vrot.lane.b32.xlu0 %v981_v22, %s5502_s23  ;;  %v3266_v17 = vld [vmem:[%s5473_s1 + $0x158] sm:$0xff] }
 0x5c9   : > { %988 = vrot.lane.b32.xlu0 %v982_v23, %s5502_s23  ;;  %v3265_v23 = vld [vmem:[%s5473_s1 + $0x150] sm:$0xff]  ;;  %s5594_s23 = smov 117  }
 0x62f   : > { %v4027_v63 = vpop.permute.xlu0 %962  ;;  %v4029_v14 = vpop.permute.xlu1 %964 }
 0x630   : > { %5565 = vst [vmem:[#allocation37_spill] sm:$0xff] %v4027_v63  ;;  %5566 = vst [vmem:[#allocation38_spill] sm:$0xff] %v4029_v14 }
 0x633   : > { %v4031_v6 = vpop.permute.xlu0 %966  ;;  %v4033_v1 = vpop.permute.xlu1 %968 }
 0x634   : > { %5567 = vst [vmem:[#allocation39_spill] sm:$0xff] %v4031_v6  ;;  %5568 = vst [vmem:[#allocation40_spill] sm:$0xff] %v4033_v1 }
 0x637   : > { %v985_v21 = vpop.permute.xlu0 %984  ;;  %v987_v12 = vpop.permute.xlu1 %986 }
 0x638   : > { %v993_v13 = vmul.f32 %v985_v21, %v3832_v15  ;;  %v994_v18 = vmul.f32 %v985_v21, %v3835_v16  ;;  %v995_v3 = vmul.f32 %v987_v12, %v3561_v24  ;;  %v996_v19 = vmul.f32 %v987_v12, %v3567_v28 }
 0x63a   : > { %v1005_v5 = vrot.slane %v993_v13, 1  ;;  %v1008_v4 = vrot.slane %v994_v18, 1  ;;  %v1006_v9 = vrot.slane %v995_v3, 1  ;;  %v1009_v20 = vrot.slane %v996_v19, 1 }
 0x63b   : > { %v989_v22 = vpop.permute.xlu0 %988  ;;  %v1034_v3 = vrot.slane %v3265_v23, 7  ;;  %v1035_v19 = vrot.slane %v3266_v17, 7 }
 0x63c   : > { %v997_v6 = vmul.f32 %v989_v22, %v3842_v8  ;;  %v998_v21 = vmul.f32 %v989_v22, %v3845_v7  ;;  %v1010_v1 = vsel %vm686_vm1, %v1008_v4, %v1009_v20  ;;  %v1007_v12 = vsel %vm686_vm1, %v1005_v5, %v1006_v9 }
 0x63d   : > { %1017 = vrot.lane.b32.xlu0 %v1010_v1, %s5500_s11  ;;  %1015 = vrot.lane.b32.xlu1 %v1007_v12, %s5500_s11  ;;  %v1036_v4 = vsel %vm661_vm0, %v1034_v3, %v1035_v19 }
 0x63e   : > { %v1011_v13 = vrot.slane %v997_v6, 1  ;;  %v1013_v18 = vrot.slane %v998_v21, 1 }
 0x640   : > { %v1014_v63 = vsel %vm686_vm1, %v1009_v20, %v1013_v18  ;;  %v1012_v14 = vsel %vm686_vm1, %v1006_v9, %v1011_v13 }
 0x641   : > { %1021 = vrot.lane.b32.xlu0 %v1014_v63, %s5500_s11  ;;  %1019 = vrot.lane.b32.xlu1 %v1012_v14, %s5500_s11  ;;  %s5595_s11 = smov 10  }
 0x645   : > { %1039 = vrot.lane.b32.xlu0 %v1036_v4, %s5498_s29  ;;  %1037 = vrot.lane.b32.xlu1 %v1034_v3, %s5498_s29  ;;  %v3268_v4 = vld [vmem:[%s5473_s1 + $0x168] sm:$0xff] }
 0x649   : > { %1041 = vrot.lane.b32.xlu1 %v1035_v19, %s5498_s29  ;;  %v3267_v19 = vld [vmem:[%s5473_s1 + $0x160] sm:$0xff]  ;;  %s5588_s29 = smov 116  }
 0x6af   : > { %v4059_v6 = vpop.permute.xlu0 %1017  ;;  %v4061_v1 = vpop.permute.xlu1 %1015 }
 0x6b0   : > { %5569 = vst [vmem:[#allocation41_spill] sm:$0xff] %v4059_v6  ;;  %5570 = vst [vmem:[#allocation42_spill] sm:$0xff] %v4061_v1 }
 0x6b3   : > { %v4063_v5 = vpop.permute.xlu0 %1021  ;;  %v4065_v20 = vpop.permute.xlu1 %1019 }
 0x6b4   : > { %5571 = vst [vmem:[#allocation43_spill] sm:$0xff] %v4063_v5  ;;  %5572 = vst [vmem:[#allocation44_spill] sm:$0xff] %v4065_v20 }
 0x6b7   : > { %v1040_v9 = vpop.permute.xlu0 %1039  ;;  %v1038_v63 = vpop.permute.xlu1 %1037 }
 0x6b8   : > { %v1048_v14 = vmul.f32 %v1040_v9, %v3561_v24  ;;  %v1049_v22 = vmul.f32 %v1040_v9, %v3567_v28  ;;  %v1046_v23 = vmul.f32 %v1038_v63, %v3832_v15  ;;  %v1047_v17 = vmul.f32 %v1038_v63, %v3835_v16 }
 0x6ba   : > { %v1059_v21 = vrot.slane %v1048_v14, 1  ;;  %v1062_v12 = vrot.slane %v1049_v22, 1  ;;  %v1058_v13 = vrot.slane %v1046_v23, 1  ;;  %v1061_v18 = vrot.slane %v1047_v17, 1 }
 0x6bb   : > { %v1042_v3 = vpop.permute.xlu1 %1041  ;;  %v1087_v23 = vrot.slane %v3267_v19, 7  ;;  %v1088_v17 = vrot.slane %v3268_v4, 7 }
 0x6bc   : > { %v1050_v24 = vmul.f32 %v1042_v3, %v3842_v8  ;;  %v1051_v28 = vmul.f32 %v1042_v3, %v3845_v7  ;;  %v1063_v9 = vsel %vm686_vm1, %v1061_v18, %v1062_v12  ;;  %v1060_v63 = vsel %vm686_vm1, %v1058_v13, %v1059_v21 }
 0x6bd   : > { %1070 = vrot.lane.b32.xlu1 %v1063_v9, %s5496_s14  ;;  %1068 = vrot.lane.b32.xlu0 %v1060_v63, %s5496_s14  ;;  %v1089_v13 = vsel %vm661_vm0, %v1087_v23, %v1088_v17  ;;  %v4106_v9 = vld [vmem:[%s3551_s27 + $0x18] sm:$0xff] }
 0x6be   : > { %v1064_v14 = vrot.slane %v1050_v24, 1  ;;  %v1066_v22 = vrot.slane %v1051_v28, 1  ;;  %v4102_v24 = vld [vmem:[%s3551_s27 + $0x10] sm:$0xff] }
 0x6c0   : > { %v1067_v20 = vsel %vm686_vm1, %v1062_v12, %v1066_v22  ;;  %v1065_v5 = vsel %vm686_vm1, %v1059_v21, %v1064_v14 }
 0x6c1   : > { %1074 = vrot.lane.b32.xlu1 %v1067_v20, %s5496_s14  ;;  %1072 = vrot.lane.b32.xlu0 %v1065_v5, %s5496_s14  ;;  %s5589_s14 = smov 11  }
 0x6c5   : > { %1092 = vrot.lane.b32.xlu1 %v1089_v13, %s5494_s8  ;;  %1090 = vrot.lane.b32.xlu0 %v1087_v23, %s5494_s8 }
 0x6c9   : > { %1094 = vrot.lane.b32.xlu0 %v1088_v17, %s5494_s8  ;;  %s5582_s8 = smov 115  }
 0x72f   : > { %v4091_v18 = vpop.permute.xlu0 %1068  ;;  %v4093_v3 = vpop.permute.xlu1 %1070 }
 0x730   : > { %5573 = vst [vmem:[#allocation45_spill] sm:$0xff] %v4091_v18  ;;  %5574 = vst [vmem:[#allocation46_spill] sm:$0xff] %v4093_v3 }
 0x733   : > { %v4095_v12 = vpop.permute.xlu0 %1072  ;;  %v4097_v21 = vpop.permute.xlu1 %1074 }
 0x734   : > { %5575 = vst [vmem:[#allocation47_spill] sm:$0xff] %v4095_v12  ;;  %5576 = vst [vmem:[#allocation48_spill] sm:$0xff] %v4097_v21  ;;  %v3269_v12 = vld [vmem:[%s5473_s1 + $0x170] sm:$0xff] }
 0x737   : > { %v1091_v20 = vpop.permute.xlu0 %1090  ;;  %v1093_v19 = vpop.permute.xlu1 %1092 }
 0x738   : > { %v1099_v5 = vmul.f32 %v1091_v20, %v3832_v15  ;;  %v1100_v4 = vmul.f32 %v1091_v20, %v3835_v16  ;;  %v1101_v28 = vmul.f32 %v4102_v24, %v1093_v19  ;;  %v1102_v63 = vmul.f32 %v4106_v9, %v1093_v19  ;;  %v3270_v20 = vld [vmem:[%s5473_s1 + $0x178] sm:$0xff] }
 0x73a   : > { %v1111_v14 = vrot.slane %v1099_v5, 1  ;;  %v1114_v22 = vrot.slane %v1100_v4, 1  ;;  %v1112_v23 = vrot.slane %v1101_v28, 1  ;;  %v1115_v17 = vrot.slane %v1102_v63, 1 }
 0x73b   : > { %v1095_v13 = vpop.permute.xlu0 %1094  ;;  %v1140_v28 = vrot.slane %v3269_v12, 7  ;;  %v1141_v63 = vrot.slane %v3270_v20, 7 }
 0x73c   : > { %v1103_v21 = vmul.f32 %v1095_v13, %v3842_v8  ;;  %v1104_v18 = vmul.f32 %v1095_v13, %v3845_v7  ;;  %v1116_v3 = vsel %vm686_vm1, %v1114_v22, %v1115_v17  ;;  %v1113_v19 = vsel %vm686_vm1, %v1111_v14, %v1112_v23 }
 0x73d   : > { %1123 = vrot.lane.b32.xlu0 %v1116_v3, %s5492_s15  ;;  %1121 = vrot.lane.b32.xlu1 %v1113_v19, %s5492_s15  ;;  %v1142_v22 = vsel %vm661_vm0, %v1140_v28, %v1141_v63 }
 0x73e   : > { %v1117_v5 = vrot.slane %v1103_v21, 1  ;;  %v1119_v4 = vrot.slane %v1104_v18, 1 }
 0x740   : > { %v1120_v1 = vsel %vm686_vm1, %v1115_v17, %v1119_v4  ;;  %v1118_v6 = vsel %vm686_vm1, %v1112_v23, %v1117_v5 }
 0x741   : > { %1127 = vrot.lane.b32.xlu0 %v1120_v1, %s5492_s15  ;;  %1125 = vrot.lane.b32.xlu1 %v1118_v6, %s5492_s15  ;;  %s5583_s15 = smov 12  }
 0x745   : > { %1145 = vrot.lane.b32.xlu0 %v1142_v22, %s5577_s18  ;;  %1143 = vrot.lane.b32.xlu1 %v1140_v28, %s5577_s18  ;;  %v3272_v22 = vld [vmem:[%s5473_s1 + $0x188] sm:$0xff] }
 0x749   : > { %1147 = vrot.lane.b32.xlu1 %v1141_v63, %s5577_s18  ;;  %v3271_v63 = vld [vmem:[%s5473_s1 + $0x180] sm:$0xff] }
 0x7af   : > { %v4129_v3 = vpop.permute.xlu0 %1123  ;;  %v4131_v18 = vpop.permute.xlu1 %1121 }
 0x7b0   : > { %5578 = vst [vmem:[#allocation49_spill] sm:$0xff] %v4129_v3  ;;  %5579 = vst [vmem:[#allocation50_spill] sm:$0xff] %v4131_v18 }
 0x7b3   : > { %v4133_v12 = vpop.permute.xlu0 %1127  ;;  %v4135_v21 = vpop.permute.xlu1 %1125 }
 0x7b4   : > { %5580 = vst [vmem:[#allocation51_spill] sm:$0xff] %v4133_v12  ;;  %5581 = vst [vmem:[#allocation52_spill] sm:$0xff] %v4135_v21 }
 0x7b7   : > { %v1146_v14 = vpop.permute.xlu0 %1145  ;;  %v1144_v1 = vpop.permute.xlu1 %1143 }
 0x7b8   : > { %v1154_v6 = vmul.f32 %v4102_v24, %v1146_v14  ;;  %v1155_v23 = vmul.f32 %v4106_v9, %v1146_v14  ;;  %v1152_v17 = vmul.f32 %v1144_v1, %v3832_v15  ;;  %v1153_v13 = vmul.f32 %v1144_v1, %v3835_v16 }
 0x7ba   : > { %v1165_v20 = vrot.slane %v1154_v6, 1  ;;  %v1168_v19 = vrot.slane %v1155_v23, 1  ;;  %v1164_v5 = vrot.slane %v1152_v17, 1  ;;  %v1167_v4 = vrot.slane %v1153_v13, 1 }
 0x7bb   : > { %v1148_v28 = vpop.permute.xlu1 %1147  ;;  %v1193_v17 = vrot.slane %v3271_v63, 7  ;;  %v1194_v13 = vrot.slane %v3272_v22, 7 }
 0x7bc   : > { %v1156_v21 = vmul.f32 %v1148_v28, %v3842_v8  ;;  %v1157_v14 = vmul.f32 %v1148_v28, %v3845_v7  ;;  %v1169_v12 = vsel %vm686_vm1, %v1167_v4, %v1168_v19  ;;  %v1166_v1 = vsel %vm686_vm1, %v1164_v5, %v1165_v20 }
 0x7bd   : > { %1176 = vrot.lane.b32.xlu1 %v1169_v12, %s5582_s8  ;;  %1174 = vrot.lane.b32.xlu0 %v1166_v1, %s5582_s8  ;;  %v1195_v4 = vsel %vm661_vm0, %v1193_v17, %v1194_v13 }
 0x7be   : > { %v1170_v6 = vrot.slane %v1156_v21, 1  ;;  %v1172_v23 = vrot.slane %v1157_v14, 1 }
 0x7c0   : > { %v1173_v18 = vsel %vm686_vm1, %v1168_v19, %v1172_v23  ;;  %v1171_v3 = vsel %vm686_vm1, %v1165_v20, %v1170_v6 }
 0x7c1   : > { %1180 = vrot.lane.b32.xlu1 %v1173_v18, %s5582_s8  ;;  %1178 = vrot.lane.b32.xlu0 %v1171_v3, %s5582_s8 }
 0x7c5   : > { %1198 = vrot.lane.b32.xlu1 %v1195_v4, %s5583_s15  ;;  %1196 = vrot.lane.b32.xlu0 %v1193_v17, %s5583_s15  ;;  %v3274_v4 = vld [vmem:[%s5473_s1 + $0x198] sm:$0xff] }
 0x7c9   : > { %1200 = vrot.lane.b32.xlu0 %v1194_v13, %s5583_s15  ;;  %v3273_v13 = vld [vmem:[%s5473_s1 + $0x190] sm:$0xff] }
 0x82f   : > { %v4161_v12 = vpop.permute.xlu0 %1174  ;;  %v4163_v21 = vpop.permute.xlu1 %1176 }
 0x830   : > { %5584 = vst [vmem:[#allocation53_spill] sm:$0xff] %v4161_v12  ;;  %5585 = vst [vmem:[#allocation54_spill] sm:$0xff] %v4163_v21 }
 0x833   : > { %v4165_v5 = vpop.permute.xlu0 %1178  ;;  %v4167_v19 = vpop.permute.xlu1 %1180 }
 0x834   : > { %5586 = vst [vmem:[#allocation55_spill] sm:$0xff] %v4165_v5  ;;  %5587 = vst [vmem:[#allocation56_spill] sm:$0xff] %v4167_v19 }
 0x837   : > { %v1197_v20 = vpop.permute.xlu0 %1196  ;;  %v1199_v18 = vpop.permute.xlu1 %1198 }
 0x838   : > { %v1205_v3 = vmul.f32 %v1197_v20, %v3832_v15  ;;  %v1206_v28 = vmul.f32 %v1197_v20, %v3835_v16  ;;  %v1207_v63 = vmul.f32 %v4102_v24, %v1199_v18  ;;  %v1208_v22 = vmul.f32 %v4106_v9, %v1199_v18 }
 0x83a   : > { %v1217_v14 = vrot.slane %v1205_v3, 1  ;;  %v1220_v1 = vrot.slane %v1206_v28, 1  ;;  %v1218_v6 = vrot.slane %v1207_v63, 1  ;;  %v1221_v23 = vrot.slane %v1208_v22, 1 }
 0x83b   : > { %v1201_v17 = vpop.permute.xlu0 %1200  ;;  %v1246_v63 = vrot.slane %v3273_v13, 7  ;;  %v1247_v22 = vrot.slane %v3274_v4, 7 }
 0x83c   : > { %v1209_v5 = vmul.f32 %v1201_v17, %v3842_v8  ;;  %v1210_v20 = vmul.f32 %v1201_v17, %v3845_v7  ;;  %v1222_v19 = vsel %vm686_vm1, %v1220_v1, %v1221_v23  ;;  %v1219_v18 = vsel %vm686_vm1, %v1217_v14, %v1218_v6 }
 0x83d   : > { %1229 = vrot.lane.b32.xlu0 %v1222_v19, %s5588_s29  ;;  %1227 = vrot.lane.b32.xlu1 %v1219_v18, %s5588_s29  ;;  %v1248_v1 = vsel %vm661_vm0, %v1246_v63, %v1247_v22 }
 0x83e   : > { %v1223_v3 = vrot.slane %v1209_v5, 1  ;;  %v1225_v28 = vrot.slane %v1210_v20, 1 }
 0x840   : > { %v1226_v12 = vsel %vm686_vm1, %v1221_v23, %v1225_v28  ;;  %v1224_v21 = vsel %vm686_vm1, %v1218_v6, %v1223_v3 }
 0x841   : > { %1233 = vrot.lane.b32.xlu0 %v1226_v12, %s5588_s29  ;;  %1231 = vrot.lane.b32.xlu1 %v1224_v21, %s5588_s29 }
 0x845   : > { %1251 = vrot.lane.b32.xlu0 %v1248_v1, %s5589_s14  ;;  %1249 = vrot.lane.b32.xlu1 %v1246_v63, %s5589_s14  ;;  %v3276_v1 = vld [vmem:[%s5473_s1 + $0x1a8] sm:$0xff] }
 0x849   : > { %1253 = vrot.lane.b32.xlu1 %v1247_v22, %s5589_s14  ;;  %v3275_v22 = vld [vmem:[%s5473_s1 + $0x1a0] sm:$0xff] }
 0x8af   : > { %v4193_v5 = vpop.permute.xlu0 %1229  ;;  %v4195_v19 = vpop.permute.xlu1 %1227 }
 0x8b0   : > { %5590 = vst [vmem:[#allocation57_spill] sm:$0xff] %v4193_v5  ;;  %5591 = vst [vmem:[#allocation58_spill] sm:$0xff] %v4195_v19 }
 0x8b3   : > { %v4197_v14 = vpop.permute.xlu0 %1233  ;;  %v4199_v23 = vpop.permute.xlu1 %1231 }
 0x8b4   : > { %5592 = vst [vmem:[#allocation59_spill] sm:$0xff] %v4197_v14  ;;  %5593 = vst [vmem:[#allocation60_spill] sm:$0xff] %v4199_v23 }
 0x8b7   : > { %v1252_v6 = vpop.permute.xlu0 %1251  ;;  %v1250_v12 = vpop.permute.xlu1 %1249 }
 0x8b8   : > { %v1260_v21 = vmul.f32 %v4102_v24, %v1252_v6  ;;  %v1261_v17 = vmul.f32 %v4106_v9, %v1252_v6  ;;  %v1258_v13 = vmul.f32 %v1250_v12, %v3832_v15  ;;  %v1259_v4 = vmul.f32 %v1250_v12, %v3835_v16 }
 0x8ba   : > { %v1271_v20 = vrot.slane %v1260_v21, 1  ;;  %v1274_v18 = vrot.slane %v1261_v17, 1  ;;  %v1270_v3 = vrot.slane %v1258_v13, 1  ;;  %v1273_v28 = vrot.slane %v1259_v4, 1 }
 0x8bb   : > { %v1254_v63 = vpop.permute.xlu1 %1253  ;;  %v1299_v13 = vrot.slane %v3275_v22, 7  ;;  %v1300_v4 = vrot.slane %v3276_v1, 7 }
 0x8bc   : > { %v1262_v23 = vmul.f32 %v1254_v63, %v3842_v8  ;;  %v1263_v6 = vmul.f32 %v1254_v63, %v3845_v7  ;;  %v1275_v14 = vsel %vm686_vm1, %v1273_v28, %v1274_v18  ;;  %v1272_v12 = vsel %vm686_vm1, %v1270_v3, %v1271_v20 }
 0x8bd   : > { %1282 = vrot.lane.b32.xlu1 %v1275_v14, %s5594_s23  ;;  %1280 = vrot.lane.b32.xlu0 %v1272_v12, %s5594_s23  ;;  %v1301_v28 = vsel %vm661_vm0, %v1299_v13, %v1300_v4 }
 0x8be   : > { %v1276_v21 = vrot.slane %v1262_v23, 1  ;;  %v1278_v17 = vrot.slane %v1263_v6, 1 }
 0x8c0   : > { %v1279_v19 = vsel %vm686_vm1, %v1274_v18, %v1278_v17  ;;  %v1277_v5 = vsel %vm686_vm1, %v1271_v20, %v1276_v21 }
 0x8c1   : > { %1286 = vrot.lane.b32.xlu1 %v1279_v19, %s5594_s23  ;;  %1284 = vrot.lane.b32.xlu0 %v1277_v5, %s5594_s23 }
 0x8c5   : > { %1304 = vrot.lane.b32.xlu1 %v1301_v28, %s5595_s11  ;;  %1302 = vrot.lane.b32.xlu0 %v1299_v13, %s5595_s11  ;;  %v3278_v28 = vld [vmem:[%s5473_s1 + $0x1b8] sm:$0xff] }
 0x8c9   : > { %1306 = vrot.lane.b32.xlu0 %v1300_v4, %s5595_s11  ;;  %v3277_v4 = vld [vmem:[%s5473_s1 + $0x1b0] sm:$0xff] }
 0x92f   : > { %v4225_v14 = vpop.permute.xlu0 %1280  ;;  %v4227_v23 = vpop.permute.xlu1 %1282 }
 0x930   : > { %5596 = vst [vmem:[#allocation61_spill] sm:$0xff] %v4225_v14  ;;  %5597 = vst [vmem:[#allocation62_spill] sm:$0xff] %v4227_v23 }
 0x933   : > { %v4229_v3 = vpop.permute.xlu0 %1284  ;;  %v4231_v18 = vpop.permute.xlu1 %1286 }
 0x934   : > { %5598 = vst [vmem:[#allocation63_spill] sm:$0xff] %v4229_v3  ;;  %5599 = vst [vmem:[#allocation64_spill] sm:$0xff] %v4231_v18 }
 0x937   : > { %v1303_v20 = vpop.permute.xlu0 %1302  ;;  %v1305_v19 = vpop.permute.xlu1 %1304 }
 0x938   : > { %v1311_v5 = vmul.f32 %v1303_v20, %v3832_v15  ;;  %v1312_v63 = vmul.f32 %v1303_v20, %v3835_v16  ;;  %v1313_v22 = vmul.f32 %v4102_v24, %v1305_v19  ;;  %v1314_v1 = vmul.f32 %v4106_v9, %v1305_v19 }
 0x93a   : > { %v1323_v6 = vrot.slane %v1311_v5, 1  ;;  %v1326_v12 = vrot.slane %v1312_v63, 1  ;;  %v1324_v21 = vrot.slane %v1313_v22, 1  ;;  %v1327_v17 = vrot.slane %v1314_v1, 1 }
 0x93b   : > { %v1307_v13 = vpop.permute.xlu0 %1306  ;;  %v1352_v22 = vrot.slane %v3277_v4, 7  ;;  %v1353_v1 = vrot.slane %v3278_v28, 7 }
 0x93c   : > { %v1315_v3 = vmul.f32 %v1307_v13, %v3842_v8  ;;  %v1316_v20 = vmul.f32 %v1307_v13, %v3845_v7  ;;  %v1328_v18 = vsel %vm686_vm1, %v1326_v12, %v1327_v17  ;;  %v1325_v19 = vsel %vm686_vm1, %v1323_v6, %v1324_v21 }
 0x93d   : > { %1335 = vrot.lane.b32.xlu0 %v1328_v18, %s5506_s19  ;;  %1333 = vrot.lane.b32.xlu1 %v1325_v19, %s5506_s19  ;;  %v1354_v12 = vsel %vm661_vm0, %v1352_v22, %v1353_v1 }
 0x93e   : > { %v1329_v5 = vrot.slane %v1315_v3, 1  ;;  %v1331_v63 = vrot.slane %v1316_v20, 1 }
 0x940   : > { %v1332_v14 = vsel %vm686_vm1, %v1327_v17, %v1331_v63  ;;  %v1330_v23 = vsel %vm686_vm1, %v1324_v21, %v1329_v5 }
 0x941   : > { %1339 = vrot.lane.b32.xlu0 %v1332_v14, %s5506_s19  ;;  %1337 = vrot.lane.b32.xlu1 %v1330_v23, %s5506_s19  ;;  %s3353_s19 = sshll.u32 %s5717_s13, 5 }
 0x942   : > { %s4464_s13 = scalar_lea.vmem %s5475_s3, %s3353_s19  ;;  %s5709_s19 = smov 123  }
 0x945   : > { %1357 = vrot.lane.b32.xlu0 %v1354_v12, %s5600_s10  ;;  %1355 = vrot.lane.b32.xlu1 %v1352_v22, %s5600_s10  ;;  %v3288_v12 = vld [vmem:[%s5473_s1 + $0x1c8] sm:$0xff] }
 0x949   : > { %1359 = vrot.lane.b32.xlu1 %v1353_v1, %s5600_s10  ;;  %v3287_v1 = vld [vmem:[%s5473_s1 + $0x1c0] sm:$0xff] }
 0x9af   : > { %v4257_v3 = vpop.permute.xlu0 %1335  ;;  %v4259_v18 = vpop.permute.xlu1 %1333 }
 0x9b3   : > { %v4261_v6 = vpop.permute.xlu0 %1339  ;;  %v4263_v17 = vpop.permute.xlu1 %1337 }
 0x9b7   : > { %v1358_v21 = vpop.permute.xlu0 %1357  ;;  %v1356_v14 = vpop.permute.xlu1 %1355 }
 0x9b8   : > { %v1366_v23 = vmul.f32 %v4102_v24, %v1358_v21  ;;  %v1367_v13 = vmul.f32 %v4106_v9, %v1358_v21  ;;  %v1364_v4 = vmul.f32 %v1356_v14, %v3832_v15  ;;  %v1365_v28 = vmul.f32 %v1356_v14, %v3835_v16 }
 0x9ba   : > { %v1377_v20 = vrot.slane %v1366_v23, 1  ;;  %v1380_v19 = vrot.slane %v1367_v13, 1  ;;  %v1376_v5 = vrot.slane %v1364_v4, 1  ;;  %v1379_v63 = vrot.slane %v1365_v28, 1 }
 0x9bb   : > { %v1360_v22 = vpop.permute.xlu1 %1359  ;;  %v1545_v23 = vrot.slane %v3287_v1, 7  ;;  %v1546_v13 = vrot.slane %v3288_v12, 7  ;;  %v272_v1 = vsel %vm271_vm4, %v3667_v33, %v3673_v36 }
 0x9bc   : > { %v1368_v24 = vmul.f32 %v1360_v22, %v3842_v8  ;;  %v1369_v9 = vmul.f32 %v1360_v22, %v3845_v7  ;;  %v1381_v15 = vsel %vm686_vm1, %v1379_v63, %v1380_v19  ;;  %v1378_v16 = vsel %vm686_vm1, %v1376_v5, %v1377_v20  ;;  %v171_v7 = vld [vmem:[%s5474_s2] sm:$0xff]  ;;  %v172_v63 = vld [vmem:[%s5474_s2 + $0x8] sm:$0xff] }
 0x9bd   : > { %1388 = vrot.lane.b32.xlu1 %v1381_v15, %s3431_s24  ;;  %1386 = vrot.lane.b32.xlu0 %v1378_v16, %s3431_s24  ;;  %v1547_v8 = vsel %vm661_vm0, %v1545_v23, %v1546_v13  ;;  %v205_v22 = vsel %vm203_vm2, %v3655_v26, %v3661_v30  ;;  %v273_v26 = vsel %vm271_vm4, %v3671_v35, %v3677_v38  ;;  %v5604_v16 = vld [vmem:[#allocation4_spill] sm:$0xff] }
 0x9be   : > { %v1382_v21 = vrot.slane %v1368_v24, 1  ;;  %v1384_v14 = vrot.slane %v1369_v9, 1  ;;  %v340_v30 = vsel %vm339_vm6, %v3683_v41, %v3689_v44  ;;  %v341_v35 = vsel %vm339_vm6, %v3687_v43, %v3693_v46  ;;  %v5602_v24 = vld [vmem:[#allocation6_spill] sm:$0xff] }
 0x9bf   : > { %v408_v38 = vsel %vm407_vm8, %v3699_v49, %v3705_v52  ;;  %v409_v43 = vsel %vm407_vm8, %v3703_v51, %v3709_v54  ;;  %v476_v46 = vsel %vm475_vm10, %v3715_v57, %v3721_v60  ;;  %v477_v51 = vsel %vm475_vm10, %v3719_v59, %v3725_v62  ;;  %v5605_v59 = vld [vmem:[#allocation3_spill] sm:$0xff] }
 0x9c0   : > { %v1385_v4 = vsel %vm686_vm1, %v1380_v19, %v1384_v14  ;;  %v1383_v28 = vsel %vm686_vm1, %v1377_v20, %v1382_v21  ;;  %v204_v20 = vsel %vm203_vm2, %v3653_v25, %v3657_v27  ;;  %v238_v19 = vsel %vm237_vm3, %v3659_v29, %v3665_v32  ;;  %v5606_v21 = vld [vmem:[#allocation10_spill] sm:$0xff] }
 0x9c1   : > { %1392 = vrot.lane.b32.xlu1 %v1385_v4, %s3431_s24  ;;  %1390 = vrot.lane.b32.xlu0 %v1383_v28, %s3431_s24  ;;  %v208_v5 = vadd.f32 %v204_v20, %v171_v7  ;;  %v239_v27 = vsel %vm237_vm3, %v3663_v31, %v3669_v34  ;;  %v306_v29 = vsel %vm305_vm5, %v3675_v37, %v3681_v40  ;;  %v5609_v4 = vld [vmem:[#allocation7_spill] sm:$0xff]  ;;  %v5610_v28 = vld [vmem:[#allocation14_spill] sm:$0xff] }
 0x9c2   : > { %v209_v32 = vadd.f32 %v205_v22, %v172_v63  ;;  %v307_v31 = vsel %vm305_vm5, %v3679_v39, %v3685_v42  ;;  %v374_v34 = vsel %vm373_vm7, %v3691_v45, %v3697_v48  ;;  %v375_v39 = vsel %vm373_vm7, %v3695_v47, %v3701_v50  ;;  %v5613_v63 = vld [vmem:[#allocation11_spill] sm:$0xff] }
 0x9c3   : > { %v242_v25 = vadd.f32 %v238_v19, %v208_v5  ;;  %v442_v42 = vsel %vm441_vm9, %v3707_v53, %v3713_v56  ;;  %v443_v47 = vsel %vm441_vm9, %v3711_v55, %v3717_v58  ;;  %v510_v50 = vsel %vm509_vm11, %v3723_v61, %v3729_v0  ;;  %v5601_v55 = vld [vmem:[#allocation2_spill] sm:$0xff]  ;;  %v5603_v61 = vld [vmem:[#allocation5_spill] sm:$0xff]  ;;  %v5612_v5 = vld [vmem:[#allocation12_spill] sm:$0xff] }
 0x9c4   : > { %v243_v33 = vadd.f32 %v239_v27, %v209_v32  ;;  %v544_v54 = vsel %vm543_vm12, %v3749_v10, %v3751_v11  ;;  %v511_v58 = vsel %vm509_vm11, %v5601_v55, %v3731_v2  ;;  %v578_v0 = vsel %vm577_vm13, %v5603_v61, %v5602_v24  ;;  %v5607_v10 = vld [vmem:[#allocation9_spill] sm:$0xff]  ;;  %v5632_v61 = vld [vmem:[#allocation32_spill] sm:$0xff] }
 0x9c5   : > { %1550 = vrot.lane.b32.xlu1 %v1547_v8, %s3404_s16  ;;  %1548 = vrot.lane.b32.xlu0 %v1545_v23, %s3404_s16  ;;  %v276_v12 = vadd.f32 %v272_v1, %v242_v25  ;;  %v545_v62 = vsel %vm543_vm12, %v5605_v59, %v5604_v16  ;;  %v612_v11 = vsel %vm611_vm14, %v5607_v10, %v5606_v21  ;;  %v5611_v8 = vld [vmem:[#allocation13_spill] sm:$0xff]  ;;  %v5615_v25 = vld [vmem:[#allocation18_spill] sm:$0xff]  ;;  %v5636_v10 = vld [vmem:[#allocation35_spill] sm:$0xff] }
 0x9c6   : > { %v277_v37 = vadd.f32 %v273_v26, %v243_v33  ;;  %v646_v7 = vsel %vm645_vm15, %v5611_v8, %v5610_v28  ;;  %v613_v22 = vsel %vm611_vm14, %v5613_v63, %v5612_v5  ;;  %v5614_v1 = vld [vmem:[#allocation17_spill] sm:$0xff]  ;;  %v5617_v26 = vld [vmem:[#allocation15_spill] sm:$0xff]  ;;  %v5618_v33 = vld [vmem:[#allocation22_spill] sm:$0xff] }
 0x9c7   : > { %v310_v36 = vadd.f32 %v306_v29, %v276_v12  ;;  %v705_v27 = vsel %vm203_vm2, %v5615_v25, %v5614_v1  ;;  %v5616_v12 = vld [vmem:[#allocation16_spill] sm:$0xff]  ;;  %v5635_v16 = vld [vmem:[#allocation37_spill] sm:$0xff]  ;;  %v5644_v25 = vld [vmem:[#allocation43_spill] sm:$0xff] }
 0x9c8   : > { %v311_v41 = vadd.f32 %v307_v31, %v277_v37  ;;  %v5640_v8 = vld [vmem:[#allocation40_spill] sm:$0xff]  ;;  %v5643_v5 = vld [vmem:[#allocation45_spill] sm:$0xff] }
 0x9c9   : > { %1552 = vrot.lane.b32.xlu0 %v1546_v13, %s3404_s16  ;;  %v344_v40 = vadd.f32 %v340_v30, %v310_v36  ;;  %v5608_v13 = vld [vmem:[#allocation8_spill] sm:$0xff]  ;;  %v647_v30 = vsel %vm645_vm15, %v5617_v26, %v5616_v12  ;;  %v5619_v36 = vld [vmem:[#allocation21_spill] sm:$0xff]  ;;  %v5647_v12 = vld [vmem:[#allocation50_spill] sm:$0xff] }
 0x9ca   : > { %v345_v45 = vadd.f32 %v341_v35, %v311_v41  ;;  %v579_v2 = vsel %vm577_vm13, %v5609_v4, %v5608_v13  ;;  %v758_v31 = vsel %vm237_vm3, %v5619_v36, %v5618_v33  ;;  %v5621_v35 = vld [vmem:[#allocation20_spill] sm:$0xff]  ;;  %v5622_v41 = vld [vmem:[#allocation25_spill] sm:$0xff]  ;;  %v5639_v13 = vld [vmem:[#allocation42_spill] sm:$0xff] }
 0x9cb   : > { %v378_v44 = vadd.f32 %v374_v34, %v344_v40  ;;  %v5620_v40 = vld [vmem:[#allocation19_spill] sm:$0xff]  ;;  %v5648_v36 = vld [vmem:[#allocation48_spill] sm:$0xff] }
 0x9cc   : > { %v379_v49 = vadd.f32 %v375_v39, %v345_v45 }
 0x9cd   : > { %v412_v48 = vadd.f32 %v408_v38, %v378_v44  ;;  %v706_v38 = vsel %vm203_vm2, %v5621_v35, %v5620_v40  ;;  %v5623_v44 = vld [vmem:[#allocation26_spill] sm:$0xff]  ;;  %v5651_v40 = vld [vmem:[#allocation53_spill] sm:$0xff] }
 0x9ce   : > { %v413_v53 = vadd.f32 %v409_v43, %v379_v49  ;;  %v811_v39 = vsel %vm271_vm4, %v5623_v44, %v5622_v41  ;;  %v5625_v43 = vld [vmem:[#allocation23_spill] sm:$0xff]  ;;  %v5626_v49 = vld [vmem:[#allocation30_spill] sm:$0xff]  ;;  %v3432_v44 = vmov 1966171168  }
 0x9cf   : > { %v446_v52 = vadd.f32 %v442_v42, %v412_v48  ;;  %v5624_v48 = vld [vmem:[#allocation24_spill] sm:$0xff] }
 0x9d0   : > { %v447_v57 = vadd.f32 %v443_v47, %v413_v53 }
 0x9d1   : > { %v480_v56 = vadd.f32 %v476_v46, %v446_v52  ;;  %v759_v46 = vsel %vm237_vm3, %v5625_v43, %v5624_v48  ;;  %v5627_v52 = vld [vmem:[#allocation29_spill] sm:$0xff]  ;;  %v5653_v48 = vld [vmem:[#allocation52_spill] sm:$0xff] }
 0x9d2   : > { %v481_v9 = vadd.f32 %v477_v51, %v447_v57  ;;  %v864_v47 = vsel %vm305_vm5, %v5627_v52, %v5626_v49  ;;  %v5629_v51 = vld [vmem:[#allocation28_spill] sm:$0xff]  ;;  %v5630_v57 = vld [vmem:[#allocation33_spill] sm:$0xff]  ;;  %v5655_v49 = vld [vmem:[#allocation58_spill] sm:$0xff] }
 0x9d3   : > { %v514_v60 = vadd.f32 %v510_v50, %v480_v56  ;;  %v5628_v56 = vld [vmem:[#allocation27_spill] sm:$0xff] }
 0x9d4   : > { %v515_v14 = vadd.f32 %v511_v58, %v481_v9 }
 0x9d5   : > { %v548_v15 = vadd.f32 %v544_v54, %v514_v60  ;;  %v812_v54 = vsel %vm271_vm4, %v5629_v51, %v5628_v56  ;;  %v5631_v60 = vld [vmem:[#allocation34_spill] sm:$0xff]  ;;  %v5657_v56 = vld [vmem:[#allocation55_spill] sm:$0xff] }
 0x9d6   : > { %v549_v20 = vadd.f32 %v545_v62, %v515_v14  ;;  %v917_v55 = vsel %vm339_vm6, %v5631_v60, %v5630_v57  ;;  %v5659_v57 = vld [vmem:[#allocation61_spill] sm:$0xff] }
 0x9d7   : > { %v582_v23 = vadd.f32 %v578_v0, %v548_v15  ;;  %v5633_v0 = vld [vmem:[#allocation31_spill] sm:$0xff]  ;;  %v5634_v15 = vld [vmem:[#allocation38_spill] sm:$0xff] }
 0x9d8   : > { %v583_v29 = vadd.f32 %v579_v2, %v549_v20  ;;  %v865_v9 = vsel %vm305_vm5, %v5633_v0, %v5632_v61  ;;  %v970_v59 = vsel %vm373_vm7, %v5635_v16, %v5634_v15  ;;  %v5660_v0 = vld [vmem:[#allocation59_spill] sm:$0xff]  ;;  %v1341_v16 = vsel %vm611_vm14, %v4259_v18, %v4257_v3 }
 0x9d9   : > { %v616_v19 = vadd.f32 %v612_v11, %v582_v23  ;;  %v5637_v11 = vld [vmem:[#allocation36_spill] sm:$0xff]  ;;  %v5638_v23 = vld [vmem:[#allocation41_spill] sm:$0xff] }
 0x9da   : > { %v617_v34 = vadd.f32 %v613_v22, %v583_v29  ;;  %v918_v14 = vsel %vm339_vm6, %v5637_v11, %v5636_v10  ;;  %v1023_v4 = vsel %vm407_vm8, %v5639_v13, %v5638_v23  ;;  %v5663_v10 = vld [vmem:[#allocation63_spill] sm:$0xff] }
 0x9db   : > { %v650_v32 = vadd.f32 %v646_v7, %v616_v19  ;;  %v5641_v7 = vld [vmem:[#allocation39_spill] sm:$0xff]  ;;  %v5642_v19 = vld [vmem:[#allocation46_spill] sm:$0xff] }
 0x9dc   : > { %v651_v42 = vadd.f32 %v647_v30, %v617_v34  ;;  %v971_v20 = vsel %vm373_vm7, %v5641_v7, %v5640_v8  ;;  %v1076_v63 = vsel %vm441_vm9, %v5643_v5, %v5642_v19 }
 0x9dd   : > { %v709_v37 = vadd.f32 %v705_v27, %v650_v32  ;;  %v5645_v27 = vld [vmem:[#allocation44_spill] sm:$0xff]  ;;  %v5646_v32 = vld [vmem:[#allocation49_spill] sm:$0xff] }
 0x9de   : > { %v710_v50 = vadd.f32 %v706_v38, %v651_v42  ;;  %v1024_v29 = vsel %vm407_vm8, %v5645_v27, %v5644_v25  ;;  %v1129_v26 = vsel %vm475_vm10, %v5647_v12, %v5646_v32  ;;  %v1406_v42 = vlaneseq  ;;  %v4472_v27 = vld [vmem:[%s3551_s27] sm:$0xfe]  ;;  %v4478_v32 = vld [vmem:[%s3551_s27 + $0x10] sm:$0xff] }
 0x9df   : > { %v762_v45 = vadd.f32 %v758_v31, %v709_v37  ;;  %v5649_v31 = vld [vmem:[#allocation47_spill] sm:$0xff]  ;;  %v5650_v37 = vld [vmem:[#allocation54_spill] sm:$0xff] }
 0x9e0   : > { %v763_v58 = vadd.f32 %v759_v46, %v710_v50  ;;  %v1077_v34 = vsel %vm441_vm9, %v5649_v31, %v5648_v36  ;;  %v1182_v35 = vsel %vm509_vm11, %v5651_v40, %v5650_v37  ;;  %v5654_v46 = vld [vmem:[#allocation57_spill] sm:$0xff]  ;;  %v1407_v61 = vshrl.u32 %v1406_v42, 7 }
 0x9e1   : > { %v815_v53 = vadd.f32 %v811_v39, %v762_v45  ;;  %v1404_v39 = vunpack.c.l.s4 %v3432_v44  ;;  %v5652_v45 = vld [vmem:[#allocation51_spill] sm:$0xff]  ;;  %v1235_v52 = vsel %vm543_vm12, %v5655_v49, %v5654_v46  ;;  %v4498_v49 = vld [vmem:[%s3551_s27 + $0x20] sm:$0x1] }
 0x9e2   : > { %v816_v62 = vadd.f32 %v812_v54, %v763_v58  ;;  %v1130_v43 = vsel %vm475_vm10, %v5653_v48, %v5652_v45  ;;  %v5658_v54 = vld [vmem:[#allocation62_spill] sm:$0xff] }
 0x9e3   : > { %v868_v24 = vadd.f32 %v864_v47, %v815_v53  ;;  %v5656_v53 = vld [vmem:[#allocation56_spill] sm:$0xff]  ;;  %v1288_v60 = vsel %vm577_vm13, %v5659_v57, %v5658_v54 }
 0x9e4   : > { %v869_v2 = vadd.f32 %v865_v9, %v816_v62  ;;  %v1183_v51 = vsel %vm509_vm11, %v5657_v56, %v5656_v53  ;;  %v5661_v9 = vld [vmem:[#allocation60_spill] sm:$0xff] }
 0x9e5   : > { %v921_v21 = vadd.f32 %v917_v55, %v868_v24  ;;  %v1405_v24 = vunpack.c.0.s8 %v1404_v39  ;;  %v1236_v15 = vsel %vm543_vm12, %v5661_v9, %v5660_v0 }
 0x9e6   : > { %v922_v22 = vadd.f32 %v918_v14, %v869_v2 }
 0x9e7   : > { %v974_v28 = vadd.f32 %v970_v59, %v921_v21  ;;  %v5662_v21 = vld [vmem:[#allocation64_spill] sm:$0xff] }
 0x9e8   : > { %v975_v30 = vadd.f32 %v971_v20, %v922_v22  ;;  %v1289_v11 = vsel %vm577_vm13, %v5663_v10, %v5662_v21 }
 0x9e9   : > { %v1027_v1 = vadd.f32 %v1023_v4, %v974_v28  ;;  %v4455_v4 = vsub.s32 %v1405_v24, %v1407_v61  ;;  %v1342_v28 = vsel %vm611_vm14, %v4263_v17, %v4261_v6 }
 0x9ea   : > { %v1028_v38 = vadd.f32 %v1024_v29, %v975_v30  ;;  %v4475_v29 = vld [vmem:[%s3551_s27 + $0x8] sm:$0xfe] }
 0x9eb   : > { %v1080_v33 = vadd.f32 %v1076_v63, %v1027_v1  ;;  %5664 = vst [vmem:[#allocation2_spill] sm:$0xff] %v4455_v4 }
 0x9ec   : > { %v1081_v47 = vadd.f32 %v1077_v34, %v1028_v38  ;;  %v4488_v38 = vld [vmem:[%s3551_s27 + $0x18] sm:$0xff] }
 0x9ed   : > { %v1133_v41 = vadd.f32 %v1129_v26, %v1080_v33 }
 0x9ee   : > { %v1134_v55 = vadd.f32 %v1130_v43, %v1081_v47 }
 0x9ef   : > { %v1186_v50 = vadd.f32 %v1182_v35, %v1133_v41 }
 0x9f0   : > { %v1187_v59 = vadd.f32 %v1183_v51, %v1134_v55 }
 0x9f1   : > { %v1239_v58 = vadd.f32 %v1235_v52, %v1186_v50  ;;  %v4501_v52 = vld [vmem:[%s3551_s27 + $0x28] sm:$0x1] }
 0x9f2   : > { %v1240_v14 = vadd.f32 %v1236_v15, %v1187_v59  ;;  %v3289_v59 = vld [vmem:[%s5473_s1 + $0x1d0] sm:$0xff] }
 0x9f3   : > { %v1292_v62 = vadd.f32 %v1288_v60, %v1239_v58 }
 0x9f4   : > { %v1293_v18 = vadd.f32 %v1289_v11, %v1240_v14 }
 0x9f5   : > { %v1345_v23 = vadd.f32 %v1341_v16, %v1292_v62  ;;  %v3290_v62 = vld [vmem:[%s5473_s1 + $0x1d8] sm:$0xff] }
 0x9f6   : > { %v1346_v7 = vadd.f32 %v1342_v28, %v1293_v18  ;;  %v1599_v28 = vrot.slane %v3290_v62, 7 }
 0xa2f   : > { %v1387_v13 = vpop.permute.xlu0 %1386  ;;  %v1389_v2 = vpop.permute.xlu1 %1388 }
 0xa30   : > { %v1394_v3 = vsel %vm645_vm15, %v1387_v13, %v1389_v2  ;;  %v1598_v2 = vrot.slane %v3289_v59, 7 }
 0xa31   : > { %v1398_v8 = vadd.f32 %v1394_v3, %v1345_v23 }
 0xa32   : > { %v1600_v3 = vsel %vm661_vm0, %v1598_v2, %v1599_v28 }
 0xa33   : > { %v1402_v20 = vcombine.high %v1398_v8, %v1398_v8  ;;  %v1409_v19 = vrot.slane %v1398_v8, %v4455_v4  ;;  %v1391_v5 = vpop.permute.xlu0 %1390  ;;  %v1393_v6 = vpop.permute.xlu1 %1392 }
 0xa34   : > { %v1395_v17 = vsel %vm645_vm15, %v1391_v5, %v1393_v6 }
 0xa35   : > { %v1416_v63 = vrot.slane %v1402_v20, %v4455_v4  ;;  %v1417_v22 = vcombine.high %v1409_v19, %v1409_v19  ;;  %v1425_v1 = vrot.slane %v1409_v19, %v4455_v4  ;;  %3279 = vst.sshfl [vmem:[%s4464_s13] sm:$0x1 pattern:$0x73625140] %v1409_v19  ;;  %v1399_v25 = vadd.f32 %v1395_v17, %v1346_v7 }
 0xa37   : > { %v1418_v12 = vcombine.high %v1416_v63, %v1416_v63  ;;  %v1432_v26 = vrot.slane %v1416_v63, %v4455_v4  ;;  %v1439_v30 = vrot.slane %v1417_v22, %v4455_v4  ;;  %v1447_v33 = vcombine.high %v1425_v1, %v1425_v1  ;;  %3280 = vst.sshfl [vmem:[%s4464_s13 + $0x2] sm:$0x1 pattern:$0x73625140] %v1417_v22  ;;  %v1549_v36 = vpop.permute.xlu0 %1548  ;;  %v1551_v31 = vpop.permute.xlu1 %1550 }
 0xa38   : > { %3281 = vst.sshfl [vmem:[%s4464_s13 + $0x8] sm:$0x1 pattern:$0x73625140] %v1416_v63  ;;  %v1451_v34 = vcombine.high %v1399_v25, %v1399_v25  ;;  %v1458_v37 = vrot.slane %v1399_v25, %v4455_v4  ;;  %v1557_v40 = vmul.f32 %v1549_v36, %v4472_v27  ;;  %v1558_v35 = vmul.f32 %v1549_v36, %v4475_v29 }
 0xa39   : > { %v1446_v41 = vrot.slane %v1418_v12, %v4455_v4  ;;  %v1448_v44 = vcombine.high %v1432_v26, %v1432_v26  ;;  %v1449_v39 = vcombine.high %v1439_v30, %v1439_v30  ;;  %1518 = vst [vmem:[%s4464_s13 + $0x4] sm:$0x1] %v1447_v33  ;;  %3282 = vst.sshfl [vmem:[%s4464_s13 + $0xa] sm:$0x1 pattern:$0x73625140] %v1418_v12 }
 0xa3a   : > { %v1559_v42 = vmul.f32 %v1551_v31, %v4478_v32  ;;  %v1465_v45 = vrot.slane %v1451_v34, %v4455_v4  ;;  %v1466_v48 = vcombine.high %v1458_v37, %v1458_v37  ;;  %v1474_v43 = vrot.slane %v1458_v37, %v4455_v4  ;;  %3283 = vst.sshfl [vmem:[%s4464_s13 + $0x10] sm:$0x1 pattern:$0x73625140] %v1458_v37  ;;  %v3292_v34 = vld [vmem:[%s5473_s1 + $0x1e8] sm:$0xff] }
 0xa3b   : > { %v1569_v46 = vrot.slane %v1557_v40, 1  ;;  %v1450_v47 = vcombine.high %v1446_v41, %v1446_v41  ;;  %1519 = vst [vmem:[%s4464_s13 + $0x6] sm:$0x1] %v1449_v39  ;;  %1522 = vst [vmem:[%s4464_s13 + $0xc] sm:$0x1] %v1448_v44  ;;  %v1572_v50 = vrot.slane %v1558_v35, 1  ;;  %v1560_v53 = vmul.f32 %v1551_v31, %v4488_v38  ;;  %v1553_v51 = vpop.permute.xlu0 %1552 }
 0xa3c   : > { %v1570_v56 = vrot.slane %v1559_v42, 1  ;;  %v1467_v54 = vcombine.high %v1465_v45, %v1465_v45  ;;  %v1481_v57 = vrot.slane %v1465_v45, %v4455_v4  ;;  %v1488_v60 = vrot.slane %v1466_v48, %v4455_v4  ;;  %3284 = vst.sshfl [vmem:[%s4464_s13 + $0x12] sm:$0x1 pattern:$0x73625140] %v1466_v48  ;;  %v3291_v31 = vld [vmem:[%s5473_s1 + $0x1e0] sm:$0xff] }
 0xa3d   : > { %v1496_v55 = vcombine.high %v1474_v43, %v1474_v43  ;;  %3285 = vst.sshfl [vmem:[%s4464_s13 + $0x18] sm:$0x1 pattern:$0x73625140] %v1465_v45  ;;  %1523 = vst [vmem:[%s4464_s13 + $0xe] sm:$0x1] %v1450_v47  ;;  %v1561_v24 = vmul.f32 %v1553_v51, %v4498_v49  ;;  %v1562_v61 = vmul.f32 %v1553_v51, %v4501_v52 }
 0xa3e   : > { %v1573_v58 = vrot.slane %v1560_v53, 1  ;;  %v1571_v0 = vsel %vm686_vm1, %v1569_v46, %v1570_v56  ;;  %v1495_v9 = vrot.slane %v1467_v54, %v4455_v4  ;;  %v1497_v15 = vcombine.high %v1481_v57, %v1481_v57  ;;  %3286 = vst.sshfl [vmem:[%s4464_s13 + $0x1a] sm:$0x1 pattern:$0x73625140] %v1467_v54 }
 0xa3f   : > { %v1498_v16 = vcombine.high %v1488_v60, %v1488_v60  ;;  %1526 = vst [vmem:[%s4464_s13 + $0x14] sm:$0x1] %v1496_v55  ;;  %1579 = vrot.lane.b32.xlu1 %v1571_v0, %s3414_s28  ;;  %v1575_v21 = vrot.slane %v1561_v24, 1  ;;  %v1577_v10 = vrot.slane %v1562_v61, 1  ;;  %v1651_v42 = vrot.slane %v3291_v31, 7 }
 0xa40   : > { %v1574_v11 = vsel %vm686_vm1, %v1572_v50, %v1573_v58  ;;  %v1499_v14 = vcombine.high %v1495_v9, %v1495_v9  ;;  %1530 = vst [vmem:[%s4464_s13 + $0x1c] sm:$0x1] %v1497_v15  ;;  %v1652_v45 = vrot.slane %v3292_v34, 7  ;;  %v3293_v9 = vld [vmem:[%s5473_s1 + $0x1f0] sm:$0xff]  ;;  %v3294_v15 = vld [vmem:[%s5473_s1 + $0x1f8] sm:$0xff]  ;;  %v3295_v34 = vld [vmem:[%s5473_s1 + $0x200] sm:$0xff] }
 0xa41   : > { %1527 = vst [vmem:[%s4464_s13 + $0x16] sm:$0x1] %v1498_v16  ;;  %1581 = vrot.lane.b32.xlu0 %v1574_v11, %s3414_s28  ;;  %v1578_v23 = vsel %vm686_vm1, %v1573_v58, %v1577_v10  ;;  %v1576_v13 = vsel %vm686_vm1, %v1570_v56, %v1575_v21 }
 0xa42   : > { %1531 = vst [vmem:[%s4464_s13 + $0x1e] sm:$0x1] %v1499_v14  ;;  %v1653_v48 = vsel %vm661_vm0, %v1651_v42, %v1652_v45  ;;  %v1704_v14 = vrot.slane %v3293_v9, 7 }
 0xa43   : > { %1583 = vrot.lane.b32.xlu1 %v1576_v13, %s3414_s28 }
 0xa45   : > { %1585 = vrot.lane.b32.xlu0 %v1578_v23, %s3414_s28  ;;  %v1705_v23 = vrot.slane %v3294_v15, 7 }
 0xa47   : > { %1601 = vrot.lane.b32.xlu1 %v1598_v2, %s3405_s21 }
 0xa49   : > { %1603 = vrot.lane.b32.xlu0 %v1600_v3, %s3405_s21 }
 0xa4b   : > { %1605 = vrot.lane.b32.xlu1 %v1599_v28, %s3405_s21  ;;  %v1706_v28 = vsel %vm661_vm0, %v1704_v14, %v1705_v23 }
 0xab1   : > { %v4537_v18 = vpop.permute.xlu1 %1579 }
 0xab3   : > { %v4539_v8 = vpop.permute.xlu0 %1581 }
 0xab5   : > { %v4541_v7 = vpop.permute.xlu1 %1583 }
 0xab7   : > { %v4543_v20 = vpop.permute.xlu0 %1585 }
 0xab9   : > { %v1602_v19 = vpop.permute.xlu1 %1601 }
 0xaba   : > { %v1610_v5 = vmul.f32 %v1602_v19, %v4472_v27  ;;  %v1611_v6 = vmul.f32 %v1602_v19, %v4475_v29 }
 0xabb   : > { %v1604_v17 = vpop.permute.xlu0 %1603 }
 0xabc   : > { %v1612_v63 = vmul.f32 %v1604_v17, %v4478_v32  ;;  %v1613_v22 = vmul.f32 %v1604_v17, %v4488_v38  ;;  %v1622_v1 = vrot.slane %v1610_v5, 1  ;;  %v1625_v25 = vrot.slane %v1611_v6, 1 }
 0xabd   : > { %v1606_v12 = vpop.permute.xlu1 %1605 }
 0xabe   : > { %v1623_v26 = vrot.slane %v1612_v63, 1  ;;  %v1626_v30 = vrot.slane %v1613_v22, 1  ;;  %v1614_v33 = vmul.f32 %v1606_v12, %v4498_v49  ;;  %v1615_v36 = vmul.f32 %v1606_v12, %v4501_v52 }
 0xac0   : > { %v1628_v37 = vrot.slane %v1614_v33, 1  ;;  %v1630_v40 = vrot.slane %v1615_v36, 1  ;;  %v1627_v35 = vsel %vm686_vm1, %v1625_v25, %v1626_v30  ;;  %v1624_v41 = vsel %vm686_vm1, %v1622_v1, %v1623_v26 }
 0xac1   : > { %1634 = vrot.lane.b32.xlu1 %v1627_v35, %s5524_s30  ;;  %1632 = vrot.lane.b32.xlu0 %v1624_v41, %s5524_s30 }
 0xac2   : > { %v1631_v44 = vsel %vm686_vm1, %v1626_v30, %v1630_v40  ;;  %v1629_v39 = vsel %vm686_vm1, %v1623_v26, %v1628_v37  ;;  %v3296_v37 = vld [vmem:[%s5473_s1 + $0x208] sm:$0xff] }
 0xac5   : > { %1638 = vrot.lane.b32.xlu1 %v1631_v44, %s5524_s30  ;;  %1636 = vrot.lane.b32.xlu0 %v1629_v39, %s5524_s30  ;;  %s5679_s30 = smov 118  }
 0xac9   : > { %1656 = vrot.lane.b32.xlu1 %v1653_v48, %s5520_s26  ;;  %1654 = vrot.lane.b32.xlu0 %v1651_v42, %s5520_s26  ;;  %v1758_v48 = vrot.slane %v3296_v37, 7 }
 0xacd   : > { %1658 = vrot.lane.b32.xlu0 %v1652_v45, %s5520_s26  ;;  %v1757_v45 = vrot.slane %v3295_v34, 7  ;;  %s5671_s26 = smov 114  }
 0xb33   : > { %v4569_v43 = vpop.permute.xlu0 %1632  ;;  %v4571_v46 = vpop.permute.xlu1 %1634 }
 0xb37   : > { %v4573_v47 = vpop.permute.xlu0 %1636  ;;  %v4575_v50 = vpop.permute.xlu1 %1638 }
 0xb3b   : > { %v1655_v53 = vpop.permute.xlu0 %1654  ;;  %v1657_v56 = vpop.permute.xlu1 %1656 }
 0xb3c   : > { %v1663_v51 = vmul.f32 %v1655_v53, %v4472_v27  ;;  %v1664_v54 = vmul.f32 %v1655_v53, %v4475_v29  ;;  %v1665_v57 = vmul.f32 %v1657_v56, %v4478_v32  ;;  %v1666_v60 = vmul.f32 %v1657_v56, %v4488_v38 }
 0xb3e   : > { %v1675_v55 = vrot.slane %v1663_v51, 1  ;;  %v1678_v58 = vrot.slane %v1664_v54, 1  ;;  %v1676_v24 = vrot.slane %v1665_v57, 1  ;;  %v1679_v61 = vrot.slane %v1666_v60, 1 }
 0xb3f   : > { %v1659_v0 = vpop.permute.xlu0 %1658  ;;  %v1759_v51 = vsel %vm661_vm0, %v1757_v45, %v1758_v48 }
 0xb40   : > { %v1667_v16 = vmul.f32 %v1659_v0, %v4498_v49  ;;  %v1668_v59 = vmul.f32 %v1659_v0, %v4501_v52  ;;  %v1680_v62 = vsel %vm686_vm1, %v1678_v58, %v1679_v61  ;;  %v1677_v21 = vsel %vm686_vm1, %v1675_v55, %v1676_v24 }
 0xb41   : > { %1687 = vrot.lane.b32.xlu0 %v1680_v62, %s5518_s5  ;;  %1685 = vrot.lane.b32.xlu1 %v1677_v21, %s5518_s5 }
 0xb42   : > { %v1681_v10 = vrot.slane %v1667_v16, 1  ;;  %v1683_v11 = vrot.slane %v1668_v59, 1 }
 0xb44   : > { %v1684_v13 = vsel %vm686_vm1, %v1679_v61, %v1683_v11  ;;  %v1682_v2 = vsel %vm686_vm1, %v1676_v24, %v1681_v10  ;;  %v3297_v11 = vld [vmem:[%s5473_s1 + $0x210] sm:$0xff] }
 0xb45   : > { %1691 = vrot.lane.b32.xlu0 %v1684_v13, %s5518_s5  ;;  %1689 = vrot.lane.b32.xlu1 %v1682_v2, %s5518_s5  ;;  %s5691_s5 = smov 5  }
 0xb49   : > { %1709 = vrot.lane.b32.xlu0 %v1706_v28, %s5516_s4  ;;  %1707 = vrot.lane.b32.xlu1 %v1704_v14, %s5516_s4  ;;  %v3298_v14 = vld [vmem:[%s5473_s1 + $0x218] sm:$0xff] }
 0xb4d   : > { %1711 = vrot.lane.b32.xlu1 %v1705_v23, %s5516_s4  ;;  %s5669_s4 = smov 113  }
 0xbb3   : > { %v4601_v3 = vpop.permute.xlu0 %1687  ;;  %v4603_v19 = vpop.permute.xlu1 %1685 }
 0xbb7   : > { %v4605_v5 = vpop.permute.xlu0 %1691  ;;  %v4607_v6 = vpop.permute.xlu1 %1689 }
 0xbbb   : > { %v1710_v17 = vpop.permute.xlu0 %1709  ;;  %v1708_v63 = vpop.permute.xlu1 %1707 }
 0xbbc   : > { %v1718_v22 = vmul.f32 %v1710_v17, %v4478_v32  ;;  %v1719_v1 = vmul.f32 %v1710_v17, %v4488_v38  ;;  %v1716_v25 = vmul.f32 %v1708_v63, %v4472_v27  ;;  %v1717_v12 = vmul.f32 %v1708_v63, %v4475_v29 }
 0xbbe   : > { %v1729_v26 = vrot.slane %v1718_v22, 1  ;;  %v1732_v30 = vrot.slane %v1719_v1, 1  ;;  %v1728_v33 = vrot.slane %v1716_v25, 1  ;;  %v1731_v36 = vrot.slane %v1717_v12, 1 }
 0xbbf   : > { %v1712_v31 = vpop.permute.xlu1 %1711  ;;  %v1810_v22 = vrot.slane %v3297_v11, 7  ;;  %v1811_v1 = vrot.slane %v3298_v14, 7 }
 0xbc0   : > { %v1720_v40 = vmul.f32 %v1712_v31, %v4498_v49  ;;  %v1721_v35 = vmul.f32 %v1712_v31, %v4501_v52  ;;  %v1733_v41 = vsel %vm686_vm1, %v1731_v36, %v1732_v30  ;;  %v1730_v44 = vsel %vm686_vm1, %v1728_v33, %v1729_v26 }
 0xbc1   : > { %1740 = vrot.lane.b32.xlu1 %v1733_v41, %s5510_s6  ;;  %1738 = vrot.lane.b32.xlu0 %v1730_v44, %s5510_s6 }
 0xbc2   : > { %v1734_v39 = vrot.slane %v1720_v40, 1  ;;  %v1736_v42 = vrot.slane %v1721_v35, 1 }
 0xbc4   : > { %v1737_v53 = vsel %vm686_vm1, %v1732_v30, %v1736_v42  ;;  %v1735_v56 = vsel %vm686_vm1, %v1729_v26, %v1734_v39  ;;  %v1812_v26 = vsel %vm661_vm0, %v1810_v22, %v1811_v1 }
 0xbc5   : > { %1744 = vrot.lane.b32.xlu1 %v1737_v53, %s5510_s6  ;;  %1742 = vrot.lane.b32.xlu0 %v1735_v56, %s5510_s6  ;;  %v3299_v56 = vld [vmem:[%s5473_s1 + $0x220] sm:$0xff]  ;;  %s5668_s6 = smov 15  }
 0xbc9   : > { %1762 = vrot.lane.b32.xlu1 %v1759_v51, %s5514_s9  ;;  %1760 = vrot.lane.b32.xlu0 %v1757_v45, %s5514_s9  ;;  %v3300_v51 = vld [vmem:[%s5473_s1 + $0x228] sm:$0xff] }
 0xbcd   : > { %1764 = vrot.lane.b32.xlu0 %v1758_v48, %s5514_s9  ;;  %s5670_s9 = smov 14  }
 0xc33   : > { %v4633_v54 = vpop.permute.xlu0 %1738  ;;  %v4635_v57 = vpop.permute.xlu1 %1740 }
 0xc37   : > { %v4637_v60 = vpop.permute.xlu0 %1742  ;;  %v4639_v55 = vpop.permute.xlu1 %1744 }
 0xc3b   : > { %v1761_v58 = vpop.permute.xlu0 %1760  ;;  %v1763_v24 = vpop.permute.xlu1 %1762 }
 0xc3c   : > { %v1769_v61 = vmul.f32 %v1761_v58, %v4472_v27  ;;  %v1770_v0 = vmul.f32 %v1761_v58, %v4475_v29  ;;  %v1771_v9 = vmul.f32 %v1763_v24, %v4478_v32  ;;  %v1772_v15 = vmul.f32 %v1763_v24, %v4488_v38 }
 0xc3e   : > { %v1781_v16 = vrot.slane %v1769_v61, 1  ;;  %v1784_v59 = vrot.slane %v1770_v0, 1  ;;  %v1782_v62 = vrot.slane %v1771_v9, 1  ;;  %v1785_v21 = vrot.slane %v1772_v15, 1 }
 0xc3f   : > { %v1765_v10 = vpop.permute.xlu0 %1764 }
 0xc40   : > { %v1773_v23 = vmul.f32 %v1765_v10, %v4498_v49  ;;  %v1774_v13 = vmul.f32 %v1765_v10, %v4501_v52  ;;  %v1786_v2 = vsel %vm686_vm1, %v1784_v59, %v1785_v21  ;;  %v1783_v28 = vsel %vm686_vm1, %v1781_v16, %v1782_v62 }
 0xc41   : > { %1793 = vrot.lane.b32.xlu0 %v1786_v2, %s5508_s7  ;;  %1791 = vrot.lane.b32.xlu1 %v1783_v28, %s5508_s7  ;;  %v1863_v16 = vrot.slane %v3299_v56, 7  ;;  %v1864_v59 = vrot.slane %v3300_v51, 7 }
 0xc42   : > { %v1787_v17 = vrot.slane %v1773_v23, 1  ;;  %v1789_v63 = vrot.slane %v1774_v13, 1 }
 0xc43   : > { %v1865_v10 = vsel %vm661_vm0, %v1863_v16, %v1864_v59 }
 0xc44   : > { %v1790_v25 = vsel %vm686_vm1, %v1785_v21, %v1789_v63  ;;  %v1788_v12 = vsel %vm686_vm1, %v1782_v62, %v1787_v17 }
 0xc45   : > { %1797 = vrot.lane.b32.xlu0 %v1790_v25, %s5508_s7  ;;  %1795 = vrot.lane.b32.xlu1 %v1788_v12, %s5508_s7  ;;  %s5665_s7 = smov 126  }
 0xc49   : > { %1815 = vrot.lane.b32.xlu0 %v1812_v26, %s5512_s17  ;;  %1813 = vrot.lane.b32.xlu1 %v1810_v22, %s5512_s17 }
 0xc4d   : > { %1817 = vrot.lane.b32.xlu1 %v1811_v1, %s5512_s17  ;;  %s5667_s17 = smov 127  }
 0xcb3   : > { %v4665_v30 = vpop.permute.xlu0 %1793  ;;  %v4667_v33 = vpop.permute.xlu1 %1791 }
 0xcb7   : > { %v4669_v36 = vpop.permute.xlu0 %1797  ;;  %v4671_v31 = vpop.permute.xlu1 %1795 }
 0xcbb   : > { %v1816_v34 = vpop.permute.xlu0 %1815  ;;  %v1814_v37 = vpop.permute.xlu1 %1813 }
 0xcbc   : > { %v1824_v40 = vmul.f32 %v1816_v34, %v4478_v32  ;;  %v1825_v35 = vmul.f32 %v1816_v34, %v4488_v38  ;;  %v1822_v41 = vmul.f32 %v1814_v37, %v4472_v27  ;;  %v1823_v44 = vmul.f32 %v1814_v37, %v4475_v29 }
 0xcbe   : > { %v1835_v39 = vrot.slane %v1824_v40, 1  ;;  %v1838_v42 = vrot.slane %v1825_v35, 1  ;;  %v1834_v45 = vrot.slane %v1822_v41, 1  ;;  %v1837_v48 = vrot.slane %v1823_v44, 1  ;;  %v3301_v40 = vld [vmem:[%s5473_s1 + $0x230] sm:$0xff]  ;;  %v3302_v35 = vld [vmem:[%s5473_s1 + $0x238] sm:$0xff] }
 0xcbf   : > { %v1818_v53 = vpop.permute.xlu1 %1817  ;;  %v1917_v56 = vrot.slane %v3302_v35, 7 }
 0xcc0   : > { %v1826_v58 = vmul.f32 %v1818_v53, %v4498_v49  ;;  %v1827_v24 = vmul.f32 %v1818_v53, %v4501_v52  ;;  %v1839_v61 = vsel %vm686_vm1, %v1837_v48, %v1838_v42  ;;  %v1836_v0 = vsel %vm686_vm1, %v1834_v45, %v1835_v39 }
 0xcc1   : > { %1846 = vrot.lane.b32.xlu1 %v1839_v61, %s5665_s7  ;;  %1844 = vrot.lane.b32.xlu0 %v1836_v0, %s5665_s7  ;;  %v1916_v53 = vrot.slane %v3301_v40, 7 }
 0xcc2   : > { %v1840_v9 = vrot.slane %v1826_v58, 1  ;;  %v1842_v15 = vrot.slane %v1827_v24, 1 }
 0xcc3   : > { %v1918_v24 = vsel %vm661_vm0, %v1916_v53, %v1917_v56 }
 0xcc4   : > { %v1843_v62 = vsel %vm686_vm1, %v1838_v42, %v1842_v15  ;;  %v1841_v21 = vsel %vm686_vm1, %v1835_v39, %v1840_v9 }
 0xcc5   : > { %1850 = vrot.lane.b32.xlu1 %v1843_v62, %s5665_s7  ;;  %1848 = vrot.lane.b32.xlu0 %v1841_v21, %s5665_s7 }
 0xcc9   : > { %1868 = vrot.lane.b32.xlu1 %v1865_v10, %s5666_s25  ;;  %1866 = vrot.lane.b32.xlu0 %v1863_v16, %s5666_s25 }
 0xccd   : > { %1870 = vrot.lane.b32.xlu0 %v1864_v59, %s5666_s25 }
 0xd33   : > { %v4697_v11 = vpop.permute.xlu0 %1844  ;;  %v4699_v14 = vpop.permute.xlu1 %1846 }
 0xd37   : > { %v4701_v23 = vpop.permute.xlu0 %1848  ;;  %v4703_v13 = vpop.permute.xlu1 %1850 }
 0xd3b   : > { %v1867_v2 = vpop.permute.xlu0 %1866  ;;  %v1869_v28 = vpop.permute.xlu1 %1868 }
 0xd3c   : > { %v1875_v17 = vmul.f32 %v1867_v2, %v4472_v27  ;;  %v1876_v63 = vmul.f32 %v1867_v2, %v4475_v29  ;;  %v1877_v22 = vmul.f32 %v1869_v28, %v4478_v32  ;;  %v1878_v1 = vmul.f32 %v1869_v28, %v4488_v38 }
 0xd3e   : > { %v1887_v25 = vrot.slane %v1875_v17, 1  ;;  %v1890_v12 = vrot.slane %v1876_v63, 1  ;;  %v1888_v26 = vrot.slane %v1877_v22, 1  ;;  %v1891_v34 = vrot.slane %v1878_v1, 1 }
 0xd3f   : > { %v1871_v37 = vpop.permute.xlu0 %1870 }
 0xd40   : > { %v1879_v41 = vmul.f32 %v1871_v37, %v4498_v49  ;;  %v1880_v44 = vmul.f32 %v1871_v37, %v4501_v52  ;;  %v1892_v39 = vsel %vm686_vm1, %v1890_v12, %v1891_v34  ;;  %v1889_v42 = vsel %vm686_vm1, %v1887_v25, %v1888_v26  ;;  %v3303_v25 = vld [vmem:[%s5473_s1 + $0x240] sm:$0xff]  ;;  %v3304_v12 = vld [vmem:[%s5473_s1 + $0x248] sm:$0xff] }
 0xd41   : > { %1899 = vrot.lane.b32.xlu0 %v1892_v39, %s5667_s17  ;;  %1897 = vrot.lane.b32.xlu1 %v1889_v42, %s5667_s17  ;;  %v1970_v39 = vrot.slane %v3304_v12, 7 }
 0xd42   : > { %v1893_v45 = vrot.slane %v1879_v41, 1  ;;  %v1895_v48 = vrot.slane %v1880_v44, 1  ;;  %v1969_v44 = vrot.slane %v3303_v25, 7  ;;  %v3306_v25 = vld [vmem:[%s5473_s1 + $0x258] sm:$0xff] }
 0xd44   : > { %v1896_v51 = vsel %vm686_vm1, %v1891_v34, %v1895_v48  ;;  %v1894_v58 = vsel %vm686_vm1, %v1888_v26, %v1893_v45  ;;  %v1971_v48 = vsel %vm661_vm0, %v1969_v44, %v1970_v39 }
 0xd45   : > { %1903 = vrot.lane.b32.xlu0 %v1896_v51, %s5667_s17  ;;  %1901 = vrot.lane.b32.xlu1 %v1894_v58, %s5667_s17 }
 0xd49   : > { %1921 = vrot.lane.b32.xlu0 %v1918_v24, %s5668_s6  ;;  %1919 = vrot.lane.b32.xlu1 %v1916_v53, %s5668_s6 }
 0xd4d   : > { %1923 = vrot.lane.b32.xlu1 %v1917_v56, %s5668_s6 }
 0xdb3   : > { %v4729_v61 = vpop.permute.xlu0 %1899  ;;  %v4731_v0 = vpop.permute.xlu1 %1897 }
 0xdb7   : > { %v4733_v9 = vpop.permute.xlu0 %1903  ;;  %v4735_v15 = vpop.permute.xlu1 %1901 }
 0xdbb   : > { %v1922_v16 = vpop.permute.xlu0 %1921  ;;  %v1920_v59 = vpop.permute.xlu1 %1919 }
 0xdbc   : > { %v1930_v62 = vmul.f32 %v1922_v16, %v4478_v32  ;;  %v1931_v21 = vmul.f32 %v1922_v16, %v4488_v38  ;;  %v1928_v10 = vmul.f32 %v1920_v59, %v4472_v27  ;;  %v1929_v2 = vmul.f32 %v1920_v59, %v4475_v29 }
 0xdbe   : > { %v1941_v28 = vrot.slane %v1930_v62, 1  ;;  %v1944_v17 = vrot.slane %v1931_v21, 1  ;;  %v1940_v63 = vrot.slane %v1928_v10, 1  ;;  %v1943_v22 = vrot.slane %v1929_v2, 1 }
 0xdbf   : > { %v1924_v1 = vpop.permute.xlu1 %1923 }
 0xdc0   : > { %v1932_v26 = vmul.f32 %v1924_v1, %v4498_v49  ;;  %v1933_v34 = vmul.f32 %v1924_v1, %v4501_v52  ;;  %v1945_v37 = vsel %vm686_vm1, %v1943_v22, %v1944_v17  ;;  %v1942_v40 = vsel %vm686_vm1, %v1940_v63, %v1941_v28  ;;  %v3305_v1 = vld [vmem:[%s5473_s1 + $0x250] sm:$0xff] }
 0xdc1   : > { %1952 = vrot.lane.b32.xlu1 %v1945_v37, %s5669_s4  ;;  %1950 = vrot.lane.b32.xlu0 %v1942_v40, %s5669_s4 }
 0xdc2   : > { %v1946_v35 = vrot.slane %v1932_v26, 1  ;;  %v1948_v41 = vrot.slane %v1933_v34, 1 }
 0xdc4   : > { %v1949_v42 = vsel %vm686_vm1, %v1944_v17, %v1948_v41  ;;  %v1947_v45 = vsel %vm686_vm1, %v1941_v28, %v1946_v35  ;;  %v2022_v41 = vrot.slane %v3305_v1, 7 }
 0xdc5   : > { %1956 = vrot.lane.b32.xlu1 %v1949_v42, %s5669_s4  ;;  %1954 = vrot.lane.b32.xlu0 %v1947_v45, %s5669_s4 }
 0xdc9   : > { %1974 = vrot.lane.b32.xlu1 %v1971_v48, %s5670_s9  ;;  %1972 = vrot.lane.b32.xlu0 %v1969_v44, %s5670_s9  ;;  %v2023_v44 = vrot.slane %v3306_v25, 7 }
 0xdcb   : > { %v2024_v45 = vsel %vm661_vm0, %v2022_v41, %v2023_v44 }
 0xdcd   : > { %1976 = vrot.lane.b32.xlu0 %v1970_v39, %s5670_s9 }
 0xe33   : > { %v4761_v53 = vpop.permute.xlu0 %1950  ;;  %v4763_v56 = vpop.permute.xlu1 %1952 }
 0xe37   : > { %v4765_v51 = vpop.permute.xlu0 %1954  ;;  %v4767_v58 = vpop.permute.xlu1 %1956 }
 0xe3b   : > { %v1973_v24 = vpop.permute.xlu0 %1972  ;;  %v1975_v16 = vpop.permute.xlu1 %1974 }
 0xe3c   : > { %v1981_v59 = vmul.f32 %v1973_v24, %v4472_v27  ;;  %v1982_v62 = vmul.f32 %v1973_v24, %v4475_v29  ;;  %v1983_v21 = vmul.f32 %v1975_v16, %v4478_v32  ;;  %v1984_v10 = vmul.f32 %v1975_v16, %v4488_v38 }
 0xe3e   : > { %v1993_v2 = vrot.slane %v1981_v59, 1  ;;  %v1996_v28 = vrot.slane %v1982_v62, 1  ;;  %v1994_v17 = vrot.slane %v1983_v21, 1  ;;  %v1997_v63 = vrot.slane %v1984_v10, 1 }
 0xe3f   : > { %v1977_v22 = vpop.permute.xlu0 %1976 }
 0xe40   : > { %v1985_v12 = vmul.f32 %v1977_v22, %v4498_v49  ;;  %v1986_v26 = vmul.f32 %v1977_v22, %v4501_v52  ;;  %v1998_v34 = vsel %vm686_vm1, %v1996_v28, %v1997_v63  ;;  %v1995_v37 = vsel %vm686_vm1, %v1993_v2, %v1994_v17 }
 0xe41   : > { %2005 = vrot.lane.b32.xlu0 %v1998_v34, %s5671_s26  ;;  %2003 = vrot.lane.b32.xlu1 %v1995_v37, %s5671_s26  ;;  %v3308_v34 = vld [vmem:[%s5473_s1 + $0x268] sm:$0xff] }
 0xe42   : > { %v1999_v40 = vrot.slane %v1985_v12, 1  ;;  %v2001_v35 = vrot.slane %v1986_v26, 1  ;;  %v3307_v26 = vld [vmem:[%s5473_s1 + $0x260] sm:$0xff] }
 0xe44   : > { %v2002_v39 = vsel %vm686_vm1, %v1997_v63, %v2001_v35  ;;  %v2000_v42 = vsel %vm686_vm1, %v1994_v17, %v1999_v40 }
 0xe45   : > { %2009 = vrot.lane.b32.xlu0 %v2002_v39, %s5671_s26  ;;  %2007 = vrot.lane.b32.xlu1 %v2000_v42, %s5671_s26  ;;  %v2075_v42 = vrot.slane %v3307_v26, 7 }
 0xe49   : > { %2027 = vrot.lane.b32.xlu0 %v2024_v45, %s5577_s18  ;;  %2025 = vrot.lane.b32.xlu1 %v2022_v41, %s5577_s18  ;;  %v2076_v45 = vrot.slane %v3308_v34, 7 }
 0xe4d   : > { %2029 = vrot.lane.b32.xlu1 %v2023_v44, %s5577_s18 }
 0xeb3   : > { %v4793_v48 = vpop.permute.xlu0 %2005  ;;  %v4795_v24 = vpop.permute.xlu1 %2003 }
 0xeb7   : > { %v4797_v16 = vpop.permute.xlu0 %2009  ;;  %v4799_v59 = vpop.permute.xlu1 %2007 }
 0xebb   : > { %v2028_v62 = vpop.permute.xlu0 %2027  ;;  %v2026_v21 = vpop.permute.xlu1 %2025 }
 0xebc   : > { %v2036_v10 = vmul.f32 %v2028_v62, %v4478_v32  ;;  %v2037_v2 = vmul.f32 %v2028_v62, %v4488_v38  ;;  %v2034_v28 = vmul.f32 %v2026_v21, %v4472_v27  ;;  %v2035_v17 = vmul.f32 %v2026_v21, %v4475_v29 }
 0xebe   : > { %v2047_v63 = vrot.slane %v2036_v10, 1  ;;  %v2050_v22 = vrot.slane %v2037_v2, 1  ;;  %v2046_v1 = vrot.slane %v2034_v28, 1  ;;  %v2049_v25 = vrot.slane %v2035_v17, 1 }
 0xebf   : > { %v2030_v12 = vpop.permute.xlu1 %2029  ;;  %v2077_v10 = vsel %vm661_vm0, %v2075_v42, %v2076_v45 }
 0xec0   : > { %v2038_v37 = vmul.f32 %v2030_v12, %v4498_v49  ;;  %v2039_v40 = vmul.f32 %v2030_v12, %v4501_v52  ;;  %v2051_v35 = vsel %vm686_vm1, %v2049_v25, %v2050_v22  ;;  %v2048_v41 = vsel %vm686_vm1, %v2046_v1, %v2047_v63 }
 0xec1   : > { %2058 = vrot.lane.b32.xlu1 %v2051_v35, %s5582_s8  ;;  %2056 = vrot.lane.b32.xlu0 %v2048_v41, %s5582_s8 }
 0xec2   : > { %v2052_v44 = vrot.slane %v2038_v37, 1  ;;  %v2054_v39 = vrot.slane %v2039_v40, 1 }
 0xec4   : > { %v2055_v62 = vsel %vm686_vm1, %v2050_v22, %v2054_v39  ;;  %v2053_v21 = vsel %vm686_vm1, %v2047_v63, %v2052_v44  ;;  %v3309_v39 = vld [vmem:[%s5473_s1 + $0x270] sm:$0xff] }
 0xec5   : > { %2062 = vrot.lane.b32.xlu1 %v2055_v62, %s5582_s8  ;;  %2060 = vrot.lane.b32.xlu0 %v2053_v21, %s5582_s8 }
 0xec9   : > { %2080 = vrot.lane.b32.xlu1 %v2077_v10, %s5583_s15  ;;  %2078 = vrot.lane.b32.xlu0 %v2075_v42, %s5583_s15  ;;  %v3310_v42 = vld [vmem:[%s5473_s1 + $0x278] sm:$0xff] }
 0xecd   : > { %2082 = vrot.lane.b32.xlu0 %v2076_v45, %s5583_s15 }
 0xf33   : > { %v4825_v2 = vpop.permute.xlu0 %2056  ;;  %v4827_v28 = vpop.permute.xlu1 %2058 }
 0xf37   : > { %v4829_v17 = vpop.permute.xlu0 %2060  ;;  %v4831_v22 = vpop.permute.xlu1 %2062 }
 0xf38   : > { %5672 = vst [vmem:[#allocation6_spill] sm:$0xff] %v4829_v17 }
 0xf3b   : > { %v2079_v63 = vpop.permute.xlu0 %2078  ;;  %v2081_v1 = vpop.permute.xlu1 %2080 }
 0xf3c   : > { %v2087_v25 = vmul.f32 %v2079_v63, %v4472_v27  ;;  %v2088_v12 = vmul.f32 %v2079_v63, %v4475_v29  ;;  %v2089_v26 = vmul.f32 %v2081_v1, %v4478_v32  ;;  %v2090_v34 = vmul.f32 %v2081_v1, %v4488_v38 }
 0xf3e   : > { %v2099_v37 = vrot.slane %v2087_v25, 1  ;;  %v2102_v40 = vrot.slane %v2088_v12, 1  ;;  %v2100_v35 = vrot.slane %v2089_v26, 1  ;;  %v2103_v41 = vrot.slane %v2090_v34, 1 }
 0xf3f   : > { %v2083_v44 = vpop.permute.xlu0 %2082  ;;  %v2128_v25 = vrot.slane %v3309_v39, 7  ;;  %v2129_v12 = vrot.slane %v3310_v42, 7 }
 0xf40   : > { %v2091_v45 = vmul.f32 %v2083_v44, %v4498_v49  ;;  %v2092_v62 = vmul.f32 %v2083_v44, %v4501_v52  ;;  %v2104_v21 = vsel %vm686_vm1, %v2102_v40, %v2103_v41  ;;  %v2101_v10 = vsel %vm686_vm1, %v2099_v37, %v2100_v35 }
 0xf41   : > { %2111 = vrot.lane.b32.xlu0 %v2104_v21, %s5588_s29  ;;  %2109 = vrot.lane.b32.xlu1 %v2101_v10, %s5588_s29  ;;  %v2130_v40 = vsel %vm661_vm0, %v2128_v25, %v2129_v12 }
 0xf42   : > { %v2105_v63 = vrot.slane %v2091_v45, 1  ;;  %v2107_v1 = vrot.slane %v2092_v62, 1 }
 0xf44   : > { %v2108_v26 = vsel %vm686_vm1, %v2103_v41, %v2107_v1  ;;  %v2106_v34 = vsel %vm686_vm1, %v2100_v35, %v2105_v63 }
 0xf45   : > { %2115 = vrot.lane.b32.xlu0 %v2108_v26, %s5588_s29  ;;  %2113 = vrot.lane.b32.xlu1 %v2106_v34, %s5588_s29  ;;  %v3311_v34 = vld [vmem:[%s5473_s1 + $0x280] sm:$0xff] }
 0xf49   : > { %2133 = vrot.lane.b32.xlu0 %v2130_v40, %s5589_s14  ;;  %2131 = vrot.lane.b32.xlu1 %v2128_v25, %s5589_s14  ;;  %v3312_v40 = vld [vmem:[%s5473_s1 + $0x288] sm:$0xff] }
 0xf4d   : > { %2135 = vrot.lane.b32.xlu1 %v2129_v12, %s5589_s14 }
 0xfb3   : > { %v4857_v37 = vpop.permute.xlu0 %2111  ;;  %v4859_v44 = vpop.permute.xlu1 %2109 }
 0xfb7   : > { %v4861_v39 = vpop.permute.xlu0 %2115  ;;  %v4863_v41 = vpop.permute.xlu1 %2113 }
 0xfb8   : > { %5673 = vst [vmem:[#allocation5_spill] sm:$0xff] %v4861_v39  ;;  %5674 = vst [vmem:[#allocation4_spill] sm:$0xff] %v4863_v41 }
 0xfbb   : > { %v2134_v35 = vpop.permute.xlu0 %2133  ;;  %v2132_v42 = vpop.permute.xlu1 %2131 }
 0xfbc   : > { %v2142_v45 = vmul.f32 %v2134_v35, %v4478_v32  ;;  %v2143_v62 = vmul.f32 %v2134_v35, %v4488_v38  ;;  %v2140_v21 = vmul.f32 %v2132_v42, %v4472_v27  ;;  %v2141_v10 = vmul.f32 %v2132_v42, %v4475_v29 }
 0xfbe   : > { %v2153_v63 = vrot.slane %v2142_v45, 1  ;;  %v2156_v1 = vrot.slane %v2143_v62, 1  ;;  %v2152_v25 = vrot.slane %v2140_v21, 1  ;;  %v2155_v12 = vrot.slane %v2141_v10, 1 }
 0xfbf   : > { %v2136_v26 = vpop.permute.xlu1 %2135  ;;  %v2181_v21 = vrot.slane %v3311_v34, 7  ;;  %v2182_v10 = vrot.slane %v3312_v40, 7 }
 0xfc0   : > { %v2144_v4 = vmul.f32 %v2136_v26, %v4498_v49  ;;  %v2145_v35 = vmul.f32 %v2136_v26, %v4501_v52  ;;  %v2157_v41 = vsel %vm686_vm1, %v2155_v12, %v2156_v1  ;;  %v2154_v42 = vsel %vm686_vm1, %v2152_v25, %v2153_v63 }
 0xfc1   : > { %2164 = vrot.lane.b32.xlu1 %v2157_v41, %s5594_s23  ;;  %2162 = vrot.lane.b32.xlu0 %v2154_v42, %s5594_s23  ;;  %v2183_v12 = vsel %vm661_vm0, %v2181_v21, %v2182_v10 }
 0xfc2   : > { %v2158_v45 = vrot.slane %v2144_v4, 1  ;;  %v2160_v62 = vrot.slane %v2145_v35, 1 }
 0xfc4   : > { %v2161_v39 = vsel %vm686_vm1, %v2156_v1, %v2160_v62  ;;  %v2159_v17 = vsel %vm686_vm1, %v2153_v63, %v2158_v45 }
 0xfc5   : > { %2168 = vrot.lane.b32.xlu1 %v2161_v39, %s5594_s23  ;;  %2166 = vrot.lane.b32.xlu0 %v2159_v17, %s5594_s23 }
 0xfc9   : > { %2186 = vrot.lane.b32.xlu1 %v2183_v12, %s5595_s11  ;;  %2184 = vrot.lane.b32.xlu0 %v2181_v21, %s5595_s11  ;;  %v3314_v12 = vld [vmem:[%s5473_s1 + $0x298] sm:$0xff] }
 0xfcd   : > { %2188 = vrot.lane.b32.xlu0 %v2182_v10, %s5595_s11  ;;  %v3313_v10 = vld [vmem:[%s5473_s1 + $0x290] sm:$0xff] }
0x1033   : > { %v4889_v4 = vpop.permute.xlu0 %2162  ;;  %v4891_v41 = vpop.permute.xlu1 %2164 }
0x1034   : > { %5675 = vst [vmem:[#allocation3_spill] sm:$0xff] %v4889_v4  ;;  %5676 = vst [vmem:[#allocation10_spill] sm:$0xff] %v4891_v41 }
0x1037   : > { %v4893_v25 = vpop.permute.xlu0 %2166  ;;  %v4895_v1 = vpop.permute.xlu1 %2168 }
0x1038   : > { %5677 = vst [vmem:[#allocation9_spill] sm:$0xff] %v4893_v25  ;;  %5678 = vst [vmem:[#allocation8_spill] sm:$0xff] %v4895_v1 }
0x103b   : > { %v2185_v63 = vpop.permute.xlu0 %2184  ;;  %v2187_v39 = vpop.permute.xlu1 %2186 }
0x103c   : > { %v2193_v17 = vmul.f32 %v2185_v63, %v4472_v27  ;;  %v2194_v26 = vmul.f32 %v2185_v63, %v4475_v29  ;;  %v2195_v34 = vmul.f32 %v2187_v39, %v4478_v32  ;;  %v2196_v40 = vmul.f32 %v2187_v39, %v4488_v38 }
0x103e   : > { %v2205_v35 = vrot.slane %v2193_v17, 1  ;;  %v2208_v42 = vrot.slane %v2194_v26, 1  ;;  %v2206_v45 = vrot.slane %v2195_v34, 1  ;;  %v2209_v62 = vrot.slane %v2196_v40, 1 }
0x103f   : > { %v2189_v21 = vpop.permute.xlu0 %2188  ;;  %v2234_v34 = vrot.slane %v3313_v10, 7  ;;  %v2235_v40 = vrot.slane %v3314_v12, 7 }
0x1040   : > { %v2197_v25 = vmul.f32 %v2189_v21, %v4498_v49  ;;  %v2198_v63 = vmul.f32 %v2189_v21, %v4501_v52  ;;  %v2210_v1 = vsel %vm686_vm1, %v2208_v42, %v2209_v62  ;;  %v2207_v39 = vsel %vm686_vm1, %v2205_v35, %v2206_v45 }
0x1041   : > { %2217 = vrot.lane.b32.xlu0 %v2210_v1, %s5679_s30  ;;  %2215 = vrot.lane.b32.xlu1 %v2207_v39, %s5679_s30  ;;  %v2236_v42 = vsel %vm661_vm0, %v2234_v34, %v2235_v40  ;;  %vm2291_vm0 = vcmask 1041408  }
0x1042   : > { %v2211_v17 = vrot.slane %v2197_v25, 1  ;;  %v2213_v26 = vrot.slane %v2198_v63, 1 }
0x1044   : > { %v2214_v4 = vsel %vm686_vm1, %v2209_v62, %v2213_v26  ;;  %v2212_v41 = vsel %vm686_vm1, %v2206_v45, %v2211_v17 }
0x1045   : > { %2221 = vrot.lane.b32.xlu0 %v2214_v4, %s5679_s30  ;;  %2219 = vrot.lane.b32.xlu1 %v2212_v41, %s5679_s30 }
0x1049   : > { %2239 = vrot.lane.b32.xlu0 %v2236_v42, %s5600_s10  ;;  %2237 = vrot.lane.b32.xlu1 %v2234_v34, %s5600_s10  ;;  %v3316_v42 = vld [vmem:[%s5473_s1 + $0x2a8] sm:$0xff] }
0x104d   : > { %2241 = vrot.lane.b32.xlu1 %v2235_v40, %s5600_s10  ;;  %v3315_v40 = vld [vmem:[%s5473_s1 + $0x2a0] sm:$0xff] }
0x10b3   : > { %v4921_v25 = vpop.permute.xlu0 %2217  ;;  %v4923_v1 = vpop.permute.xlu1 %2215 }
0x10b4   : > { %5680 = vst [vmem:[#allocation7_spill] sm:$0xff] %v4921_v25  ;;  %5681 = vst [vmem:[#allocation14_spill] sm:$0xff] %v4923_v1 }
0x10b7   : > { %v4925_v35 = vpop.permute.xlu0 %2221  ;;  %v4927_v62 = vpop.permute.xlu1 %2219 }
0x10b8   : > { %5682 = vst [vmem:[#allocation13_spill] sm:$0xff] %v4925_v35  ;;  %5683 = vst [vmem:[#allocation12_spill] sm:$0xff] %v4927_v62  ;;  %v3318_v62 = vld [vmem:[%s5473_s1 + $0x2b8] sm:$0xff] }
0x10bb   : > { %v2240_v45 = vpop.permute.xlu0 %2239  ;;  %v2238_v4 = vpop.permute.xlu1 %2237 }
0x10bc   : > { %v2248_v41 = vmul.f32 %v2240_v45, %v4478_v32  ;;  %v2249_v21 = vmul.f32 %v2240_v45, %v4488_v38  ;;  %v2246_v10 = vmul.f32 %v2238_v4, %v4472_v27  ;;  %v2247_v12 = vmul.f32 %v2238_v4, %v4475_v29 }
0x10be   : > { %v2259_v63 = vrot.slane %v2248_v41, 1  ;;  %v2262_v39 = vrot.slane %v2249_v21, 1  ;;  %v2258_v17 = vrot.slane %v2246_v10, 1  ;;  %v2261_v26 = vrot.slane %v2247_v12, 1 }
0x10bf   : > { %v2242_v34 = vpop.permute.xlu1 %2241  ;;  %v2292_v41 = vrot.slane %v3315_v40, 6  ;;  %v2293_v21 = vrot.slane %v3316_v42, 6 }
0x10c0   : > { %v2250_v32 = vmul.f32 %v2242_v34, %v4498_v49  ;;  %v2251_v38 = vmul.f32 %v2242_v34, %v4501_v52  ;;  %v2263_v27 = vsel %vm686_vm1, %v2261_v26, %v2262_v39  ;;  %v2260_v29 = vsel %vm686_vm1, %v2258_v17, %v2259_v63  ;;  %v4962_v26 = vld [vmem:[%s3551_s27] sm:$0xfc]  ;;  %v4965_v34 = vld [vmem:[%s3551_s27 + $0x8] sm:$0xfc] }
0x10c1   : > { %2270 = vrot.lane.b32.xlu1 %v2263_v27, %s3431_s24  ;;  %2268 = vrot.lane.b32.xlu0 %v2260_v29, %s3431_s24  ;;  %v2294_v52 = vsel %vm2291_vm0, %v2292_v41, %v2293_v21  ;;  %v4970_v27 = vld [vmem:[%s3551_s27 + $0x10] sm:$0xff] }
0x10c2   : > { %v2264_v45 = vrot.slane %v2250_v32, 1  ;;  %v2266_v4 = vrot.slane %v2251_v38, 1  ;;  %5688 = vst [vmem:[#allocation15_spill] sm:$0xff] %v4970_v27 }
0x10c4   : > { %v2267_v10 = vsel %vm686_vm1, %v2262_v39, %v2266_v4  ;;  %v2265_v49 = vsel %vm686_vm1, %v2259_v63, %v2264_v45  ;;  %v4974_v45 = vld [vmem:[%s3551_s27 + $0x18] sm:$0xff]  ;;  %vm2316_vm1 = vcmask 1045504  }
0x10c5   : > { %2274 = vrot.lane.b32.xlu1 %v2267_v10, %s3431_s24  ;;  %2272 = vrot.lane.b32.xlu0 %v2265_v49, %s3431_s24  ;;  %5689 = vst [vmem:[#allocation22_spill] sm:$0xff] %v4974_v45 }
0x10c9   : > { %2297 = vrot.lane.b32.xlu1 %v2294_v52, %s3404_s16  ;;  %2295 = vrot.lane.b32.xlu0 %v2292_v41, %s3404_s16  ;;  %v4978_v41 = vld [vmem:[%s3551_s27 + $0x20] sm:$0x3] }
0x10cd   : > { %2299 = vrot.lane.b32.xlu0 %v2293_v21, %s3404_s16  ;;  %v4981_v21 = vld [vmem:[%s3551_s27 + $0x28] sm:$0x3]  ;;  %s5690_s16 = smov 122  }
0x1133   : > { %v4953_v12 = vpop.permute.xlu0 %2268  ;;  %v4955_v39 = vpop.permute.xlu1 %2270 }
0x1134   : > { %5684 = vst [vmem:[#allocation11_spill] sm:$0xff] %v4953_v12  ;;  %5685 = vst [vmem:[#allocation17_spill] sm:$0xff] %v4955_v39  ;;  %v2347_v39 = vrot.slane %v3318_v62, 6 }
0x1137   : > { %v4957_v63 = vpop.permute.xlu0 %2272  ;;  %v4959_v17 = vpop.permute.xlu1 %2274 }
0x1138   : > { %5686 = vst [vmem:[#allocation18_spill] sm:$0xff] %v4957_v63  ;;  %5687 = vst [vmem:[#allocation16_spill] sm:$0xff] %v4959_v17 }
0x113b   : > { %v2296_v40 = vpop.permute.xlu0 %2295  ;;  %v2298_v42 = vpop.permute.xlu1 %2297 }
0x113c   : > { %v2304_v32 = vmul.f32 %v2296_v40, %v4962_v26  ;;  %v2305_v38 = vmul.f32 %v2296_v40, %v4965_v34  ;;  %v2306_v29 = vmul.f32 %v4970_v27, %v2298_v42  ;;  %v2307_v4 = vmul.f32 %v4974_v45, %v2298_v42  ;;  %v3317_v40 = vld [vmem:[%s5473_s1 + $0x2b0] sm:$0xff] }
0x113e   : > { %v2317_v10 = vrot.slane %v2304_v32, 2  ;;  %v2320_v49 = vrot.slane %v2305_v38, 2  ;;  %v2318_v52 = vrot.slane %v2306_v29, 2  ;;  %v2321_v63 = vrot.slane %v2307_v4, 2 }
0x113f   : > { %v2300_v17 = vpop.permute.xlu0 %2299  ;;  %v2346_v4 = vrot.slane %v3317_v40, 6 }
0x1140   : > { %v2308_v42 = vmul.f32 %v2300_v17, %v4978_v41  ;;  %v2309_v35 = vmul.f32 %v2300_v17, %v4981_v21  ;;  %v2322_v12 = vsel %vm2316_vm1, %v2320_v49, %v2321_v63  ;;  %v2319_v32 = vsel %vm2316_vm1, %v2317_v10, %v2318_v52 }
0x1141   : > { %2329 = vrot.lane.b32.xlu0 %v2322_v12, %s3414_s28  ;;  %2327 = vrot.lane.b32.xlu1 %v2319_v32, %s3414_s28  ;;  %v2348_v17 = vsel %vm2291_vm0, %v2346_v4, %v2347_v39 }
0x1142   : > { %v2323_v38 = vrot.slane %v2308_v42, 2  ;;  %v2325_v29 = vrot.slane %v2309_v35, 2 }
0x1144   : > { %v2326_v1 = vsel %vm2316_vm1, %v2321_v63, %v2325_v29  ;;  %v2324_v25 = vsel %vm2316_vm1, %v2318_v52, %v2323_v38 }
0x1145   : > { %2333 = vrot.lane.b32.xlu0 %v2326_v1, %s3414_s28  ;;  %2331 = vrot.lane.b32.xlu1 %v2324_v25, %s3414_s28 }
0x1149   : > { %2351 = vrot.lane.b32.xlu0 %v2348_v17, %s3405_s21  ;;  %2349 = vrot.lane.b32.xlu1 %v2346_v4, %s3405_s21 }
0x114d   : > { %2353 = vrot.lane.b32.xlu1 %v2347_v39, %s3405_s21 }
0x11b3   : > { %v2330_v12 = vpop.permute.xlu0 %2329  ;;  %v2328_v35 = vpop.permute.xlu1 %2327 }
0x11b4   : > { %v5004_v62 = vsel %vm203_vm2, %v2328_v35, %v2330_v12  ;;  %v3319_v12 = vld [vmem:[%s5473_s1 + $0x2c0] sm:$0xff]  ;;  %v3320_v35 = vld [vmem:[%s5473_s1 + $0x2c8] sm:$0xff] }
0x11b7   : > { %v2334_v63 = vpop.permute.xlu0 %2333  ;;  %v2332_v10 = vpop.permute.xlu1 %2331 }
0x11b8   : > { %v5007_v49 = vsel %vm203_vm2, %v2332_v10, %v2334_v63 }
0x11bb   : > { %v2352_v1 = vpop.permute.xlu0 %2351  ;;  %v2350_v25 = vpop.permute.xlu1 %2349 }
0x11bc   : > { %v2360_v52 = vmul.f32 %v4970_v27, %v2352_v1  ;;  %v2361_v40 = vmul.f32 %v4974_v45, %v2352_v1  ;;  %v2358_v42 = vmul.f32 %v2350_v25, %v4962_v26  ;;  %v2359_v39 = vmul.f32 %v2350_v25, %v4965_v34 }
0x11be   : > { %v2371_v32 = vrot.slane %v2360_v52, 2  ;;  %v2374_v38 = vrot.slane %v2361_v40, 2  ;;  %v2370_v29 = vrot.slane %v2358_v42, 2  ;;  %v2373_v4 = vrot.slane %v2359_v39, 2 }
0x11bf   : > { %v2354_v17 = vpop.permute.xlu1 %2353  ;;  %v2399_v42 = vrot.slane %v3319_v12, 6  ;;  %v2400_v39 = vrot.slane %v3320_v35, 6  ;;  %v1693_v12 = vsel %vm271_vm4, %v4603_v19, %v4601_v3 }
0x11c0   : > { %v2362_v63 = vmul.f32 %v2354_v17, %v4978_v41  ;;  %v2363_v10 = vmul.f32 %v2354_v17, %v4981_v21  ;;  %v2375_v1 = vsel %vm2316_vm1, %v2373_v4, %v2374_v38  ;;  %v2372_v25 = vsel %vm2316_vm1, %v2370_v29, %v2371_v32  ;;  %v1532_v29 = vld [vmem:[%s5474_s2] sm:$0xff] }
0x11c1   : > { %2382 = vrot.lane.b32.xlu1 %v2375_v1, %s5690_s16  ;;  %2380 = vrot.lane.b32.xlu0 %v2372_v25, %s5690_s16  ;;  %v2401_v4 = vsel %vm2291_vm0, %v2399_v42, %v2400_v39  ;;  %v1588_v17 = vsel %vm203_vm2, %v4541_v7, %v4543_v20  ;;  %v1799_v7 = vsel %vm339_vm6, %v4667_v33, %v4665_v30  ;;  %v5695_v25 = vld [vmem:[#allocation5_spill] sm:$0xff] }
0x11c2   : > { %v2376_v52 = vrot.slane %v2362_v63, 2  ;;  %v2378_v40 = vrot.slane %v2363_v10, 2  ;;  %v1694_v63 = vsel %vm271_vm4, %v4607_v6, %v4605_v5  ;;  %v1800_v5 = vsel %vm339_vm6, %v4671_v31, %v4669_v36  ;;  %v5694_v10 = vld [vmem:[#allocation3_spill] sm:$0xff] }
0x11c3   : > { %v1905_v6 = vsel %vm407_vm8, %v4731_v0, %v4729_v61  ;;  %v1906_v36 = vsel %vm407_vm8, %v4735_v15, %v4733_v9  ;;  %v2011_v31 = vsel %vm475_vm10, %v4795_v24, %v4793_v48  ;;  %v2012_v9 = vsel %vm475_vm10, %v4799_v59, %v4797_v16  ;;  %v5692_v24 = vld [vmem:[#allocation6_spill] sm:$0xff]  ;;  %v5697_v59 = vld [vmem:[#allocation7_spill] sm:$0xff] }
0x11c4   : > { %v2379_v45 = vsel %vm2316_vm1, %v2374_v38, %v2378_v40  ;;  %v2377_v27 = vsel %vm2316_vm1, %v2371_v32, %v2376_v52  ;;  %v1587_v32 = vsel %vm203_vm2, %v4537_v18, %v4539_v8  ;;  %v1533_v38 = vld [vmem:[%s5474_s2 + $0x8] sm:$0xff]  ;;  %v1641_v18 = vsel %vm237_vm3, %v4573_v47, %v4575_v50  ;;  %v5696_v52 = vld [vmem:[#allocation4_spill] sm:$0xff]  ;;  %v5698_v40 = vld [vmem:[#allocation14_spill] sm:$0xff] }
0x11c5   : > { %2386 = vrot.lane.b32.xlu1 %v2379_v45, %s5690_s16  ;;  %2384 = vrot.lane.b32.xlu0 %v2377_v27, %s5690_s16  ;;  %v1640_v27 = vsel %vm237_vm3, %v4569_v43, %v4571_v46  ;;  %v1591_v45 = vadd.f32 %v1587_v32, %v1532_v29  ;;  %v1746_v8 = vsel %vm305_vm5, %v4633_v54, %v4635_v57  ;;  %v5701_v29 = vld [vmem:[#allocation17_spill] sm:$0xff]  ;;  %v5702_v32 = vld [vmem:[#allocation11_spill] sm:$0xff] }
0x11c6   : > { %v1592_v43 = vadd.f32 %v1588_v17, %v1533_v38  ;;  %v1747_v47 = vsel %vm305_vm5, %v4637_v60, %v4639_v55  ;;  %v1852_v50 = vsel %vm373_vm7, %v4697_v11, %v4699_v14  ;;  %v1853_v60 = vsel %vm373_vm7, %v4701_v23, %v4703_v13  ;;  %v5703_v17 = vld [vmem:[#allocation13_spill] sm:$0xff] }
0x11c7   : > { %v1644_v35 = vadd.f32 %v1640_v27, %v1591_v45  ;;  %v1958_v55 = vsel %vm441_vm9, %v4761_v53, %v4763_v56  ;;  %v1959_v23 = vsel %vm441_vm9, %v4765_v51, %v4767_v58  ;;  %v2064_v13 = vsel %vm509_vm11, %v4825_v2, %v4827_v28  ;;  %v5693_v58 = vld [vmem:[#allocation10_spill] sm:$0xff] }
0x11c8   : > { %v1645_v20 = vadd.f32 %v1641_v18, %v1592_v43  ;;  %v2117_v15 = vsel %vm543_vm12, %v4859_v44, %v4857_v37  ;;  %v2065_v51 = vsel %vm509_vm11, %v5692_v24, %v4831_v22  ;;  %v2170_v2 = vsel %vm577_vm13, %v5694_v10, %v5693_v58  ;;  %v5705_v43 = vld [vmem:[#allocation16_spill] sm:$0xff] }
0x11c9   : > { %2404 = vrot.lane.b32.xlu1 %v2401_v4, %s5691_s5  ;;  %2402 = vrot.lane.b32.xlu0 %v2399_v42, %s5691_s5  ;;  %v1697_v46 = vadd.f32 %v1693_v12, %v1644_v35  ;;  %v2118_v16 = vsel %vm543_vm12, %v5696_v52, %v5695_v25  ;;  %v2223_v37 = vsel %vm611_vm14, %v5698_v40, %v5697_v59  ;;  %v5700_v4 = vld [vmem:[#allocation9_spill] sm:$0xff]  ;;  %v5704_v12 = vld [vmem:[#allocation12_spill] sm:$0xff]  ;;  %v3324_v59 = vld [vmem:[%s5473_s1 + $0x2e8] sm:$0xff] }
0x11ca   : > { %v1698_v19 = vadd.f32 %v1694_v63, %v1645_v20  ;;  %v2276_v27 = vsel %vm645_vm15, %v5702_v32, %v5701_v29  ;;  %v2224_v35 = vsel %vm611_vm14, %v5704_v12, %v5703_v17  ;;  %v3327_v32 = vld [vmem:[%s5473_s1 + $0x300] sm:$0xff]  ;;  %v3330_v17 = vld [vmem:[%s5473_s1 + $0x318] sm:$0xff]  ;;  %v3329_v12 = vld [vmem:[%s5473_s1 + $0x310] sm:$0xff] }
0x11cb   : > { %v1750_v3 = vadd.f32 %v1746_v8, %v1697_v46  ;;  %v5706_v46 = vld [vmem:[#allocation18_spill] sm:$0xff] }
0x11cc   : > { %v1751_v57 = vadd.f32 %v1747_v47, %v1698_v19  ;;  %v2277_v63 = vsel %vm645_vm15, %v5706_v46, %v5705_v43  ;;  %v3331_v46 = vld [vmem:[%s5473_s1 + $0x320] sm:$0xff] }
0x11cd   : > { %2406 = vrot.lane.b32.xlu0 %v2400_v39, %s5691_s5  ;;  %v1803_v54 = vadd.f32 %v1799_v7, %v1750_v3  ;;  %v5699_v39 = vld [vmem:[#allocation8_spill] sm:$0xff]  ;;  %s5712_s5 = smov 2  }
0x11ce   : > { %v1804_v33 = vadd.f32 %v1800_v5, %v1751_v57  ;;  %v2171_v22 = vsel %vm577_vm13, %v5700_v4, %v5699_v39 }
0x11cf   : > { %v1856_v30 = vadd.f32 %v1852_v50, %v1803_v54 }
0x11d0   : > { %v1857_v14 = vadd.f32 %v1853_v60, %v1804_v33 }
0x11d1   : > { %v1909_v11 = vadd.f32 %v1905_v6, %v1856_v30 }
0x11d2   : > { %v1910_v0 = vadd.f32 %v1906_v36, %v1857_v14  ;;  %v5707_v36 = vld [vmem:[#allocation15_spill] sm:$0xff]  ;;  %v5708_v14 = vld [vmem:[#allocation22_spill] sm:$0xff] }
0x11d3   : > { %v1962_v61 = vadd.f32 %v1958_v55, %v1909_v11 }
0x11d4   : > { %v1963_v56 = vadd.f32 %v1959_v23, %v1910_v0 }
0x11d5   : > { %v2015_v53 = vadd.f32 %v2011_v31, %v1962_v61 }
0x11d6   : > { %v2016_v28 = vadd.f32 %v2012_v9, %v1963_v56  ;;  %v3321_v9 = vld [vmem:[%s5473_s1 + $0x2d0] sm:$0xff] }
0x11d7   : > { %v2068_v48 = vadd.f32 %v2064_v13, %v2015_v53 }
0x11d8   : > { %v2069_v44 = vadd.f32 %v2065_v51, %v2016_v28 }
0x11d9   : > { %v2121_v1 = vadd.f32 %v2117_v15, %v2068_v48  ;;  %v3322_v15 = vld [vmem:[%s5473_s1 + $0x2d8] sm:$0xff] }
0x11da   : > { %v2122_v45 = vadd.f32 %v2118_v16, %v2069_v44  ;;  %v2453_v28 = vrot.slane %v3322_v15, 6  ;;  %v3323_v16 = vld [vmem:[%s5473_s1 + $0x2e0] sm:$0xff]  ;;  %v3326_v44 = vld [vmem:[%s5473_s1 + $0x2f8] sm:$0xff] }
0x11db   : > { %v2174_v42 = vadd.f32 %v2170_v2, %v2121_v1  ;;  %v2452_v2 = vrot.slane %v3321_v9, 6  ;;  %v2505_v40 = vrot.slane %v3323_v16, 6  ;;  %v2559_v4 = vrot.slane %v3326_v44, 6  ;;  %v3342_v15 = vld [vmem:[%s5473_s1 + $0x378] sm:$0xff] }
0x11dc   : > { %v2175_v18 = vadd.f32 %v2171_v22, %v2122_v45  ;;  %v2611_v45 = vrot.slane %v3327_v32, 6 }
0x11dd   : > { %v2227_v38 = vadd.f32 %v2223_v37, %v2174_v42  ;;  %v2454_v52 = vsel %vm2291_vm0, %v2452_v2, %v2453_v28  ;;  %v2506_v37 = vrot.slane %v3324_v59, 6  ;;  %v3325_v42 = vld [vmem:[%s5473_s1 + $0x2f0] sm:$0xff] }
0x11de   : > { %v2228_v7 = vadd.f32 %v2224_v35, %v2175_v18  ;;  %v2558_v22 = vrot.slane %v3325_v42, 6  ;;  %v2665_v18 = vrot.slane %v3330_v17, 6 }
0x11df   : > { %v2280_v8 = vadd.f32 %v2276_v27, %v2227_v38  ;;  %v2507_v39 = vsel %vm2291_vm0, %v2505_v40, %v2506_v37  ;;  %v3328_v27 = vld [vmem:[%s5473_s1 + $0x308] sm:$0xff] }
0x11e0   : > { %v2281_v19 = vadd.f32 %v2277_v63, %v2228_v7  ;;  %v2560_v29 = vsel %vm2291_vm0, %v2558_v22, %v2559_v4  ;;  %v2612_v38 = vrot.slane %v3328_v27, 6  ;;  %v3332_v63 = vld [vmem:[%s5473_s1 + $0x328] sm:$0xff]  ;;  %v2717_v7 = vrot.slane %v3331_v46, 6 }
0x11e1   : > { %v2339_v20 = vadd.f32 %v5004_v62, %v2280_v8  ;;  %v2664_v8 = vrot.slane %v3329_v12, 6 }
0x11e2   : > { %v2340_v5 = vadd.f32 %v5007_v49, %v2281_v19  ;;  %v2613_v35 = vsel %vm2291_vm0, %v2611_v45, %v2612_v38 }
0x11e3   : > { %v2666_v43 = vsel %vm2291_vm0, %v2664_v8, %v2665_v18 }
0x1233   : > { %v2381_v3 = vpop.permute.xlu0 %2380  ;;  %v2383_v47 = vpop.permute.xlu1 %2382 }
0x1234   : > { %v2388_v50 = vsel %vm237_vm3, %v2381_v3, %v2383_v47  ;;  %v3334_v3 = vld [vmem:[%s5473_s1 + $0x338] sm:$0xff]  ;;  %v3333_v47 = vld [vmem:[%s5473_s1 + $0x330] sm:$0xff] }
0x1235   : > { %v5125_v54 = vadd.f32 %v2388_v50, %v2339_v20  ;;  %v2718_v20 = vrot.slane %v3332_v63, 6  ;;  %v2771_v19 = vrot.slane %v3334_v3, 6 }
0x1237   : > { %v2385_v6 = vpop.permute.xlu0 %2384  ;;  %v2387_v57 = vpop.permute.xlu1 %2386  ;;  %v2719_v50 = vsel %vm2291_vm0, %v2717_v7, %v2718_v20 }
0x1238   : > { %v2389_v30 = vsel %vm237_vm3, %v2385_v6, %v2387_v57  ;;  %v3335_v57 = vld [vmem:[%s5473_s1 + $0x340] sm:$0xff] }
0x1239   : > { %v5129_v60 = vadd.f32 %v2389_v30, %v2340_v5  ;;  %v2770_v5 = vrot.slane %v3333_v47, 6  ;;  %v3336_v30 = vld [vmem:[%s5473_s1 + $0x348] sm:$0xff] }
0x123b   : > { %v2403_v55 = vpop.permute.xlu0 %2402  ;;  %v2405_v33 = vpop.permute.xlu1 %2404  ;;  %v2772_v6 = vsel %vm2291_vm0, %v2770_v5, %v2771_v19 }
0x123c   : > { %v2411_v11 = vmul.f32 %v2403_v55, %v4962_v26  ;;  %v2412_v62 = vmul.f32 %v2403_v55, %v4965_v34  ;;  %v2413_v31 = vmul.f32 %v5707_v36, %v2405_v33  ;;  %v2414_v61 = vmul.f32 %v5708_v14, %v2405_v33 }
0x123d   : > { %v2823_v55 = vrot.slane %v3335_v57, 6  ;;  %v2824_v33 = vrot.slane %v3336_v30, 6 }
0x123e   : > { %v2423_v23 = vrot.slane %v2411_v11, 2  ;;  %v2426_v13 = vrot.slane %v2412_v62, 2  ;;  %v2424_v0 = vrot.slane %v2413_v31, 2  ;;  %v2427_v49 = vrot.slane %v2414_v61, 2  ;;  %v3338_v11 = vld [vmem:[%s5473_s1 + $0x358] sm:$0xff]  ;;  %v3337_v62 = vld [vmem:[%s5473_s1 + $0x350] sm:$0xff] }
0x123f   : > { %v2407_v53 = vpop.permute.xlu0 %2406  ;;  %v2825_v31 = vsel %vm2291_vm0, %v2823_v55, %v2824_v33  ;;  %v2877_v61 = vrot.slane %v3338_v11, 6 }
0x1240   : > { %v2415_v56 = vmul.f32 %v2407_v53, %v4978_v41  ;;  %v2416_v48 = vmul.f32 %v2407_v53, %v4981_v21  ;;  %v2428_v24 = vsel %vm2316_vm1, %v2426_v13, %v2427_v49  ;;  %v2425_v51 = vsel %vm2316_vm1, %v2423_v23, %v2424_v0 }
0x1241   : > { %2435 = vrot.lane.b32.xlu0 %v2428_v24, %s5709_s19  ;;  %2433 = vrot.lane.b32.xlu1 %v2425_v51, %s5709_s19  ;;  %v2876_v23 = vrot.slane %v3337_v62, 6  ;;  %v2983_v24 = vrot.slane %v3342_v15, 6 }
0x1242   : > { %v2429_v58 = vrot.slane %v2415_v56, 2  ;;  %v2431_v10 = vrot.slane %v2416_v48, 2  ;;  %v3341_v56 = vld [vmem:[%s5473_s1 + $0x370] sm:$0xff] }
0x1243   : > { %v2878_v13 = vsel %vm2291_vm0, %v2876_v23, %v2877_v61  ;;  %v2982_v51 = vrot.slane %v3341_v56, 6 }
0x1244   : > { %v2432_v1 = vsel %vm2316_vm1, %v2427_v49, %v2431_v10  ;;  %v2430_v25 = vsel %vm2316_vm1, %v2424_v0, %v2429_v58  ;;  %v3339_v0 = vld [vmem:[%s5473_s1 + $0x360] sm:$0xff]  ;;  %v3340_v49 = vld [vmem:[%s5473_s1 + $0x368] sm:$0xff] }
0x1245   : > { %2439 = vrot.lane.b32.xlu0 %v2432_v1, %s5709_s19  ;;  %2437 = vrot.lane.b32.xlu1 %v2430_v25, %s5709_s19  ;;  %s5711_s19 = smov 3   ;;  %v2929_v53 = vrot.slane %v3339_v0, 6  ;;  %v2930_v9 = vrot.slane %v3340_v49, 6  ;;  %v2984_v58 = vsel %vm2291_vm0, %v2982_v51, %v2983_v24 }
0x1247   : > { %v2931_v48 = vsel %vm2291_vm0, %v2929_v53, %v2930_v9 }
0x1249   : > { %2457 = vrot.lane.b32.xlu0 %v2454_v52, %s5710_s22  ;;  %2455 = vrot.lane.b32.xlu1 %v2452_v2, %s5710_s22 }
0x124d   : > { %2508 = vrot.lane.b32.xlu0 %v2505_v40, %s5711_s19  ;;  %2459 = vrot.lane.b32.xlu1 %v2453_v28, %s5710_s22 }
0x1251   : > { %2512 = vrot.lane.b32.xlu0 %v2506_v37, %s5711_s19  ;;  %2510 = vrot.lane.b32.xlu1 %v2507_v39, %s5711_s19 }
0x1255   : > { %2561 = vrot.lane.b32.xlu1 %v2558_v22, %s5712_s5  ;;  %2563 = vrot.lane.b32.xlu0 %v2560_v29, %s5712_s5 }
0x1259   : > { %2565 = vrot.lane.b32.xlu1 %v2559_v4, %s5712_s5  ;;  %2614 = vrot.lane.b32.xlu0 %v2611_v45, %s5666_s25 }
0x125d   : > { %2618 = vrot.lane.b32.xlu0 %v2612_v38, %s5666_s25  ;;  %2616 = vrot.lane.b32.xlu1 %v2613_v35, %s5666_s25 }
0x1261   : > { %2667 = vrot.lane.b32.xlu1 %v2664_v8, %s5668_s6  ;;  %2669 = vrot.lane.b32.xlu0 %v2666_v43, %s5668_s6 }
0x1265   : > { %2671 = vrot.lane.b32.xlu1 %v2665_v18, %s5668_s6  ;;  %2720 = vrot.lane.b32.xlu0 %v2717_v7, %s5670_s9 }
0x1269   : > { %2724 = vrot.lane.b32.xlu0 %v2718_v20, %s5670_s9  ;;  %2722 = vrot.lane.b32.xlu1 %v2719_v50, %s5670_s9 }
0x126d   : > { %2773 = vrot.lane.b32.xlu1 %v2770_v5, %s5577_s18  ;;  %2775 = vrot.lane.b32.xlu0 %v2772_v6, %s5577_s18 }
0x1271   : > { %2777 = vrot.lane.b32.xlu1 %v2771_v19, %s5577_s18  ;;  %2826 = vrot.lane.b32.xlu0 %v2823_v55, %s5583_s15 }
0x1275   : > { %2830 = vrot.lane.b32.xlu0 %v2824_v33, %s5583_s15  ;;  %2828 = vrot.lane.b32.xlu1 %v2825_v31, %s5583_s15 }
0x1279   : > { %2879 = vrot.lane.b32.xlu1 %v2876_v23, %s5589_s14  ;;  %2881 = vrot.lane.b32.xlu0 %v2878_v13, %s5589_s14 }
0x127d   : > { %2883 = vrot.lane.b32.xlu1 %v2877_v61, %s5589_s14  ;;  %2932 = vrot.lane.b32.xlu0 %v2929_v53, %s5595_s11  ;;  %s5713_s14 = smov 124  }
0x1281   : > { %2936 = vrot.lane.b32.xlu0 %v2930_v9, %s5595_s11  ;;  %2934 = vrot.lane.b32.xlu1 %v2931_v48, %s5595_s11  ;;  %s5714_s11 = smov 125  }
0x1285   : > { %2985 = vrot.lane.b32.xlu1 %v2982_v51, %s5600_s10  ;;  %2987 = vrot.lane.b32.xlu0 %v2984_v58, %s5600_s10 }
0x1289   : > { %2989 = vrot.lane.b32.xlu1 %v2983_v24, %s5600_s10 }
0x12b3   : > { %v2436_v10 = vpop.permute.xlu0 %2435  ;;  %v2434_v2 = vpop.permute.xlu1 %2433 }
0x12b4   : > { %v2441_v28 = vsel %vm271_vm4, %v2434_v2, %v2436_v10 }
0x12b5   : > { %v5257_v1 = vadd.f32 %v2441_v28, %v5125_v54 }
0x12b7   : > { %v2440_v25 = vpop.permute.xlu0 %2439  ;;  %v2438_v52 = vpop.permute.xlu1 %2437 }
0x12b8   : > { %v2442_v16 = vsel %vm271_vm4, %v2438_v52, %v2440_v25 }
0x12b9   : > { %v5261_v59 = vadd.f32 %v2442_v16, %v5129_v60 }
0x12bb   : > { %v2458_v40 = vpop.permute.xlu0 %2457  ;;  %v2456_v37 = vpop.permute.xlu1 %2455 }
0x12bc   : > { %v2466_v44 = vmul.f32 %v5707_v36, %v2458_v40  ;;  %v2467_v42 = vmul.f32 %v5708_v14, %v2458_v40  ;;  %v2464_v39 = vmul.f32 %v2456_v37, %v4962_v26  ;;  %v2465_v4 = vmul.f32 %v2456_v37, %v4965_v34 }
0x12be   : > { %v2477_v22 = vrot.slane %v2466_v44, 2  ;;  %v2480_v54 = vrot.slane %v2467_v42, 2  ;;  %v2476_v29 = vrot.slane %v2464_v39, 2  ;;  %v2479_v32 = vrot.slane %v2465_v4, 2 }
0x12bf   : > { %v2509_v27 = vpop.permute.xlu0 %2508  ;;  %v2460_v45 = vpop.permute.xlu1 %2459 }
0x12c0   : > { %v2517_v38 = vmul.f32 %v2509_v27, %v4962_v26  ;;  %v2518_v60 = vmul.f32 %v2509_v27, %v4965_v34  ;;  %v2468_v17 = vmul.f32 %v2460_v45, %v4978_v41  ;;  %v2469_v12 = vmul.f32 %v2460_v45, %v4981_v21 }
0x12c1   : > { %v2481_v35 = vsel %vm2316_vm1, %v2479_v32, %v2480_v54  ;;  %v2478_v18 = vsel %vm2316_vm1, %v2476_v29, %v2477_v22 }
0x12c2   : > { %v2482_v8 = vrot.slane %v2468_v17, 2  ;;  %v2484_v43 = vrot.slane %v2469_v12, 2  ;;  %2488 = vrot.lane.b32.xlu1 %v2481_v35, %s5713_s14  ;;  %2486 = vrot.lane.b32.xlu0 %v2478_v18, %s5713_s14  ;;  %v2529_v7 = vrot.slane %v2517_v38, 2  ;;  %v2532_v20 = vrot.slane %v2518_v60, 2 }
0x12c3   : > { %v2513_v46 = vpop.permute.xlu0 %2512  ;;  %v2511_v63 = vpop.permute.xlu1 %2510 }
0x12c4   : > { %v2519_v3 = vmul.f32 %v5707_v36, %v2511_v63  ;;  %v2520_v47 = vmul.f32 %v5708_v14, %v2511_v63  ;;  %v2521_v50 = vmul.f32 %v2513_v46, %v4978_v41  ;;  %v2522_v19 = vmul.f32 %v2513_v46, %v4981_v21 }
0x12c5   : > { %v2485_v5 = vsel %vm2316_vm1, %v2480_v54, %v2484_v43  ;;  %v2483_v6 = vsel %vm2316_vm1, %v2477_v22, %v2482_v8 }
0x12c6   : > { %v2530_v57 = vrot.slane %v2519_v3, 2  ;;  %v2533_v30 = vrot.slane %v2520_v47, 2  ;;  %2492 = vrot.lane.b32.xlu1 %v2485_v5, %s5713_s14  ;;  %2490 = vrot.lane.b32.xlu0 %v2483_v6, %s5713_s14  ;;  %v2535_v23 = vrot.slane %v2521_v50, 2  ;;  %v2537_v13 = vrot.slane %v2522_v19, 2 }
0x12c7   : > { %v2562_v55 = vpop.permute.xlu1 %2561  ;;  %v2564_v33 = vpop.permute.xlu0 %2563 }
0x12c8   : > { %v2570_v11 = vmul.f32 %v2562_v55, %v4962_v26  ;;  %v2571_v62 = vmul.f32 %v2562_v55, %v4965_v34  ;;  %v2534_v31 = vsel %vm2316_vm1, %v2532_v20, %v2533_v30  ;;  %v2531_v61 = vsel %vm2316_vm1, %v2529_v7, %v2530_v57 }
0x12c9   : > { %v2572_v0 = vmul.f32 %v5707_v36, %v2564_v33  ;;  %v2573_v49 = vmul.f32 %v5708_v14, %v2564_v33  ;;  %v2538_v10 = vsel %vm2316_vm1, %v2533_v30, %v2537_v13  ;;  %v2536_v2 = vsel %vm2316_vm1, %v2530_v57, %v2535_v23 }
0x12ca   : > { %2541 = vrot.lane.b32.xlu1 %v2534_v31, %s5714_s11  ;;  %2539 = vrot.lane.b32.xlu0 %v2531_v61, %s5714_s11  ;;  %v2582_v53 = vrot.slane %v2570_v11, 2  ;;  %v2585_v9 = vrot.slane %v2571_v62, 2 }
0x12cb   : > { %v2583_v15 = vrot.slane %v2572_v0, 2  ;;  %v2586_v56 = vrot.slane %v2573_v49, 2  ;;  %v2566_v48 = vpop.permute.xlu1 %2565  ;;  %v2615_v24 = vpop.permute.xlu0 %2614 }
0x12cc   : > { %v2574_v51 = vmul.f32 %v2566_v48, %v4978_v41  ;;  %v2575_v58 = vmul.f32 %v2566_v48, %v4981_v21  ;;  %v2623_v28 = vmul.f32 %v2615_v24, %v4962_v26  ;;  %v2624_v25 = vmul.f32 %v2615_v24, %v4965_v34 }
0x12cd   : > { %v2587_v52 = vsel %vm2316_vm1, %v2585_v9, %v2586_v56  ;;  %v2584_v16 = vsel %vm2316_vm1, %v2582_v53, %v2583_v15 }
0x12ce   : > { %2545 = vrot.lane.b32.xlu1 %v2538_v10, %s5714_s11  ;;  %2543 = vrot.lane.b32.xlu0 %v2536_v2, %s5714_s11  ;;  %v2588_v39 = vrot.slane %v2574_v51, 2  ;;  %v2590_v4 = vrot.slane %v2575_v58, 2  ;;  %v2635_v22 = vrot.slane %v2623_v28, 2  ;;  %v2638_v54 = vrot.slane %v2624_v25, 2 }
0x12cf   : > { %v2617_v40 = vpop.permute.xlu1 %2616  ;;  %v2619_v37 = vpop.permute.xlu0 %2618 }
0x12d0   : > { %v2625_v44 = vmul.f32 %v5707_v36, %v2617_v40  ;;  %v2626_v42 = vmul.f32 %v5708_v14, %v2617_v40  ;;  %v2627_v38 = vmul.f32 %v2619_v37, %v4978_v41  ;;  %v2628_v60 = vmul.f32 %v2619_v37, %v4981_v21 }
0x12d1   : > { %v2591_v17 = vsel %vm2316_vm1, %v2586_v56, %v2590_v4  ;;  %v2589_v12 = vsel %vm2316_vm1, %v2583_v15, %v2588_v39 }
0x12d2   : > { %2594 = vrot.lane.b32.xlu1 %v2587_v52, %s5665_s7  ;;  %2592 = vrot.lane.b32.xlu0 %v2584_v16, %s5665_s7  ;;  %v2636_v29 = vrot.slane %v2625_v44, 2  ;;  %v2639_v32 = vrot.slane %v2626_v42, 2  ;;  %v2641_v20 = vrot.slane %v2627_v38, 2  ;;  %v2643_v3 = vrot.slane %v2628_v60, 2 }
0x12d3   : > { %v2668_v27 = vpop.permute.xlu1 %2667  ;;  %v2670_v45 = vpop.permute.xlu0 %2669 }
0x12d4   : > { %v2676_v35 = vmul.f32 %v2668_v27, %v4962_v26  ;;  %v2677_v18 = vmul.f32 %v2668_v27, %v4965_v34  ;;  %v2640_v8 = vsel %vm2316_vm1, %v2638_v54, %v2639_v32  ;;  %v2637_v43 = vsel %vm2316_vm1, %v2635_v22, %v2636_v29 }
0x12d5   : > { %v2678_v46 = vmul.f32 %v5707_v36, %v2670_v45  ;;  %v2679_v63 = vmul.f32 %v5708_v14, %v2670_v45  ;;  %v2644_v33 = vsel %vm2316_vm1, %v2639_v32, %v2643_v3  ;;  %v2642_v11 = vsel %vm2316_vm1, %v2636_v29, %v2641_v20 }
0x12d6   : > { %2598 = vrot.lane.b32.xlu1 %v2591_v17, %s5665_s7  ;;  %2596 = vrot.lane.b32.xlu0 %v2589_v12, %s5665_s7  ;;  %v2688_v50 = vrot.slane %v2676_v35, 2  ;;  %v2691_v19 = vrot.slane %v2677_v18, 2 }
0x12d7   : > { %v2672_v7 = vpop.permute.xlu1 %2671  ;;  %v2721_v47 = vpop.permute.xlu0 %2720  ;;  %v2689_v5 = vrot.slane %v2678_v46, 2  ;;  %v2692_v6 = vrot.slane %v2679_v63, 2 }
0x12d8   : > { %v2680_v30 = vmul.f32 %v2672_v7, %v4978_v41  ;;  %v2681_v55 = vmul.f32 %v2672_v7, %v4981_v21  ;;  %v2729_v62 = vmul.f32 %v2721_v47, %v4962_v26  ;;  %v2730_v31 = vmul.f32 %v2721_v47, %v4965_v34 }
0x12d9   : > { %v2693_v61 = vsel %vm2316_vm1, %v2691_v19, %v2692_v6  ;;  %v2690_v23 = vsel %vm2316_vm1, %v2688_v50, %v2689_v5 }
0x12da   : > { %2647 = vrot.lane.b32.xlu1 %v2640_v8, %s5667_s17  ;;  %2645 = vrot.lane.b32.xlu0 %v2637_v43, %s5667_s17  ;;  %v2694_v53 = vrot.slane %v2680_v30, 2  ;;  %v2696_v9 = vrot.slane %v2681_v55, 2  ;;  %v2741_v56 = vrot.slane %v2729_v62, 2  ;;  %v2744_v48 = vrot.slane %v2730_v31, 2 }
0x12db   : > { %v2723_v57 = vpop.permute.xlu1 %2722  ;;  %v2725_v49 = vpop.permute.xlu0 %2724 }
0x12dc   : > { %v2731_v13 = vmul.f32 %v5707_v36, %v2723_v57  ;;  %v2732_v0 = vmul.f32 %v5708_v14, %v2723_v57  ;;  %v2733_v10 = vmul.f32 %v2725_v49, %v4978_v41  ;;  %v2734_v2 = vmul.f32 %v2725_v49, %v4981_v21 }
0x12dd   : > { %v2697_v28 = vsel %vm2316_vm1, %v2692_v6, %v2696_v9  ;;  %v2695_v25 = vsel %vm2316_vm1, %v2689_v5, %v2694_v53 }
0x12de   : > { %2651 = vrot.lane.b32.xlu1 %v2644_v33, %s5667_s17  ;;  %2649 = vrot.lane.b32.xlu0 %v2642_v11, %s5667_s17  ;;  %v2742_v24 = vrot.slane %v2731_v13, 2  ;;  %v2745_v51 = vrot.slane %v2732_v0, 2  ;;  %v2747_v4 = vrot.slane %v2733_v10, 2  ;;  %v2749_v22 = vrot.slane %v2734_v2, 2 }
0x12df   : > { %v2774_v15 = vpop.permute.xlu1 %2773  ;;  %v2776_v58 = vpop.permute.xlu0 %2775 }
0x12e0   : > { %v2782_v52 = vmul.f32 %v2774_v15, %v4962_v26  ;;  %v2783_v16 = vmul.f32 %v2774_v15, %v4965_v34  ;;  %v2746_v40 = vsel %vm2316_vm1, %v2744_v48, %v2745_v51  ;;  %v2743_v37 = vsel %vm2316_vm1, %v2741_v56, %v2742_v24 }
0x12e1   : > { %v2784_v44 = vmul.f32 %v5707_v36, %v2776_v58  ;;  %v2785_v42 = vmul.f32 %v5708_v14, %v2776_v58  ;;  %v2750_v12 = vsel %vm2316_vm1, %v2745_v51, %v2749_v22  ;;  %v2748_v35 = vsel %vm2316_vm1, %v2742_v24, %v2747_v4 }
0x12e2   : > { %2700 = vrot.lane.b32.xlu1 %v2693_v61, %s5669_s4  ;;  %2698 = vrot.lane.b32.xlu0 %v2690_v23, %s5669_s4  ;;  %v2794_v29 = vrot.slane %v2782_v52, 2  ;;  %v2797_v32 = vrot.slane %v2783_v16, 2 }
0x12e3   : > { %v2778_v39 = vpop.permute.xlu1 %2777  ;;  %v2827_v54 = vpop.permute.xlu0 %2826  ;;  %v2795_v27 = vrot.slane %v2784_v44, 2  ;;  %v2798_v45 = vrot.slane %v2785_v42, 2 }
0x12e4   : > { %v2786_v60 = vmul.f32 %v2778_v39, %v4978_v41  ;;  %v2787_v17 = vmul.f32 %v2778_v39, %v4981_v21  ;;  %v2835_v18 = vmul.f32 %v2827_v54, %v4962_v26  ;;  %v2836_v8 = vmul.f32 %v2827_v54, %v4965_v34 }
0x12e5   : > { %v2799_v43 = vsel %vm2316_vm1, %v2797_v32, %v2798_v45  ;;  %v2796_v46 = vsel %vm2316_vm1, %v2794_v29, %v2795_v27 }
0x12e6   : > { %2704 = vrot.lane.b32.xlu1 %v2697_v28, %s5669_s4  ;;  %2702 = vrot.lane.b32.xlu0 %v2695_v25, %s5669_s4  ;;  %v2800_v3 = vrot.slane %v2786_v60, 2  ;;  %v2802_v47 = vrot.slane %v2787_v17, 2  ;;  %v2847_v19 = vrot.slane %v2835_v18, 2  ;;  %v2850_v5 = vrot.slane %v2836_v8, 2 }
0x12e7   : > { %v2829_v38 = vpop.permute.xlu1 %2828  ;;  %v2831_v20 = vpop.permute.xlu0 %2830 }
0x12e8   : > { %v2837_v63 = vmul.f32 %v5707_v36, %v2829_v38  ;;  %v2838_v7 = vmul.f32 %v5708_v14, %v2829_v38  ;;  %v2839_v55 = vmul.f32 %v2831_v20, %v4978_v41  ;;  %v2840_v33 = vmul.f32 %v2831_v20, %v4981_v21 }
0x12e9   : > { %v2803_v11 = vsel %vm2316_vm1, %v2798_v45, %v2802_v47  ;;  %v2801_v62 = vsel %vm2316_vm1, %v2795_v27, %v2800_v3 }
0x12ea   : > { %2753 = vrot.lane.b32.xlu1 %v2746_v40, %s5671_s26  ;;  %2751 = vrot.lane.b32.xlu0 %v2743_v37, %s5671_s26  ;;  %v2848_v6 = vrot.slane %v2837_v63, 2  ;;  %v2851_v57 = vrot.slane %v2838_v7, 2  ;;  %v2853_v9 = vrot.slane %v2839_v55, 2  ;;  %v2855_v15 = vrot.slane %v2840_v33, 2 }
0x12eb   : > { %v2880_v50 = vpop.permute.xlu1 %2879  ;;  %v2882_v30 = vpop.permute.xlu0 %2881 }
0x12ec   : > { %v2888_v31 = vmul.f32 %v2880_v50, %v4962_v26  ;;  %v2889_v61 = vmul.f32 %v2880_v50, %v4965_v34  ;;  %v2852_v23 = vsel %vm2316_vm1, %v2850_v5, %v2851_v57  ;;  %v2849_v13 = vsel %vm2316_vm1, %v2847_v19, %v2848_v6 }
0x12ed   : > { %v2890_v0 = vmul.f32 %v5707_v36, %v2882_v30  ;;  %v2891_v49 = vmul.f32 %v5708_v14, %v2882_v30  ;;  %v2856_v25 = vsel %vm2316_vm1, %v2851_v57, %v2855_v15  ;;  %v2854_v52 = vsel %vm2316_vm1, %v2848_v6, %v2853_v9 }
0x12ee   : > { %2757 = vrot.lane.b32.xlu1 %v2750_v12, %s5671_s26  ;;  %2755 = vrot.lane.b32.xlu0 %v2748_v35, %s5671_s26  ;;  %v2900_v48 = vrot.slane %v2888_v31, 2  ;;  %v2903_v24 = vrot.slane %v2889_v61, 2 }
0x12ef   : > { %v2884_v53 = vpop.permute.xlu1 %2883  ;;  %v2933_v56 = vpop.permute.xlu0 %2932  ;;  %v2901_v51 = vrot.slane %v2890_v0, 2  ;;  %v2904_v58 = vrot.slane %v2891_v49, 2 }
0x12f0   : > { %v2892_v2 = vmul.f32 %v2884_v53, %v4978_v41  ;;  %v2893_v28 = vmul.f32 %v2884_v53, %v4981_v21  ;;  %v2941_v16 = vmul.f32 %v2933_v56, %v4962_v26  ;;  %v2942_v40 = vmul.f32 %v2933_v56, %v4965_v34 }
0x12f1   : > { %v2905_v37 = vsel %vm2316_vm1, %v2903_v24, %v2904_v58  ;;  %v2902_v44 = vsel %vm2316_vm1, %v2900_v48, %v2901_v51 }
0x12f2   : > { %2806 = vrot.lane.b32.xlu1 %v2799_v43, %s5582_s8  ;;  %2804 = vrot.lane.b32.xlu0 %v2796_v46, %s5582_s8  ;;  %v2906_v22 = vrot.slane %v2892_v2, 2  ;;  %v2908_v54 = vrot.slane %v2893_v28, 2  ;;  %v2953_v29 = vrot.slane %v2941_v16, 2  ;;  %v2956_v32 = vrot.slane %v2942_v40, 2 }
0x12f3   : > { %v2935_v10 = vpop.permute.xlu1 %2934  ;;  %v2937_v4 = vpop.permute.xlu0 %2936 }
0x12f4   : > { %v2943_v42 = vmul.f32 %v5707_v36, %v2935_v10  ;;  %v2944_v39 = vmul.f32 %v5708_v14, %v2935_v10  ;;  %v2945_v17 = vmul.f32 %v2937_v4, %v4978_v41  ;;  %v2946_v12 = vmul.f32 %v2937_v4, %v4981_v21 }
0x12f5   : > { %v2909_v35 = vsel %vm2316_vm1, %v2904_v58, %v2908_v54  ;;  %v2907_v18 = vsel %vm2316_vm1, %v2901_v51, %v2906_v22 }
0x12f6   : > { %2810 = vrot.lane.b32.xlu1 %v2803_v11, %s5582_s8  ;;  %2808 = vrot.lane.b32.xlu0 %v2801_v62, %s5582_s8  ;;  %v2954_v27 = vrot.slane %v2943_v42, 2  ;;  %v2957_v45 = vrot.slane %v2944_v39, 2  ;;  %v2959_v3 = vrot.slane %v2945_v17, 2  ;;  %v2961_v47 = vrot.slane %v2946_v12, 2 }
0x12f7   : > { %v2986_v38 = vpop.permute.xlu1 %2985  ;;  %v2988_v60 = vpop.permute.xlu0 %2987 }
0x12f8   : > { %v2994_v8 = vmul.f32 %v2986_v38, %v4962_v26  ;;  %v2995_v43 = vmul.f32 %v2986_v38, %v4965_v34  ;;  %v2958_v46 = vsel %vm2316_vm1, %v2956_v32, %v2957_v45  ;;  %v2955_v63 = vsel %vm2316_vm1, %v2953_v29, %v2954_v27 }
0x12f9   : > { %v2996_v7 = vmul.f32 %v5707_v36, %v2988_v60  ;;  %v2997_v20 = vmul.f32 %v5708_v14, %v2988_v60  ;;  %v2962_v30 = vsel %vm2316_vm1, %v2957_v45, %v2961_v47  ;;  %v2960_v36 = vsel %vm2316_vm1, %v2954_v27, %v2959_v3 }
0x12fa   : > { %2859 = vrot.lane.b32.xlu1 %v2852_v23, %s5588_s29  ;;  %2857 = vrot.lane.b32.xlu0 %v2849_v13, %s5588_s29  ;;  %v3006_v19 = vrot.slane %v2994_v8, 2  ;;  %v3009_v5 = vrot.slane %v2995_v43, 2 }
0x12fb   : > { %v2990_v50 = vpop.permute.xlu1 %2989  ;;  %v3007_v26 = vrot.slane %v2996_v7, 2  ;;  %v3010_v6 = vrot.slane %v2997_v20, 2 }
0x12fc   : > { %v2998_v34 = vmul.f32 %v2990_v50, %v4978_v41  ;;  %v2999_v57 = vmul.f32 %v2990_v50, %v4981_v21 }
0x12fd   : > { %v3011_v14 = vsel %vm2316_vm1, %v3009_v5, %v3010_v6  ;;  %v3008_v55 = vsel %vm2316_vm1, %v3006_v19, %v3007_v26 }
0x12fe   : > { %2863 = vrot.lane.b32.xlu1 %v2856_v25, %s5588_s29  ;;  %2861 = vrot.lane.b32.xlu0 %v2854_v52, %s5588_s29  ;;  %v3012_v33 = vrot.slane %v2998_v34, 2  ;;  %v3014_v11 = vrot.slane %v2999_v57, 2 }
0x1300   : > { %v3015_v41 = vsel %vm2316_vm1, %v3010_v6, %v3014_v11  ;;  %v3013_v21 = vsel %vm2316_vm1, %v3007_v26, %v3012_v33 }
0x1302   : > { %2912 = vrot.lane.b32.xlu1 %v2905_v37, %s5594_s23  ;;  %2910 = vrot.lane.b32.xlu0 %v2902_v44, %s5594_s23 }
0x1306   : > { %2916 = vrot.lane.b32.xlu1 %v2909_v35, %s5594_s23  ;;  %2914 = vrot.lane.b32.xlu0 %v2907_v18, %s5594_s23 }
0x130a   : > { %2965 = vrot.lane.b32.xlu1 %v2958_v46, %s5679_s30  ;;  %2963 = vrot.lane.b32.xlu0 %v2955_v63, %s5679_s30 }
0x130e   : > { %2969 = vrot.lane.b32.xlu1 %v2962_v30, %s5679_s30  ;;  %2967 = vrot.lane.b32.xlu0 %v2960_v36, %s5679_s30 }
0x1312   : > { %3018 = vrot.lane.b32.xlu1 %v3011_v14, %s3431_s24  ;;  %3016 = vrot.lane.b32.xlu0 %v3008_v55, %s3431_s24 }
0x1316   : > { %3022 = vrot.lane.b32.xlu1 %v3015_v41, %s3431_s24  ;;  %3020 = vrot.lane.b32.xlu0 %v3013_v21, %s3431_s24 }
0x1334   : > { %v2487_v62 = vpop.permute.xlu0 %2486  ;;  %v2489_v31 = vpop.permute.xlu1 %2488 }
0x1335   : > { %v2494_v32 = vsel %vm305_vm5, %v2487_v62, %v2489_v31 }
0x1336   : > { %v2498_v60 = vadd.f32 %v2494_v32, %v5257_v1 }
0x1338   : > { %v2491_v61 = vpop.permute.xlu0 %2490  ;;  %v2493_v23 = vpop.permute.xlu1 %2492 }
0x1339   : > { %v2495_v17 = vsel %vm305_vm5, %v2491_v61, %v2493_v23 }
0x133a   : > { %v2499_v63 = vadd.f32 %v2495_v17, %v5261_v59 }
0x133c   : > { %v2540_v13 = vpop.permute.xlu0 %2539  ;;  %v2542_v0 = vpop.permute.xlu1 %2541 }
0x133d   : > { %v2547_v38 = vsel %vm339_vm6, %v2540_v13, %v2542_v0 }
0x133e   : > { %v2551_v35 = vadd.f32 %v2547_v38, %v2498_v60 }
0x1340   : > { %v2544_v49 = vpop.permute.xlu0 %2543  ;;  %v2546_v53 = vpop.permute.xlu1 %2545 }
0x1341   : > { %v2548_v43 = vsel %vm339_vm6, %v2544_v49, %v2546_v53 }
0x1342   : > { %v2552_v47 = vadd.f32 %v2548_v43, %v2499_v63 }
0x1344   : > { %v2593_v9 = vpop.permute.xlu0 %2592  ;;  %v2595_v15 = vpop.permute.xlu1 %2594 }
0x1345   : > { %v2600_v12 = vsel %vm373_vm7, %v2593_v9, %v2595_v15 }
0x1346   : > { %v2604_v7 = vadd.f32 %v2600_v12, %v2551_v35 }
0x1348   : > { %v2597_v56 = vpop.permute.xlu0 %2596  ;;  %v2599_v48 = vpop.permute.xlu1 %2598 }
0x1349   : > { %v2601_v20 = vsel %vm373_vm7, %v2597_v56, %v2599_v48 }
0x134a   : > { %v2605_v6 = vadd.f32 %v2601_v20, %v2552_v47 }
0x134c   : > { %v2646_v24 = vpop.permute.xlu0 %2645  ;;  %v2648_v51 = vpop.permute.xlu1 %2647 }
0x134d   : > { %v2653_v46 = vsel %vm407_vm8, %v2646_v24, %v2648_v51 }
0x134e   : > { %v2657_v1 = vadd.f32 %v2653_v46, %v2604_v7 }
0x1350   : > { %v2650_v58 = vpop.permute.xlu0 %2649  ;;  %v2652_v10 = vpop.permute.xlu1 %2651 }
0x1351   : > { %v2654_v5 = vsel %vm407_vm8, %v2650_v58, %v2652_v10 }
0x1352   : > { %v2658_v59 = vadd.f32 %v2654_v5, %v2605_v6 }
0x1354   : > { %v2699_v2 = vpop.permute.xlu0 %2698  ;;  %v2701_v28 = vpop.permute.xlu1 %2700 }
0x1355   : > { %v2706_v3 = vsel %vm441_vm9, %v2699_v2, %v2701_v28 }
0x1356   : > { %v2710_v34 = vadd.f32 %v2706_v3, %v2657_v1 }
0x1358   : > { %v2703_v25 = vpop.permute.xlu0 %2702  ;;  %v2705_v52 = vpop.permute.xlu1 %2704 }
0x1359   : > { %v2707_v57 = vsel %vm441_vm9, %v2703_v25, %v2705_v52 }
0x135a   : > { %v2711_v41 = vadd.f32 %v2707_v57, %v2658_v59 }
0x135c   : > { %v2752_v16 = vpop.permute.xlu0 %2751  ;;  %v2754_v40 = vpop.permute.xlu1 %2753 }
0x135d   : > { %v2759_v26 = vsel %vm475_vm10, %v2752_v16, %v2754_v40  ;;  %v5715_v40 = vld [vmem:[#allocation2_spill] sm:$0xff] }
0x135e   : > { %v2763_v36 = vadd.f32 %v2759_v26, %v2710_v34 }
0x1360   : > { %v2756_v37 = vpop.permute.xlu0 %2755  ;;  %v2758_v44 = vpop.permute.xlu1 %2757 }
0x1361   : > { %v2760_v33 = vsel %vm475_vm10, %v2756_v37, %v2758_v44 }
0x1362   : > { %v2764_v61 = vadd.f32 %v2760_v33, %v2711_v41 }
0x1364   : > { %v2805_v42 = vpop.permute.xlu0 %2804  ;;  %v2807_v39 = vpop.permute.xlu1 %2806 }
0x1365   : > { %v2812_v30 = vsel %vm509_vm11, %v2805_v42, %v2807_v39 }
0x1366   : > { %v2816_v21 = vadd.f32 %v2812_v30, %v2763_v36 }
0x1368   : > { %v2809_v4 = vpop.permute.xlu0 %2808  ;;  %v2811_v22 = vpop.permute.xlu1 %2810 }
0x1369   : > { %v2813_v62 = vsel %vm509_vm11, %v2809_v4, %v2811_v22 }
0x136a   : > { %v2817_v9 = vadd.f32 %v2813_v62, %v2764_v61 }
0x136c   : > { %v2858_v54 = vpop.permute.xlu0 %2857  ;;  %v2860_v29 = vpop.permute.xlu1 %2859 }
0x136d   : > { %v2865_v11 = vsel %vm543_vm12, %v2858_v54, %v2860_v29 }
0x136e   : > { %v2869_v23 = vadd.f32 %v2865_v11, %v2816_v21 }
0x1370   : > { %v2862_v27 = vpop.permute.xlu0 %2861  ;;  %v2864_v45 = vpop.permute.xlu1 %2863 }
0x1371   : > { %v2866_v49 = vsel %vm543_vm12, %v2862_v27, %v2864_v45 }
0x1372   : > { %v2870_v48 = vadd.f32 %v2866_v49, %v2817_v9 }
0x1374   : > { %v2911_v18 = vpop.permute.xlu0 %2910  ;;  %v2913_v8 = vpop.permute.xlu1 %2912 }
0x1375   : > { %v2918_v31 = vsel %vm577_vm13, %v2911_v18, %v2913_v8 }
0x1376   : > { %v2922_v15 = vadd.f32 %v2918_v31, %v2869_v23 }
0x1378   : > { %v2915_v50 = vpop.permute.xlu0 %2914  ;;  %v2917_v19 = vpop.permute.xlu1 %2916 }
0x1379   : > { %v2919_v56 = vsel %vm577_vm13, %v2915_v50, %v2917_v19 }
0x137a   : > { %v2923_v28 = vadd.f32 %v2919_v56, %v2870_v48 }
0x137c   : > { %v2964_v14 = vpop.permute.xlu0 %2963  ;;  %v2966_v55 = vpop.permute.xlu1 %2965 }
0x137d   : > { %v2971_v53 = vsel %vm611_vm14, %v2964_v14, %v2966_v55 }
0x137e   : > { %v2975_v24 = vadd.f32 %v2971_v53, %v2922_v15 }
0x1380   : > { %v2968_v13 = vpop.permute.xlu0 %2967  ;;  %v2970_v0 = vpop.permute.xlu1 %2969 }
0x1381   : > { %v2972_v10 = vsel %vm611_vm14, %v2968_v13, %v2970_v0 }
0x1382   : > { %v2976_v52 = vadd.f32 %v2972_v10, %v2923_v28 }
0x1384   : > { %v3017_v51 = vpop.permute.xlu0 %3016  ;;  %v3019_v58 = vpop.permute.xlu1 %3018 }
0x1385   : > { %v3024_v2 = vsel %vm645_vm15, %v3017_v51, %v3019_v58 }
0x1386   : > { %v3028_v25 = vadd.f32 %v3024_v2, %v2975_v24 }
0x1388   : > { %v3032_v16 = vcombine.high %v3028_v25, %v3028_v25  ;;  %v3039_v37 = vrot.slane %v3028_v25, %v5715_v40  ;;  %v3021_v44 = vpop.permute.xlu0 %3020  ;;  %v3023_v42 = vpop.permute.xlu1 %3022 }
0x1389   : > { %v3025_v39 = vsel %vm645_vm15, %v3021_v44, %v3023_v42 }
0x138a   : > { %v3046_v4 = vrot.slane %v3032_v16, %v5715_v40  ;;  %v3047_v22 = vcombine.high %v3039_v37, %v3039_v37  ;;  %v3055_v54 = vrot.slane %v3039_v37, %v5715_v40  ;;  %3343 = vst.sshfl [vmem:[%s4464_s13 + $0x1] sm:$0x1 pattern:$0x73625140] %v3039_v37  ;;  %v3029_v29 = vadd.f32 %v3025_v39, %v2976_v52 }
0x138c   : > { %v3048_v32 = vcombine.high %v3046_v4, %v3046_v4  ;;  %v3062_v27 = vrot.slane %v3046_v4, %v5715_v40  ;;  %v3069_v45 = vrot.slane %v3047_v22, %v5715_v40  ;;  %v3077_v38 = vcombine.high %v3055_v54, %v3055_v54  ;;  %3344 = vst.sshfl [vmem:[%s4464_s13 + $0x3] sm:$0x1 pattern:$0x73625140] %v3047_v22 }
0x138d   : > { %3345 = vst.sshfl [vmem:[%s4464_s13 + $0x9] sm:$0x1 pattern:$0x73625140] %v3046_v4  ;;  %v3081_v60 = vcombine.high %v3029_v29, %v3029_v29  ;;  %v3088_v17 = vrot.slane %v3029_v29, %v5715_v40 }
0x138e   : > { %v3076_v12 = vrot.slane %v3048_v32, %v5715_v40  ;;  %v3078_v35 = vcombine.high %v3062_v27, %v3062_v27  ;;  %v3079_v18 = vcombine.high %v3069_v45, %v3069_v45  ;;  %3148 = vst [vmem:[%s4464_s13 + $0x5] sm:$0x1] %v3077_v38  ;;  %3346 = vst.sshfl [vmem:[%s4464_s13 + $0xb] sm:$0x1 pattern:$0x73625140] %v3048_v32 }
0x138f   : > { %v3095_v8 = vrot.slane %v3081_v60, %v5715_v40  ;;  %v3096_v43 = vcombine.high %v3088_v17, %v3088_v17  ;;  %v3104_v46 = vrot.slane %v3088_v17, %v5715_v40  ;;  %3347 = vst.sshfl [vmem:[%s4464_s13 + $0x11] sm:$0x1 pattern:$0x73625140] %v3088_v17 }
0x1390   : > { %v3080_v63 = vcombine.high %v3076_v12, %v3076_v12  ;;  %3149 = vst [vmem:[%s4464_s13 + $0x7] sm:$0x1] %v3079_v18  ;;  %3152 = vst [vmem:[%s4464_s13 + $0xd] sm:$0x1] %v3078_v35 }
0x1391   : > { %v3097_v7 = vcombine.high %v3095_v8, %v3095_v8  ;;  %v3111_v20 = vrot.slane %v3095_v8, %v5715_v40  ;;  %v3118_v3 = vrot.slane %v3096_v43, %v5715_v40  ;;  %v3126_v47 = vcombine.high %v3104_v46, %v3104_v46  ;;  %3348 = vst.sshfl [vmem:[%s4464_s13 + $0x13] sm:$0x1 pattern:$0x73625140] %v3096_v43 }
0x1392   : > { %3349 = vst.sshfl [vmem:[%s4464_s13 + $0x19] sm:$0x1 pattern:$0x73625140] %v3095_v8  ;;  %3153 = vst [vmem:[%s4464_s13 + $0xf] sm:$0x1] %v3080_v63 }
0x1393   : > { %v3125_v1 = vrot.slane %v3097_v7, %v5715_v40  ;;  %v3127_v50 = vcombine.high %v3111_v20, %v3111_v20  ;;  %v3128_v19 = vcombine.high %v3118_v3, %v3118_v3  ;;  %3156 = vst [vmem:[%s4464_s13 + $0x15] sm:$0x1] %v3126_v47  ;;  %3350 = vst.sshfl [vmem:[%s4464_s13 + $0x1b] sm:$0x1 pattern:$0x73625140] %v3097_v7 }
0x1395   : > { %v3129_v5 = vcombine.high %v3125_v1, %v3125_v1  ;;  %3157 = vst [vmem:[%s4464_s13 + $0x17] sm:$0x1] %v3128_v19  ;;  %3160 = vst [vmem:[%s4464_s13 + $0x1d] sm:$0x1] %v3127_v50 }
0x1397   : > { %3161 = vst [vmem:[%s4464_s13 + $0x1f] sm:$0x1] %v3129_v5 }
0x1398 PF: > { %s13_s12 = sadd.s32 1, %s3402_s12  }
0x1399   : > { %p10_p4 = scmp.ge.s32.totalorder %s13_s12, 4  }
0x139b   :  { %12 = sbr.rel (!%p10_p4) target bundleno = 1 (0x1), region = 117 }

</bundles_post_ra>
